<compile_context>
chip_gen: v7x
topology: tpu7x:2x2x1
jax: 0.10.0
libtpu: 0.0.40
codegen_flags: <defaults>
</compile_context>

<pallas_src>
import jax
import jax.numpy as jnp
from jax import lax
from jax.experimental import pallas as pl
from jax.experimental.pallas import tpu as pltpu

HIDDEN = 64        # GRU hidden_size
MLP_HIDDEN = 32    # linear1 output width
GRU_LAYERS = 2     # fixed (two fused GRU layers in the kernel)
GATE_PAD = 128     # each 64-wide gate padded to 128 output lanes
UNROLL_T_MAX = 16  # full Python unroll of the time loop up to this T


def value_network_kernel(
    x_ref,       # (T*bb, F)    bf16, time-major within the batch block
    w0i_ref,     # (F, 384)     bf16  layer-0 input weights, gates [r|z|n] 128-padded
    b0i_ref,     # (1, 384)     f32   [b_ir+b_hr | b_iz+b_hz | b_in]
    w0h_ref,     # (128, 384)   bf16  layer-0 hidden weights (rows 64: zero)
    b0h_ref,     # (1, 384)     f32   [0 | 0 | b_hn]
    w1i_ref,     # (128, 384)   bf16  layer-1 input weights
    b1i_ref,     # (1, 384)     f32
    w1h_ref,     # (128, 384)   bf16  layer-1 hidden weights
    b1h_ref,     # (1, 384)     f32
    w1a_ref,     # (128, 32)    bf16  hidden2nn.w[0,0] * linear1.W^T (rows 64: zero)
    w1b_ref,     # (128, 32)    bf16  hidden2nn.w[0,1] * linear1.W^T
    b1eff_ref,   # (1, 32)      f32   linear1.b + hidden2nn.b * colsum(linear1.W^T)
    w2_ref,      # (32, 1)      bf16
    b2_ref,      # (1, 1)       f32
    out_ref,     # (bb, 1)      f32
    gi0_ref,     # VMEM scratch (T*bb, 384) f32 : layer-0 input projections
):
    TB = x_ref.shape[0]
    bb = out_ref.shape[0]
    T = TB // bb
    GP = GATE_PAD
    f32 = jnp.float32
    bf16 = jnp.bfloat16

    # Layer-0 input projections for all timesteps: ONE fused (T*bb,F)@(F,384)
    # matmul + one fused bias add, off the serialized recurrence path.
    gi0_ref[...] = (
        jnp.dot(x_ref[...], w0i_ref[...], preferred_element_type=f32)
        + b0i_ref[...])

    def gru_step(h0, h1, lo):
        # h0, h1: f32 (bb, 128); padding lanes [64:128) are exactly zero.
        gi0 = gi0_ref[pl.ds(lo, bb), :]                          # (bb, 384)

        # ---- layer 0: single gate-fused hidden matmul ----
        gh0 = (jnp.dot(h0.astype(bf16), w0h_ref[...],
                       preferred_element_type=f32) + b0h_ref[...])
        rz0 = jax.nn.sigmoid(gi0[:, :2 * GP] + gh0[:, :2 * GP])  # r||z slab
        n0 = jnp.tanh(gi0[:, 2 * GP:] + rz0[:, :GP] * gh0[:, 2 * GP:])
        h0 = n0 + rz0[:, GP:] * (h0 - n0)

        # ---- layer 1 (consumes h0 at the same timestep): two fused matmuls ----
        gi1 = (jnp.dot(h0.astype(bf16), w1i_ref[...],
                       preferred_element_type=f32) + b1i_ref[...])
        gh1 = (jnp.dot(h1.astype(bf16), w1h_ref[...],
                       preferred_element_type=f32) + b1h_ref[...])
        rz1 = jax.nn.sigmoid(gi1[:, :2 * GP] + gh1[:, :2 * GP])
        n1 = jnp.tanh(gi1[:, 2 * GP:] + rz1[:, :GP] * gh1[:, 2 * GP:])
        h1 = n1 + rz1[:, GP:] * (h1 - n1)
        return h0, h1

    h0 = jnp.zeros((bb, GP), f32)
    h1 = jnp.zeros((bb, GP), f32)

    if T <= UNROLL_T_MAX:
        # Fully unrolled at trace time: scheduler interleaves the three MXU
        # pushes with VPU/EUP gate math across timesteps.
        for t in range(T):
            h0, h1 = gru_step(h0, h1, t * bb)
    else:
        # Bounded live ranges / trace size for long sequences.
        def body(t, carry):
            return gru_step(carry[0], carry[1], pl.multiple_of(t * bb, 8))
        h0, h1 = lax.fori_loop(0, T, body, (h0, h1))

    # ---- head: tanh(h_n); hidden2nn folded into linear1; then linear2 ----
    t0 = jnp.tanh(h0).astype(bf16)   # padding lanes stay 0 (tanh(0) = 0)
    t1 = jnp.tanh(h1).astype(bf16)
    hmid = jnp.tanh(
        jnp.dot(t0, w1a_ref[...], preferred_element_type=f32)
        + jnp.dot(t1, w1b_ref[...], preferred_element_type=f32)
        + b1eff_ref[...])                                        # (bb, 32)
    out_ref[...] = (jnp.dot(hmid.astype(bf16), w2_ref[...],
                            preferred_element_type=f32) + b2_ref[...])


def _pick_batch_block(b_pad):
    """Largest multiple-of-8 divisor of b_pad, capped at 256; once b_pad >= 16
    also cap at b_pad//2 so nb >= 2 and both v7x TensorCores get work."""
    cap = min(256, b_pad if b_pad < 16 else b_pad // 2)
    best = 8
    d = 8
    while d <= cap:
        if b_pad % d == 0:
            best = d
        d += 8
    return best


def _prepare_kernel_params(raw):
    """Gate-fused, 128-lane-padded, bf16 weight layouts + folded biases/head."""
    H = HIDDEN
    GP = GATE_PAD
    f32 = jnp.float32
    bf16 = jnp.bfloat16

    def fuse_gates(w, in_pad):
        # torch (3H, in_dim), gate order [r, z, n] -> (in_pad, 3*GP) bf16,
        # each gate's H columns start at a 128-lane boundary; extra rows/cols 0.
        in_dim = w.shape[1]
        out = jnp.zeros((in_pad, 3 * GP), f32)
        for g in range(3):
            out = out.at[:in_dim, g * GP:g * GP + H].set(w[g * H:(g + 1) * H, :].T)
        return out.astype(bf16)

    def fuse_bias(vals):
        # list of three length-H vectors (or None -> zeros) -> (1, 3*GP) f32
        out = jnp.zeros((1, 3 * GP), f32)
        for g, v in enumerate(vals):
            if v is not None:
                out = out.at[0, g * GP:g * GP + H].set(v)
        return out

    def g(vec, i):
        return vec[i * H:(i + 1) * H]

    b_ih0, b_hh0 = raw["bias_ih_l0"], raw["bias_hh_l0"]
    b_ih1, b_hh1 = raw["bias_ih_l1"], raw["bias_hh_l1"]

    # Fold hidden2nn (Linear(2,1)) into linear1:
    # (a*t0 + b*t1 + c) @ W1^T + b1 == t0@(a*W1^T) + t1@(b*W1^T) + (b1 + c*colsum(W1^T))
    w1_t = raw["linear1_w"].T                                   # (H, 32)
    a = raw["hidden2nn_w"][0, 0]
    b = raw["hidden2nn_w"][0, 1]
    c = raw["hidden2nn_b"][0]
    w1a = jnp.zeros((GP, MLP_HIDDEN), f32).at[:H].set(a * w1_t).astype(bf16)
    w1b = jnp.zeros((GP, MLP_HIDDEN), f32).at[:H].set(b * w1_t).astype(bf16)

    return {
        "w0i": fuse_gates(raw["weight_ih_l0"], raw["weight_ih_l0"].shape[1]),
        "b0i": fuse_bias([g(b_ih0, 0) + g(b_hh0, 0),
                          g(b_ih0, 1) + g(b_hh0, 1),
                          g(b_ih0, 2)]),
        "w0h": fuse_gates(raw["weight_hh_l0"], GP),
        "b0h": fuse_bias([None, None, g(b_hh0, 2)]),
        "w1i": fuse_gates(raw["weight_ih_l1"], GP),
        "b1i": fuse_bias([g(b_ih1, 0) + g(b_hh1, 0),
                          g(b_ih1, 1) + g(b_hh1, 1),
                          g(b_ih1, 2)]),
        "w1h": fuse_gates(raw["weight_hh_l1"], GP),
        "b1h": fuse_bias([None, None, g(b_hh1, 2)]),
        "w1a": w1a,
        "w1b": w1b,
        "b1eff": (raw["linear1_b"] + c * jnp.sum(w1_t, axis=0)).reshape(1, -1).astype(f32),
        "w2": raw["linear2_w"].T.astype(bf16),                  # (32, 1)
        "b2": raw["linear2_b"].reshape(1, 1).astype(f32),       # (1, 1)
    }


def value_network_forward(state, raw_params, batch_block=None):
    """state: (B, T, F) batch_first, like the PyTorch module. Returns (B, 1) f32."""
    B, T, F = state.shape
    p = _prepare_kernel_params(raw_params)

    # Pad batch to a multiple of 8 so every batch block is sublane-aligned.
    b_pad = ((B + 7) // 8) * 8
    if b_pad != B:
        state = jnp.concatenate(
            [state, jnp.zeros((b_pad - B, T, F), state.dtype)], axis=0)

    bb = batch_block or _pick_batch_block(b_pad)
    assert bb % 8 == 0 and b_pad % bb == 0, (b_pad, bb)
    nb = b_pad // bb

    # Time-major within each batch block: (nb, T*bb, F), rows ordered
    # [t0 block, t1 block, ...]; cast to bf16 for the MXU (halves x DMA).
    xt = jnp.transpose(state, (1, 0, 2))                         # (T, B_pad, F)
    xt = (xt.reshape(T, nb, bb, F).transpose(1, 0, 2, 3)
            .reshape(nb, T * bb, F).astype(jnp.bfloat16))

    weights = (p["w0i"], p["b0i"], p["w0h"], p["b0h"],
               p["w1i"], p["b1i"], p["w1h"], p["b1h"],
               p["w1a"], p["w1b"], p["b1eff"], p["w2"], p["b2"])

    def full_spec(arr):
        nd = arr.ndim
        return pl.BlockSpec(arr.shape, lambda i, _nd=nd: (0,) * _nd)

    in_specs = [pl.BlockSpec((None, T * bb, F), lambda i: (i, 0, 0))]
    in_specs += [full_spec(w) for w in weights]

    out = pl.pallas_call(
        value_network_kernel,
        out_shape=jax.ShapeDtypeStruct((b_pad, 1), jnp.float32),
        grid=(nb,),
        in_specs=in_specs,
        # NOTE: (bb, 1) store is masked (last dim 1) but bytes are tiny; the
        # lane-dense-output rework is deliberately skipped (low priority).
        out_specs=pl.BlockSpec((bb, 1), lambda i: (i, 0)),
        scratch_shapes=[pltpu.VMEM((T * bb, 3 * GATE_PAD), jnp.float32)],
        compiler_params=pltpu.CompilerParams(
            dimension_semantics=("parallel",),
            vmem_limit_bytes=32 * 1024 * 1024),
    )(xt, *weights)
    return out[:B]


def init_params(key, num_features, hidden_size=HIDDEN):
    """Deterministic PyTorch-style uniform(-1/sqrt(fan), 1/sqrt(fan)) init,
    kept in raw PyTorch layout (gate order [r, z, n] on the 3H axis)."""
    H = hidden_size
    keys = jax.random.split(key, 14)

    def u(kk, shape, bound):
        return jax.random.uniform(kk, shape, jnp.float32, -bound, bound)

    kH = H ** -0.5
    params = {
        "weight_ih_l0": u(keys[0], (3 * H, num_features), kH),
        "weight_hh_l0": u(keys[1], (3 * H, H), kH),
        "bias_ih_l0": u(keys[2], (3 * H,), kH),
        "bias_hh_l0": u(keys[3], (3 * H,), kH),
        "weight_ih_l1": u(keys[4], (3 * H, H), kH),
        "weight_hh_l1": u(keys[5], (3 * H, H), kH),
        "bias_ih_l1": u(keys[6], (3 * H,), kH),
        "bias_hh_l1": u(keys[7], (3 * H,), kH),
    }
    kL = GRU_LAYERS ** -0.5
    params["hidden2nn_w"] = u(keys[8], (1, GRU_LAYERS), kL)      # Linear(2, 1)
    params["hidden2nn_b"] = u(keys[9], (1,), kL)
    params["linear1_w"] = u(keys[10], (MLP_HIDDEN, H), kH)       # Linear(H, 32)
    params["linear1_b"] = u(keys[11], (MLP_HIDDEN,), kH)
    k2 = MLP_HIDDEN ** -0.5
    params["linear2_w"] = u(keys[12], (1, MLP_HIDDEN), k2)       # Linear(32, 1)
    params["linear2_b"] = u(keys[13], (1,), k2)
    return params


def reference_forward(state, raw):
    """Pure-JAX f32 reference of the PyTorch forward (same math, no Pallas)."""
    B, T, F = state.shape
    H = HIDDEN

    def cell(x_t, h, w_ih, w_hh, b_ih, b_hh):
        gi = x_t @ w_ih.T + b_ih
        gh = h @ w_hh.T + b_hh
        r = jax.nn.sigmoid(gi[:, :H] + gh[:, :H])
        z = jax.nn.sigmoid(gi[:, H:2 * H] + gh[:, H:2 * H])
        n = jnp.tanh(gi[:, 2 * H:] + r * gh[:, 2 * H:])
        return (1.0 - z) * n + z * h

    xt = jnp.transpose(state, (1, 0, 2))
    h0 = jnp.zeros((B, H), jnp.float32)
    h1 = jnp.zeros((B, H), jnp.float32)
    seq0 = []
    for t in range(T):
        h0 = cell(xt[t], h0, raw["weight_ih_l0"], raw["weight_hh_l0"],
                  raw["bias_ih_l0"], raw["bias_hh_l0"])
        seq0.append(h0)
    for t in range(T):
        h1 = cell(seq0[t], h1, raw["weight_ih_l1"], raw["weight_hh_l1"],
                  raw["bias_ih_l1"], raw["bias_hh_l1"])

    x = jnp.stack([jnp.tanh(h0), jnp.tanh(h1)], axis=-1)         # (B, H, 2)
    x = (x @ raw["hidden2nn_w"].T + raw["hidden2nn_b"])[..., 0]  # (B, H)
    x = jnp.tanh(x @ raw["linear1_w"].T + raw["linear1_b"])      # (B, 32)
    return x @ raw["linear2_w"].T + raw["linear2_b"]             # (B, 1)


if __name__ == "__main__":
    key = jax.random.PRNGKey(0)
    B, T, F = 8, 8, 16                             # batch, seq, num_features
    k_x, k_p = jax.random.split(key)
    state = jax.random.normal(k_x, (B, T, F), jnp.float32)
    params = init_params(k_p, F)

    out = value_network_forward(state, params)
    out = jax.block_until_ready(out)

    ref = reference_forward(state, params)
    assert out.shape == (B, 1), out.shape
    # Tolerance loosened vs the f32 reference: MXU operands are bf16.
    assert jnp.allclose(out, ref, atol=5e-2, rtol=5e-2), (out, ref)
    print("KERNEL_OK")
</pallas_src>

<mosaic_0001>
module attributes {stable_mosaic.version = 11 : i64} {
  func.func @value_network_kernel(%arg0: i32, %arg1: memref<1x64x16xbf16, #tpu.memory_space<vmem>>, %arg2: memref<16x384xbf16, #tpu.memory_space<vmem>>, %arg3: memref<1x384xf32, #tpu.memory_space<vmem>>, %arg4: memref<128x384xbf16, #tpu.memory_space<vmem>>, %arg5: memref<1x384xf32, #tpu.memory_space<vmem>>, %arg6: memref<128x384xbf16, #tpu.memory_space<vmem>>, %arg7: memref<1x384xf32, #tpu.memory_space<vmem>>, %arg8: memref<128x384xbf16, #tpu.memory_space<vmem>>, %arg9: memref<1x384xf32, #tpu.memory_space<vmem>>, %arg10: memref<128x32xbf16, #tpu.memory_space<vmem>>, %arg11: memref<128x32xbf16, #tpu.memory_space<vmem>>, %arg12: memref<1x32xf32, #tpu.memory_space<vmem>>, %arg13: memref<32x1xbf16, #tpu.memory_space<vmem>>, %arg14: memref<1x1xf32, #tpu.memory_space<vmem>>, %arg15: memref<8x1xf32, #tpu.memory_space<vmem>>, %arg16: memref<64x384xf32, #tpu.memory_space<vmem>>) attributes {dimension_semantics = [#tpu.dimension_semantics<parallel>], iteration_bounds = array<i64: 1>, scalar_prefetch = 0 : i64, scratch_operands = 1 : i64, tpu.core_type = #tpu.core_type<tc>, window_params = [{transform_indices = @transform_0, window_bounds = array<i64: 1, 64, 16>}, {pipeline_mode = #tpu.pipeline_mode<synchronous>, transform_indices = @transform_1, window_bounds = array<i64: 16, 384>}, {pipeline_mode = #tpu.pipeline_mode<synchronous>, transform_indices = @transform_2, window_bounds = array<i64: 1, 384>}, {pipeline_mode = #tpu.pipeline_mode<synchronous>, transform_indices = @transform_3, window_bounds = array<i64: 128, 384>}, {pipeline_mode = #tpu.pipeline_mode<synchronous>, transform_indices = @transform_4, window_bounds = array<i64: 1, 384>}, {pipeline_mode = #tpu.pipeline_mode<synchronous>, transform_indices = @transform_5, window_bounds = array<i64: 128, 384>}, {pipeline_mode = #tpu.pipeline_mode<synchronous>, transform_indices = @transform_6, window_bounds = array<i64: 1, 384>}, {pipeline_mode = #tpu.pipeline_mode<synchronous>, transform_indices = @transform_7, window_bounds = array<i64: 128, 384>}, {pipeline_mode = #tpu.pipeline_mode<synchronous>, transform_indices = @transform_8, window_bounds = array<i64: 1, 384>}, {pipeline_mode = #tpu.pipeline_mode<synchronous>, transform_indices = @transform_9, window_bounds = array<i64: 128, 32>}, {pipeline_mode = #tpu.pipeline_mode<synchronous>, transform_indices = @transform_10, window_bounds = array<i64: 128, 32>}, {pipeline_mode = #tpu.pipeline_mode<synchronous>, transform_indices = @transform_11, window_bounds = array<i64: 1, 32>}, {pipeline_mode = #tpu.pipeline_mode<synchronous>, transform_indices = @transform_12, window_bounds = array<i64: 32, 1>}, {pipeline_mode = #tpu.pipeline_mode<synchronous>, transform_indices = @transform_13, window_bounds = array<i64: 1, 1>}, {transform_indices = @transform_14, window_bounds = array<i64: 8, 1>}]} {
    %c0 = arith.constant 0 : index
    %c0_0 = arith.constant 0 : index
    %c0_1 = arith.constant 0 : index
    %0 = vector.load %arg1[%c0, %c0_0, %c0_1] : memref<1x64x16xbf16, #tpu.memory_space<vmem>>, vector<1x64x16xbf16>
    %1 = vector.shape_cast %0 : vector<1x64x16xbf16> to vector<64x16xbf16>
    %c0_2 = arith.constant 0 : index
    %c0_3 = arith.constant 0 : index
    %2 = vector.load %arg2[%c0_2, %c0_3] : memref<16x384xbf16, #tpu.memory_space<vmem>>, vector<16x384xbf16>
    %cst = arith.constant dense<0.000000e+00> : vector<64x384xf32>
    %3 = tpu.matmul %1, %2, %cst {dimension_numbers = #tpu.dot_dimension_numbers<[1], [0], [0], [1], [0, 0, 1, 1], [], []>} : vector<64x16xbf16>, vector<16x384xbf16>, vector<64x384xf32> -> vector<64x384xf32>
    %c0_4 = arith.constant 0 : index
    %c0_5 = arith.constant 0 : index
    %4 = vector.load %arg3[%c0_4, %c0_5] : memref<1x384xf32, #tpu.memory_space<vmem>>, vector<1x384xf32>
    %5 = vector.broadcast %4 : vector<1x384xf32> to vector<64x384xf32>
    %6 = arith.addf %3, %5 : vector<64x384xf32>
    %c0_6 = arith.constant 0 : index
    %c0_7 = arith.constant 0 : index
    %7 = vector.load %arg16[%c0_6, %c0_7] : memref<64x384xf32, #tpu.memory_space<vmem>>, vector<64x384xf32>
    tpu.vector_store %arg16[%c0_6, %c0_7], %6 {strides = array<i32>} : memref<64x384xf32, #tpu.memory_space<vmem>>, vector<64x384xf32>,
    %cst_8 = arith.constant 0.000000e+00 : f32
    %8 = vector.broadcast %cst_8 : f32 to vector<8x128xf32>
    %cst_9 = arith.constant 0.000000e+00 : f32
    %9 = vector.broadcast %cst_9 : f32 to vector<8x128xf32>
    %c0_10 = arith.constant 0 : index
    %c0_11 = arith.constant 0 : index
    %10 = vector.load %arg16[%c0_10, %c0_11] : memref<64x384xf32, #tpu.memory_space<vmem>>, vector<8x384xf32>
    %11 = arith.truncf %8 : vector<8x128xf32> to vector<8x128xbf16>
    %c0_12 = arith.constant 0 : index
    %c0_13 = arith.constant 0 : index
    %12 = vector.load %arg4[%c0_12, %c0_13] : memref<128x384xbf16, #tpu.memory_space<vmem>>, vector<128x384xbf16>
    %cst_14 = arith.constant dense<0.000000e+00> : vector<8x384xf32>
    %13 = tpu.matmul %11, %12, %cst_14 {dimension_numbers = #tpu.dot_dimension_numbers<[1], [0], [0], [1], [0, 0, 1, 1], [], []>} : vector<8x128xbf16>, vector<128x384xbf16>, vector<8x384xf32> -> vector<8x384xf32>
    %c0_15 = arith.constant 0 : index
    %c0_16 = arith.constant 0 : index
    %14 = vector.load %arg5[%c0_15, %c0_16] : memref<1x384xf32, #tpu.memory_space<vmem>>, vector<1x384xf32>
    %15 = vector.broadcast %14 : vector<1x384xf32> to vector<8x384xf32>
    %16 = arith.addf %13, %15 : vector<8x384xf32>
    %17 = vector.extract_strided_slice %10 {offsets = [0, 0], sizes = [8, 256], strides = [1, 1]} : vector<8x384xf32> to vector<8x256xf32>
    %18 = vector.extract_strided_slice %16 {offsets = [0, 0], sizes = [8, 256], strides = [1, 1]} : vector<8x384xf32> to vector<8x256xf32>
    %19 = arith.addf %17, %18 : vector<8x256xf32>
    %20 = arith.negf %19 : vector<8x256xf32>
    %21 = math.exp %20 : vector<8x256xf32>
    %cst_17 = arith.constant 1.000000e+00 : f32
    %22 = vector.broadcast %cst_17 : f32 to vector<8x256xf32>
    %23 = arith.addf %22, %21 : vector<8x256xf32>
    %24 = arith.divf %22, %23 : vector<8x256xf32>
    %25 = vector.extract_strided_slice %10 {offsets = [0, 256], sizes = [8, 128], strides = [1, 1]} : vector<8x384xf32> to vector<8x128xf32>
    %26 = vector.extract_strided_slice %24 {offsets = [0, 0], sizes = [8, 128], strides = [1, 1]} : vector<8x256xf32> to vector<8x128xf32>
    %27 = vector.extract_strided_slice %16 {offsets = [0, 256], sizes = [8, 128], strides = [1, 1]} : vector<8x384xf32> to vector<8x128xf32>
    %28 = arith.mulf %26, %27 : vector<8x128xf32>
    %29 = arith.addf %25, %28 : vector<8x128xf32>
    %30 = math.tanh %29 : vector<8x128xf32>
    %31 = vector.extract_strided_slice %24 {offsets = [0, 128], sizes = [8, 128], strides = [1, 1]} : vector<8x256xf32> to vector<8x128xf32>
    %32 = arith.subf %8, %30 : vector<8x128xf32>
    %33 = arith.mulf %31, %32 : vector<8x128xf32>
    %34 = arith.addf %30, %33 : vector<8x128xf32>
    %35 = arith.truncf %34 : vector<8x128xf32> to vector<8x128xbf16>
    %c0_18 = arith.constant 0 : index
    %c0_19 = arith.constant 0 : index
    %36 = vector.load %arg6[%c0_18, %c0_19] : memref<128x384xbf16, #tpu.memory_space<vmem>>, vector<128x384xbf16>
    %cst_20 = arith.constant dense<0.000000e+00> : vector<8x384xf32>
    %37 = tpu.matmul %35, %36, %cst_20 {dimension_numbers = #tpu.dot_dimension_numbers<[1], [0], [0], [1], [0, 0, 1, 1], [], []>} : vector<8x128xbf16>, vector<128x384xbf16>, vector<8x384xf32> -> vector<8x384xf32>
    %c0_21 = arith.constant 0 : index
    %c0_22 = arith.constant 0 : index
    %38 = vector.load %arg7[%c0_21, %c0_22] : memref<1x384xf32, #tpu.memory_space<vmem>>, vector<1x384xf32>
    %39 = vector.broadcast %38 : vector<1x384xf32> to vector<8x384xf32>
    %40 = arith.addf %37, %39 : vector<8x384xf32>
    %41 = arith.truncf %9 : vector<8x128xf32> to vector<8x128xbf16>
    %c0_23 = arith.constant 0 : index
    %c0_24 = arith.constant 0 : index
    %42 = vector.load %arg8[%c0_23, %c0_24] : memref<128x384xbf16, #tpu.memory_space<vmem>>, vector<128x384xbf16>
    %cst_25 = arith.constant dense<0.000000e+00> : vector<8x384xf32>
    %43 = tpu.matmul %41, %42, %cst_25 {dimension_numbers = #tpu.dot_dimension_numbers<[1], [0], [0], [1], [0, 0, 1, 1], [], []>} : vector<8x128xbf16>, vector<128x384xbf16>, vector<8x384xf32> -> vector<8x384xf32>
    %c0_26 = arith.constant 0 : index
    %c0_27 = arith.constant 0 : index
    %44 = vector.load %arg9[%c0_26, %c0_27] : memref<1x384xf32, #tpu.memory_space<vmem>>, vector<1x384xf32>
    %45 = vector.broadcast %44 : vector<1x384xf32> to vector<8x384xf32>
    %46 = arith.addf %43, %45 : vector<8x384xf32>
    %47 = vector.extract_strided_slice %40 {offsets = [0, 0], sizes = [8, 256], strides = [1, 1]} : vector<8x384xf32> to vector<8x256xf32>
    %48 = vector.extract_strided_slice %46 {offsets = [0, 0], sizes = [8, 256], strides = [1, 1]} : vector<8x384xf32> to vector<8x256xf32>
    %49 = arith.addf %47, %48 : vector<8x256xf32>
    %50 = arith.negf %49 : vector<8x256xf32>
    %51 = math.exp %50 : vector<8x256xf32>
    %cst_28 = arith.constant 1.000000e+00 : f32
    %52 = vector.broadcast %cst_28 : f32 to vector<8x256xf32>
    %53 = arith.addf %52, %51 : vector<8x256xf32>
    %54 = arith.divf %52, %53 : vector<8x256xf32>
    %55 = vector.extract_strided_slice %40 {offsets = [0, 256], sizes = [8, 128], strides = [1, 1]} : vector<8x384xf32> to vector<8x128xf32>
    %56 = vector.extract_strided_slice %54 {offsets = [0, 0], sizes = [8, 128], strides = [1, 1]} : vector<8x256xf32> to vector<8x128xf32>
    %57 = vector.extract_strided_slice %46 {offsets = [0, 256], sizes = [8, 128], strides = [1, 1]} : vector<8x384xf32> to vector<8x128xf32>
    %58 = arith.mulf %56, %57 : vector<8x128xf32>
    %59 = arith.addf %55, %58 : vector<8x128xf32>
    %60 = math.tanh %59 : vector<8x128xf32>
    %61 = vector.extract_strided_slice %54 {offsets = [0, 128], sizes = [8, 128], strides = [1, 1]} : vector<8x256xf32> to vector<8x128xf32>
    %62 = arith.subf %9, %60 : vector<8x128xf32>
    %63 = arith.mulf %61, %62 : vector<8x128xf32>
    %64 = arith.addf %60, %63 : vector<8x128xf32>
    %c8 = arith.constant 8 : index
    %c0_29 = arith.constant 0 : index
    %65 = vector.load %arg16[%c8, %c0_29] : memref<64x384xf32, #tpu.memory_space<vmem>>, vector<8x384xf32>
    %66 = arith.truncf %34 : vector<8x128xf32> to vector<8x128xbf16>
    %c0_30 = arith.constant 0 : index
    %c0_31 = arith.constant 0 : index
    %67 = vector.load %arg4[%c0_30, %c0_31] : memref<128x384xbf16, #tpu.memory_space<vmem>>, vector<128x384xbf16>
    %cst_32 = arith.constant dense<0.000000e+00> : vector<8x384xf32>
    %68 = tpu.matmul %66, %67, %cst_32 {dimension_numbers = #tpu.dot_dimension_numbers<[1], [0], [0], [1], [0, 0, 1, 1], [], []>} : vector<8x128xbf16>, vector<128x384xbf16>, vector<8x384xf32> -> vector<8x384xf32>
    %c0_33 = arith.constant 0 : index
    %c0_34 = arith.constant 0 : index
    %69 = vector.load %arg5[%c0_33, %c0_34] : memref<1x384xf32, #tpu.memory_space<vmem>>, vector<1x384xf32>
    %70 = vector.broadcast %69 : vector<1x384xf32> to vector<8x384xf32>
    %71 = arith.addf %68, %70 : vector<8x384xf32>
    %72 = vector.extract_strided_slice %65 {offsets = [0, 0], sizes = [8, 256], strides = [1, 1]} : vector<8x384xf32> to vector<8x256xf32>
    %73 = vector.extract_strided_slice %71 {offsets = [0, 0], sizes = [8, 256], strides = [1, 1]} : vector<8x384xf32> to vector<8x256xf32>
    %74 = arith.addf %72, %73 : vector<8x256xf32>
    %75 = arith.negf %74 : vector<8x256xf32>
    %76 = math.exp %75 : vector<8x256xf32>
    %cst_35 = arith.constant 1.000000e+00 : f32
    %77 = vector.broadcast %cst_35 : f32 to vector<8x256xf32>
    %78 = arith.addf %77, %76 : vector<8x256xf32>
    %79 = arith.divf %77, %78 : vector<8x256xf32>
    %80 = vector.extract_strided_slice %65 {offsets = [0, 256], sizes = [8, 128], strides = [1, 1]} : vector<8x384xf32> to vector<8x128xf32>
    %81 = vector.extract_strided_slice %79 {offsets = [0, 0], sizes = [8, 128], strides = [1, 1]} : vector<8x256xf32> to vector<8x128xf32>
    %82 = vector.extract_strided_slice %71 {offsets = [0, 256], sizes = [8, 128], strides = [1, 1]} : vector<8x384xf32> to vector<8x128xf32>
    %83 = arith.mulf %81, %82 : vector<8x128xf32>
    %84 = arith.addf %80, %83 : vector<8x128xf32>
    %85 = math.tanh %84 : vector<8x128xf32>
    %86 = vector.extract_strided_slice %79 {offsets = [0, 128], sizes = [8, 128], strides = [1, 1]} : vector<8x256xf32> to vector<8x128xf32>
    %87 = arith.subf %34, %85 : vector<8x128xf32>
    %88 = arith.mulf %86, %87 : vector<8x128xf32>
    %89 = arith.addf %85, %88 : vector<8x128xf32>
    %90 = arith.truncf %89 : vector<8x128xf32> to vector<8x128xbf16>
    %c0_36 = arith.constant 0 : index
    %c0_37 = arith.constant 0 : index
    %91 = vector.load %arg6[%c0_36, %c0_37] : memref<128x384xbf16, #tpu.memory_space<vmem>>, vector<128x384xbf16>
    %cst_38 = arith.constant dense<0.000000e+00> : vector<8x384xf32>
    %92 = tpu.matmul %90, %91, %cst_38 {dimension_numbers = #tpu.dot_dimension_numbers<[1], [0], [0], [1], [0, 0, 1, 1], [], []>} : vector<8x128xbf16>, vector<128x384xbf16>, vector<8x384xf32> -> vector<8x384xf32>
    %c0_39 = arith.constant 0 : index
    %c0_40 = arith.constant 0 : index
    %93 = vector.load %arg7[%c0_39, %c0_40] : memref<1x384xf32, #tpu.memory_space<vmem>>, vector<1x384xf32>
    %94 = vector.broadcast %93 : vector<1x384xf32> to vector<8x384xf32>
    %95 = arith.addf %92, %94 : vector<8x384xf32>
    %96 = arith.truncf %64 : vector<8x128xf32> to vector<8x128xbf16>
    %c0_41 = arith.constant 0 : index
    %c0_42 = arith.constant 0 : index
    %97 = vector.load %arg8[%c0_41, %c0_42] : memref<128x384xbf16, #tpu.memory_space<vmem>>, vector<128x384xbf16>
    %cst_43 = arith.constant dense<0.000000e+00> : vector<8x384xf32>
    %98 = tpu.matmul %96, %97, %cst_43 {dimension_numbers = #tpu.dot_dimension_numbers<[1], [0], [0], [1], [0, 0, 1, 1], [], []>} : vector<8x128xbf16>, vector<128x384xbf16>, vector<8x384xf32> -> vector<8x384xf32>
    %c0_44 = arith.constant 0 : index
    %c0_45 = arith.constant 0 : index
    %99 = vector.load %arg9[%c0_44, %c0_45] : memref<1x384xf32, #tpu.memory_space<vmem>>, vector<1x384xf32>
    %100 = vector.broadcast %99 : vector<1x384xf32> to vector<8x384xf32>
    %101 = arith.addf %98, %100 : vector<8x384xf32>
    %102 = vector.extract_strided_slice %95 {offsets = [0, 0], sizes = [8, 256], strides = [1, 1]} : vector<8x384xf32> to vector<8x256xf32>
    %103 = vector.extract_strided_slice %101 {offsets = [0, 0], sizes = [8, 256], strides = [1, 1]} : vector<8x384xf32> to vector<8x256xf32>
    %104 = arith.addf %102, %103 : vector<8x256xf32>
    %105 = arith.negf %104 : vector<8x256xf32>
    %106 = math.exp %105 : vector<8x256xf32>
    %cst_46 = arith.constant 1.000000e+00 : f32
    %107 = vector.broadcast %cst_46 : f32 to vector<8x256xf32>
    %108 = arith.addf %107, %106 : vector<8x256xf32>
    %109 = arith.divf %107, %108 : vector<8x256xf32>
    %110 = vector.extract_strided_slice %95 {offsets = [0, 256], sizes = [8, 128], strides = [1, 1]} : vector<8x384xf32> to vector<8x128xf32>
    %111 = vector.extract_strided_slice %109 {offsets = [0, 0], sizes = [8, 128], strides = [1, 1]} : vector<8x256xf32> to vector<8x128xf32>
    %112 = vector.extract_strided_slice %101 {offsets = [0, 256], sizes = [8, 128], strides = [1, 1]} : vector<8x384xf32> to vector<8x128xf32>
    %113 = arith.mulf %111, %112 : vector<8x128xf32>
    %114 = arith.addf %110, %113 : vector<8x128xf32>
    %115 = math.tanh %114 : vector<8x128xf32>
    %116 = vector.extract_strided_slice %109 {offsets = [0, 128], sizes = [8, 128], strides = [1, 1]} : vector<8x256xf32> to vector<8x128xf32>
    %117 = arith.subf %64, %115 : vector<8x128xf32>
    %118 = arith.mulf %116, %117 : vector<8x128xf32>
    %119 = arith.addf %115, %118 : vector<8x128xf32>
    %c16 = arith.constant 16 : index
    %c0_47 = arith.constant 0 : index
    %120 = vector.load %arg16[%c16, %c0_47] : memref<64x384xf32, #tpu.memory_space<vmem>>, vector<8x384xf32>
    %121 = arith.truncf %89 : vector<8x128xf32> to vector<8x128xbf16>
    %c0_48 = arith.constant 0 : index
    %c0_49 = arith.constant 0 : index
    %122 = vector.load %arg4[%c0_48, %c0_49] : memref<128x384xbf16, #tpu.memory_space<vmem>>, vector<128x384xbf16>
    %cst_50 = arith.constant dense<0.000000e+00> : vector<8x384xf32>
    %123 = tpu.matmul %121, %122, %cst_50 {dimension_numbers = #tpu.dot_dimension_numbers<[1], [0], [0], [1], [0, 0, 1, 1], [], []>} : vector<8x128xbf16>, vector<128x384xbf16>, vector<8x384xf32> -> vector<8x384xf32>
    %c0_51 = arith.constant 0 : index
    %c0_52 = arith.constant 0 : index
    %124 = vector.load %arg5[%c0_51, %c0_52] : memref<1x384xf32, #tpu.memory_space<vmem>>, vector<1x384xf32>
    %125 = vector.broadcast %124 : vector<1x384xf32> to vector<8x384xf32>
    %126 = arith.addf %123, %125 : vector<8x384xf32>
    %127 = vector.extract_strided_slice %120 {offsets = [0, 0], sizes = [8, 256], strides = [1, 1]} : vector<8x384xf32> to vector<8x256xf32>
    %128 = vector.extract_strided_slice %126 {offsets = [0, 0], sizes = [8, 256], strides = [1, 1]} : vector<8x384xf32> to vector<8x256xf32>
    %129 = arith.addf %127, %128 : vector<8x256xf32>
    %130 = arith.negf %129 : vector<8x256xf32>
    %131 = math.exp %130 : vector<8x256xf32>
    %cst_53 = arith.constant 1.000000e+00 : f32
    %132 = vector.broadcast %cst_53 : f32 to vector<8x256xf32>
    %133 = arith.addf %132, %131 : vector<8x256xf32>
    %134 = arith.divf %132, %133 : vector<8x256xf32>
    %135 = vector.extract_strided_slice %120 {offsets = [0, 256], sizes = [8, 128], strides = [1, 1]} : vector<8x384xf32> to vector<8x128xf32>
    %136 = vector.extract_strided_slice %134 {offsets = [0, 0], sizes = [8, 128], strides = [1, 1]} : vector<8x256xf32> to vector<8x128xf32>
    %137 = vector.extract_strided_slice %126 {offsets = [0, 256], sizes = [8, 128], strides = [1, 1]} : vector<8x384xf32> to vector<8x128xf32>
    %138 = arith.mulf %136, %137 : vector<8x128xf32>
    %139 = arith.addf %135, %138 : vector<8x128xf32>
    %140 = math.tanh %139 : vector<8x128xf32>
    %141 = vector.extract_strided_slice %134 {offsets = [0, 128], sizes = [8, 128], strides = [1, 1]} : vector<8x256xf32> to vector<8x128xf32>
    %142 = arith.subf %89, %140 : vector<8x128xf32>
    %143 = arith.mulf %141, %142 : vector<8x128xf32>
    %144 = arith.addf %140, %143 : vector<8x128xf32>
    %145 = arith.truncf %144 : vector<8x128xf32> to vector<8x128xbf16>
    %c0_54 = arith.constant 0 : index
    %c0_55 = arith.constant 0 : index
    %146 = vector.load %arg6[%c0_54, %c0_55] : memref<128x384xbf16, #tpu.memory_space<vmem>>, vector<128x384xbf16>
    %cst_56 = arith.constant dense<0.000000e+00> : vector<8x384xf32>
    %147 = tpu.matmul %145, %146, %cst_56 {dimension_numbers = #tpu.dot_dimension_numbers<[1], [0], [0], [1], [0, 0, 1, 1], [], []>} : vector<8x128xbf16>, vector<128x384xbf16>, vector<8x384xf32> -> vector<8x384xf32>
    %c0_57 = arith.constant 0 : index
    %c0_58 = arith.constant 0 : index
    %148 = vector.load %arg7[%c0_57, %c0_58] : memref<1x384xf32, #tpu.memory_space<vmem>>, vector<1x384xf32>
    %149 = vector.broadcast %148 : vector<1x384xf32> to vector<8x384xf32>
    %150 = arith.addf %147, %149 : vector<8x384xf32>
    %151 = arith.truncf %119 : vector<8x128xf32> to vector<8x128xbf16>
    %c0_59 = arith.constant 0 : index
    %c0_60 = arith.constant 0 : index
    %152 = vector.load %arg8[%c0_59, %c0_60] : memref<128x384xbf16, #tpu.memory_space<vmem>>, vector<128x384xbf16>
    %cst_61 = arith.constant dense<0.000000e+00> : vector<8x384xf32>
    %153 = tpu.matmul %151, %152, %cst_61 {dimension_numbers = #tpu.dot_dimension_numbers<[1], [0], [0], [1], [0, 0, 1, 1], [], []>} : vector<8x128xbf16>, vector<128x384xbf16>, vector<8x384xf32> -> vector<8x384xf32>
    %c0_62 = arith.constant 0 : index
    %c0_63 = arith.constant 0 : index
    %154 = vector.load %arg9[%c0_62, %c0_63] : memref<1x384xf32, #tpu.memory_space<vmem>>, vector<1x384xf32>
    %155 = vector.broadcast %154 : vector<1x384xf32> to vector<8x384xf32>
    %156 = arith.addf %153, %155 : vector<8x384xf32>
    %157 = vector.extract_strided_slice %150 {offsets = [0, 0], sizes = [8, 256], strides = [1, 1]} : vector<8x384xf32> to vector<8x256xf32>
    %158 = vector.extract_strided_slice %156 {offsets = [0, 0], sizes = [8, 256], strides = [1, 1]} : vector<8x384xf32> to vector<8x256xf32>
    %159 = arith.addf %157, %158 : vector<8x256xf32>
    %160 = arith.negf %159 : vector<8x256xf32>
    %161 = math.exp %160 : vector<8x256xf32>
    %cst_64 = arith.constant 1.000000e+00 : f32
    %162 = vector.broadcast %cst_64 : f32 to vector<8x256xf32>
    %163 = arith.addf %162, %161 : vector<8x256xf32>
    %164 = arith.divf %162, %163 : vector<8x256xf32>
    %165 = vector.extract_strided_slice %150 {offsets = [0, 256], sizes = [8, 128], strides = [1, 1]} : vector<8x384xf32> to vector<8x128xf32>
    %166 = vector.extract_strided_slice %164 {offsets = [0, 0], sizes = [8, 128], strides = [1, 1]} : vector<8x256xf32> to vector<8x128xf32>
    %167 = vector.extract_strided_slice %156 {offsets = [0, 256], sizes = [8, 128], strides = [1, 1]} : vector<8x384xf32> to vector<8x128xf32>
    %168 = arith.mulf %166, %167 : vector<8x128xf32>
    %169 = arith.addf %165, %168 : vector<8x128xf32>
    %170 = math.tanh %169 : vector<8x128xf32>
    %171 = vector.extract_strided_slice %164 {offsets = [0, 128], sizes = [8, 128], strides = [1, 1]} : vector<8x256xf32> to vector<8x128xf32>
    %172 = arith.subf %119, %170 : vector<8x128xf32>
    %173 = arith.mulf %171, %172 : vector<8x128xf32>
    %174 = arith.addf %170, %173 : vector<8x128xf32>
    %c24 = arith.constant 24 : index
    %c0_65 = arith.constant 0 : index
    %175 = vector.load %arg16[%c24, %c0_65] : memref<64x384xf32, #tpu.memory_space<vmem>>, vector<8x384xf32>
    %176 = arith.truncf %144 : vector<8x128xf32> to vector<8x128xbf16>
    %c0_66 = arith.constant 0 : index
    %c0_67 = arith.constant 0 : index
    %177 = vector.load %arg4[%c0_66, %c0_67] : memref<128x384xbf16, #tpu.memory_space<vmem>>, vector<128x384xbf16>
    %cst_68 = arith.constant dense<0.000000e+00> : vector<8x384xf32>
    %178 = tpu.matmul %176, %177, %cst_68 {dimension_numbers = #tpu.dot_dimension_numbers<[1], [0], [0], [1], [0, 0, 1, 1], [], []>} : vector<8x128xbf16>, vector<128x384xbf16>, vector<8x384xf32> -> vector<8x384xf32>
    %c0_69 = arith.constant 0 : index
    %c0_70 = arith.constant 0 : index
    %179 = vector.load %arg5[%c0_69, %c0_70] : memref<1x384xf32, #tpu.memory_space<vmem>>, vector<1x384xf32>
    %180 = vector.broadcast %179 : vector<1x384xf32> to vector<8x384xf32>
    %181 = arith.addf %178, %180 : vector<8x384xf32>
    %182 = vector.extract_strided_slice %175 {offsets = [0, 0], sizes = [8, 256], strides = [1, 1]} : vector<8x384xf32> to vector<8x256xf32>
    %183 = vector.extract_strided_slice %181 {offsets = [0, 0], sizes = [8, 256], strides = [1, 1]} : vector<8x384xf32> to vector<8x256xf32>
    %184 = arith.addf %182, %183 : vector<8x256xf32>
    %185 = arith.negf %184 : vector<8x256xf32>
    %186 = math.exp %185 : vector<8x256xf32>
    %cst_71 = arith.constant 1.000000e+00 : f32
    %187 = vector.broadcast %cst_71 : f32 to vector<8x256xf32>
    %188 = arith.addf %187, %186 : vector<8x256xf32>
    %189 = arith.divf %187, %188 : vector<8x256xf32>
    %190 = vector.extract_strided_slice %175 {offsets = [0, 256], sizes = [8, 128], strides = [1, 1]} : vector<8x384xf32> to vector<8x128xf32>
    %191 = vector.extract_strided_slice %189 {offsets = [0, 0], sizes = [8, 128], strides = [1, 1]} : vector<8x256xf32> to vector<8x128xf32>
    %192 = vector.extract_strided_slice %181 {offsets = [0, 256], sizes = [8, 128], strides = [1, 1]} : vector<8x384xf32> to vector<8x128xf32>
    %193 = arith.mulf %191, %192 : vector<8x128xf32>
    %194 = arith.addf %190, %193 : vector<8x128xf32>
    %195 = math.tanh %194 : vector<8x128xf32>
    %196 = vector.extract_strided_slice %189 {offsets = [0, 128], sizes = [8, 128], strides = [1, 1]} : vector<8x256xf32> to vector<8x128xf32>
    %197 = arith.subf %144, %195 : vector<8x128xf32>
    %198 = arith.mulf %196, %197 : vector<8x128xf32>
    %199 = arith.addf %195, %198 : vector<8x128xf32>
    %200 = arith.truncf %199 : vector<8x128xf32> to vector<8x128xbf16>
    %c0_72 = arith.constant 0 : index
    %c0_73 = arith.constant 0 : index
    %201 = vector.load %arg6[%c0_72, %c0_73] : memref<128x384xbf16, #tpu.memory_space<vmem>>, vector<128x384xbf16>
    %cst_74 = arith.constant dense<0.000000e+00> : vector<8x384xf32>
    %202 = tpu.matmul %200, %201, %cst_74 {dimension_numbers = #tpu.dot_dimension_numbers<[1], [0], [0], [1], [0, 0, 1, 1], [], []>} : vector<8x128xbf16>, vector<128x384xbf16>, vector<8x384xf32> -> vector<8x384xf32>
    %c0_75 = arith.constant 0 : index
    %c0_76 = arith.constant 0 : index
    %203 = vector.load %arg7[%c0_75, %c0_76] : memref<1x384xf32, #tpu.memory_space<vmem>>, vector<1x384xf32>
    %204 = vector.broadcast %203 : vector<1x384xf32> to vector<8x384xf32>
    %205 = arith.addf %202, %204 : vector<8x384xf32>
    %206 = arith.truncf %174 : vector<8x128xf32> to vector<8x128xbf16>
    %c0_77 = arith.constant 0 : index
    %c0_78 = arith.constant 0 : index
    %207 = vector.load %arg8[%c0_77, %c0_78] : memref<128x384xbf16, #tpu.memory_space<vmem>>, vector<128x384xbf16>
    %cst_79 = arith.constant dense<0.000000e+00> : vector<8x384xf32>
    %208 = tpu.matmul %206, %207, %cst_79 {dimension_numbers = #tpu.dot_dimension_numbers<[1], [0], [0], [1], [0, 0, 1, 1], [], []>} : vector<8x128xbf16>, vector<128x384xbf16>, vector<8x384xf32> -> vector<8x384xf32>
    %c0_80 = arith.constant 0 : index
    %c0_81 = arith.constant 0 : index
    %209 = vector.load %arg9[%c0_80, %c0_81] : memref<1x384xf32, #tpu.memory_space<vmem>>, vector<1x384xf32>
    %210 = vector.broadcast %209 : vector<1x384xf32> to vector<8x384xf32>
    %211 = arith.addf %208, %210 : vector<8x384xf32>
    %212 = vector.extract_strided_slice %205 {offsets = [0, 0], sizes = [8, 256], strides = [1, 1]} : vector<8x384xf32> to vector<8x256xf32>
    %213 = vector.extract_strided_slice %211 {offsets = [0, 0], sizes = [8, 256], strides = [1, 1]} : vector<8x384xf32> to vector<8x256xf32>
    %214 = arith.addf %212, %213 : vector<8x256xf32>
    %215 = arith.negf %214 : vector<8x256xf32>
    %216 = math.exp %215 : vector<8x256xf32>
    %cst_82 = arith.constant 1.000000e+00 : f32
    %217 = vector.broadcast %cst_82 : f32 to vector<8x256xf32>
    %218 = arith.addf %217, %216 : vector<8x256xf32>
    %219 = arith.divf %217, %218 : vector<8x256xf32>
    %220 = vector.extract_strided_slice %205 {offsets = [0, 256], sizes = [8, 128], strides = [1, 1]} : vector<8x384xf32> to vector<8x128xf32>
    %221 = vector.extract_strided_slice %219 {offsets = [0, 0], sizes = [8, 128], strides = [1, 1]} : vector<8x256xf32> to vector<8x128xf32>
    %222 = vector.extract_strided_slice %211 {offsets = [0, 256], sizes = [8, 128], strides = [1, 1]} : vector<8x384xf32> to vector<8x128xf32>
    %223 = arith.mulf %221, %222 : vector<8x128xf32>
    %224 = arith.addf %220, %223 : vector<8x128xf32>
    %225 = math.tanh %224 : vector<8x128xf32>
    %226 = vector.extract_strided_slice %219 {offsets = [0, 128], sizes = [8, 128], strides = [1, 1]} : vector<8x256xf32> to vector<8x128xf32>
    %227 = arith.subf %174, %225 : vector<8x128xf32>
    %228 = arith.mulf %226, %227 : vector<8x128xf32>
    %229 = arith.addf %225, %228 : vector<8x128xf32>
    %c32 = arith.constant 32 : index
    %c0_83 = arith.constant 0 : index
    %230 = vector.load %arg16[%c32, %c0_83] : memref<64x384xf32, #tpu.memory_space<vmem>>, vector<8x384xf32>
    %231 = arith.truncf %199 : vector<8x128xf32> to vector<8x128xbf16>
    %c0_84 = arith.constant 0 : index
    %c0_85 = arith.constant 0 : index
    %232 = vector.load %arg4[%c0_84, %c0_85] : memref<128x384xbf16, #tpu.memory_space<vmem>>, vector<128x384xbf16>
    %cst_86 = arith.constant dense<0.000000e+00> : vector<8x384xf32>
    %233 = tpu.matmul %231, %232, %cst_86 {dimension_numbers = #tpu.dot_dimension_numbers<[1], [0], [0], [1], [0, 0, 1, 1], [], []>} : vector<8x128xbf16>, vector<128x384xbf16>, vector<8x384xf32> -> vector<8x384xf32>
    %c0_87 = arith.constant 0 : index
    %c0_88 = arith.constant 0 : index
    %234 = vector.load %arg5[%c0_87, %c0_88] : memref<1x384xf32, #tpu.memory_space<vmem>>, vector<1x384xf32>
    %235 = vector.broadcast %234 : vector<1x384xf32> to vector<8x384xf32>
    %236 = arith.addf %233, %235 : vector<8x384xf32>
    %237 = vector.extract_strided_slice %230 {offsets = [0, 0], sizes = [8, 256], strides = [1, 1]} : vector<8x384xf32> to vector<8x256xf32>
    %238 = vector.extract_strided_slice %236 {offsets = [0, 0], sizes = [8, 256], strides = [1, 1]} : vector<8x384xf32> to vector<8x256xf32>
    %239 = arith.addf %237, %238 : vector<8x256xf32>
    %240 = arith.negf %239 : vector<8x256xf32>
    %241 = math.exp %240 : vector<8x256xf32>
    %cst_89 = arith.constant 1.000000e+00 : f32
    %242 = vector.broadcast %cst_89 : f32 to vector<8x256xf32>
    %243 = arith.addf %242, %241 : vector<8x256xf32>
    %244 = arith.divf %242, %243 : vector<8x256xf32>
    %245 = vector.extract_strided_slice %230 {offsets = [0, 256], sizes = [8, 128], strides = [1, 1]} : vector<8x384xf32> to vector<8x128xf32>
    %246 = vector.extract_strided_slice %244 {offsets = [0, 0], sizes = [8, 128], strides = [1, 1]} : vector<8x256xf32> to vector<8x128xf32>
    %247 = vector.extract_strided_slice %236 {offsets = [0, 256], sizes = [8, 128], strides = [1, 1]} : vector<8x384xf32> to vector<8x128xf32>
    %248 = arith.mulf %246, %247 : vector<8x128xf32>
    %249 = arith.addf %245, %248 : vector<8x128xf32>
    %250 = math.tanh %249 : vector<8x128xf32>
    %251 = vector.extract_strided_slice %244 {offsets = [0, 128], sizes = [8, 128], strides = [1, 1]} : vector<8x256xf32> to vector<8x128xf32>
    %252 = arith.subf %199, %250 : vector<8x128xf32>
    %253 = arith.mulf %251, %252 : vector<8x128xf32>
    %254 = arith.addf %250, %253 : vector<8x128xf32>
    %255 = arith.truncf %254 : vector<8x128xf32> to vector<8x128xbf16>
    %c0_90 = arith.constant 0 : index
    %c0_91 = arith.constant 0 : index
    %256 = vector.load %arg6[%c0_90, %c0_91] : memref<128x384xbf16, #tpu.memory_space<vmem>>, vector<128x384xbf16>
    %cst_92 = arith.constant dense<0.000000e+00> : vector<8x384xf32>
    %257 = tpu.matmul %255, %256, %cst_92 {dimension_numbers = #tpu.dot_dimension_numbers<[1], [0], [0], [1], [0, 0, 1, 1], [], []>} : vector<8x128xbf16>, vector<128x384xbf16>, vector<8x384xf32> -> vector<8x384xf32>
    %c0_93 = arith.constant 0 : index
    %c0_94 = arith.constant 0 : index
    %258 = vector.load %arg7[%c0_93, %c0_94] : memref<1x384xf32, #tpu.memory_space<vmem>>, vector<1x384xf32>
    %259 = vector.broadcast %258 : vector<1x384xf32> to vector<8x384xf32>
    %260 = arith.addf %257, %259 : vector<8x384xf32>
    %261 = arith.truncf %229 : vector<8x128xf32> to vector<8x128xbf16>
    %c0_95 = arith.constant 0 : index
    %c0_96 = arith.constant 0 : index
    %262 = vector.load %arg8[%c0_95, %c0_96] : memref<128x384xbf16, #tpu.memory_space<vmem>>, vector<128x384xbf16>
    %cst_97 = arith.constant dense<0.000000e+00> : vector<8x384xf32>
    %263 = tpu.matmul %261, %262, %cst_97 {dimension_numbers = #tpu.dot_dimension_numbers<[1], [0], [0], [1], [0, 0, 1, 1], [], []>} : vector<8x128xbf16>, vector<128x384xbf16>, vector<8x384xf32> -> vector<8x384xf32>
    %c0_98 = arith.constant 0 : index
    %c0_99 = arith.constant 0 : index
    %264 = vector.load %arg9[%c0_98, %c0_99] : memref<1x384xf32, #tpu.memory_space<vmem>>, vector<1x384xf32>
    %265 = vector.broadcast %264 : vector<1x384xf32> to vector<8x384xf32>
    %266 = arith.addf %263, %265 : vector<8x384xf32>
    %267 = vector.extract_strided_slice %260 {offsets = [0, 0], sizes = [8, 256], strides = [1, 1]} : vector<8x384xf32> to vector<8x256xf32>
    %268 = vector.extract_strided_slice %266 {offsets = [0, 0], sizes = [8, 256], strides = [1, 1]} : vector<8x384xf32> to vector<8x256xf32>
    %269 = arith.addf %267, %268 : vector<8x256xf32>
    %270 = arith.negf %269 : vector<8x256xf32>
    %271 = math.exp %270 : vector<8x256xf32>
    %cst_100 = arith.constant 1.000000e+00 : f32
    %272 = vector.broadcast %cst_100 : f32 to vector<8x256xf32>
    %273 = arith.addf %272, %271 : vector<8x256xf32>
    %274 = arith.divf %272, %273 : vector<8x256xf32>
    %275 = vector.extract_strided_slice %260 {offsets = [0, 256], sizes = [8, 128], strides = [1, 1]} : vector<8x384xf32> to vector<8x128xf32>
    %276 = vector.extract_strided_slice %274 {offsets = [0, 0], sizes = [8, 128], strides = [1, 1]} : vector<8x256xf32> to vector<8x128xf32>
    %277 = vector.extract_strided_slice %266 {offsets = [0, 256], sizes = [8, 128], strides = [1, 1]} : vector<8x384xf32> to vector<8x128xf32>
    %278 = arith.mulf %276, %277 : vector<8x128xf32>
    %279 = arith.addf %275, %278 : vector<8x128xf32>
    %280 = math.tanh %279 : vector<8x128xf32>
    %281 = vector.extract_strided_slice %274 {offsets = [0, 128], sizes = [8, 128], strides = [1, 1]} : vector<8x256xf32> to vector<8x128xf32>
    %282 = arith.subf %229, %280 : vector<8x128xf32>
    %283 = arith.mulf %281, %282 : vector<8x128xf32>
    %284 = arith.addf %280, %283 : vector<8x128xf32>
    %c40 = arith.constant 40 : index
    %c0_101 = arith.constant 0 : index
    %285 = vector.load %arg16[%c40, %c0_101] : memref<64x384xf32, #tpu.memory_space<vmem>>, vector<8x384xf32>
    %286 = arith.truncf %254 : vector<8x128xf32> to vector<8x128xbf16>
    %c0_102 = arith.constant 0 : index
    %c0_103 = arith.constant 0 : index
    %287 = vector.load %arg4[%c0_102, %c0_103] : memref<128x384xbf16, #tpu.memory_space<vmem>>, vector<128x384xbf16>
    %cst_104 = arith.constant dense<0.000000e+00> : vector<8x384xf32>
    %288 = tpu.matmul %286, %287, %cst_104 {dimension_numbers = #tpu.dot_dimension_numbers<[1], [0], [0], [1], [0, 0, 1, 1], [], []>} : vector<8x128xbf16>, vector<128x384xbf16>, vector<8x384xf32> -> vector<8x384xf32>
    %c0_105 = arith.constant 0 : index
    %c0_106 = arith.constant 0 : index
    %289 = vector.load %arg5[%c0_105, %c0_106] : memref<1x384xf32, #tpu.memory_space<vmem>>, vector<1x384xf32>
    %290 = vector.broadcast %289 : vector<1x384xf32> to vector<8x384xf32>
    %291 = arith.addf %288, %290 : vector<8x384xf32>
    %292 = vector.extract_strided_slice %285 {offsets = [0, 0], sizes = [8, 256], strides = [1, 1]} : vector<8x384xf32> to vector<8x256xf32>
    %293 = vector.extract_strided_slice %291 {offsets = [0, 0], sizes = [8, 256], strides = [1, 1]} : vector<8x384xf32> to vector<8x256xf32>
    %294 = arith.addf %292, %293 : vector<8x256xf32>
    %295 = arith.negf %294 : vector<8x256xf32>
    %296 = math.exp %295 : vector<8x256xf32>
    %cst_107 = arith.constant 1.000000e+00 : f32
    %297 = vector.broadcast %cst_107 : f32 to vector<8x256xf32>
    %298 = arith.addf %297, %296 : vector<8x256xf32>
    %299 = arith.divf %297, %298 : vector<8x256xf32>
    %300 = vector.extract_strided_slice %285 {offsets = [0, 256], sizes = [8, 128], strides = [1, 1]} : vector<8x384xf32> to vector<8x128xf32>
    %301 = vector.extract_strided_slice %299 {offsets = [0, 0], sizes = [8, 128], strides = [1, 1]} : vector<8x256xf32> to vector<8x128xf32>
    %302 = vector.extract_strided_slice %291 {offsets = [0, 256], sizes = [8, 128], strides = [1, 1]} : vector<8x384xf32> to vector<8x128xf32>
    %303 = arith.mulf %301, %302 : vector<8x128xf32>
    %304 = arith.addf %300, %303 : vector<8x128xf32>
    %305 = math.tanh %304 : vector<8x128xf32>
    %306 = vector.extract_strided_slice %299 {offsets = [0, 128], sizes = [8, 128], strides = [1, 1]} : vector<8x256xf32> to vector<8x128xf32>
    %307 = arith.subf %254, %305 : vector<8x128xf32>
    %308 = arith.mulf %306, %307 : vector<8x128xf32>
    %309 = arith.addf %305, %308 : vector<8x128xf32>
    %310 = arith.truncf %309 : vector<8x128xf32> to vector<8x128xbf16>
    %c0_108 = arith.constant 0 : index
    %c0_109 = arith.constant 0 : index
    %311 = vector.load %arg6[%c0_108, %c0_109] : memref<128x384xbf16, #tpu.memory_space<vmem>>, vector<128x384xbf16>
    %cst_110 = arith.constant dense<0.000000e+00> : vector<8x384xf32>
    %312 = tpu.matmul %310, %311, %cst_110 {dimension_numbers = #tpu.dot_dimension_numbers<[1], [0], [0], [1], [0, 0, 1, 1], [], []>} : vector<8x128xbf16>, vector<128x384xbf16>, vector<8x384xf32> -> vector<8x384xf32>
    %c0_111 = arith.constant 0 : index
    %c0_112 = arith.constant 0 : index
    %313 = vector.load %arg7[%c0_111, %c0_112] : memref<1x384xf32, #tpu.memory_space<vmem>>, vector<1x384xf32>
    %314 = vector.broadcast %313 : vector<1x384xf32> to vector<8x384xf32>
    %315 = arith.addf %312, %314 : vector<8x384xf32>
    %316 = arith.truncf %284 : vector<8x128xf32> to vector<8x128xbf16>
    %c0_113 = arith.constant 0 : index
    %c0_114 = arith.constant 0 : index
    %317 = vector.load %arg8[%c0_113, %c0_114] : memref<128x384xbf16, #tpu.memory_space<vmem>>, vector<128x384xbf16>
    %cst_115 = arith.constant dense<0.000000e+00> : vector<8x384xf32>
    %318 = tpu.matmul %316, %317, %cst_115 {dimension_numbers = #tpu.dot_dimension_numbers<[1], [0], [0], [1], [0, 0, 1, 1], [], []>} : vector<8x128xbf16>, vector<128x384xbf16>, vector<8x384xf32> -> vector<8x384xf32>
    %c0_116 = arith.constant 0 : index
    %c0_117 = arith.constant 0 : index
    %319 = vector.load %arg9[%c0_116, %c0_117] : memref<1x384xf32, #tpu.memory_space<vmem>>, vector<1x384xf32>
    %320 = vector.broadcast %319 : vector<1x384xf32> to vector<8x384xf32>
    %321 = arith.addf %318, %320 : vector<8x384xf32>
    %322 = vector.extract_strided_slice %315 {offsets = [0, 0], sizes = [8, 256], strides = [1, 1]} : vector<8x384xf32> to vector<8x256xf32>
    %323 = vector.extract_strided_slice %321 {offsets = [0, 0], sizes = [8, 256], strides = [1, 1]} : vector<8x384xf32> to vector<8x256xf32>
    %324 = arith.addf %322, %323 : vector<8x256xf32>
    %325 = arith.negf %324 : vector<8x256xf32>
    %326 = math.exp %325 : vector<8x256xf32>
    %cst_118 = arith.constant 1.000000e+00 : f32
    %327 = vector.broadcast %cst_118 : f32 to vector<8x256xf32>
    %328 = arith.addf %327, %326 : vector<8x256xf32>
    %329 = arith.divf %327, %328 : vector<8x256xf32>
    %330 = vector.extract_strided_slice %315 {offsets = [0, 256], sizes = [8, 128], strides = [1, 1]} : vector<8x384xf32> to vector<8x128xf32>
    %331 = vector.extract_strided_slice %329 {offsets = [0, 0], sizes = [8, 128], strides = [1, 1]} : vector<8x256xf32> to vector<8x128xf32>
    %332 = vector.extract_strided_slice %321 {offsets = [0, 256], sizes = [8, 128], strides = [1, 1]} : vector<8x384xf32> to vector<8x128xf32>
    %333 = arith.mulf %331, %332 : vector<8x128xf32>
    %334 = arith.addf %330, %333 : vector<8x128xf32>
    %335 = math.tanh %334 : vector<8x128xf32>
    %336 = vector.extract_strided_slice %329 {offsets = [0, 128], sizes = [8, 128], strides = [1, 1]} : vector<8x256xf32> to vector<8x128xf32>
    %337 = arith.subf %284, %335 : vector<8x128xf32>
    %338 = arith.mulf %336, %337 : vector<8x128xf32>
    %339 = arith.addf %335, %338 : vector<8x128xf32>
    %c48 = arith.constant 48 : index
    %c0_119 = arith.constant 0 : index
    %340 = vector.load %arg16[%c48, %c0_119] : memref<64x384xf32, #tpu.memory_space<vmem>>, vector<8x384xf32>
    %341 = arith.truncf %309 : vector<8x128xf32> to vector<8x128xbf16>
    %c0_120 = arith.constant 0 : index
    %c0_121 = arith.constant 0 : index
    %342 = vector.load %arg4[%c0_120, %c0_121] : memref<128x384xbf16, #tpu.memory_space<vmem>>, vector<128x384xbf16>
    %cst_122 = arith.constant dense<0.000000e+00> : vector<8x384xf32>
    %343 = tpu.matmul %341, %342, %cst_122 {dimension_numbers = #tpu.dot_dimension_numbers<[1], [0], [0], [1], [0, 0, 1, 1], [], []>} : vector<8x128xbf16>, vector<128x384xbf16>, vector<8x384xf32> -> vector<8x384xf32>
    %c0_123 = arith.constant 0 : index
    %c0_124 = arith.constant 0 : index
    %344 = vector.load %arg5[%c0_123, %c0_124] : memref<1x384xf32, #tpu.memory_space<vmem>>, vector<1x384xf32>
    %345 = vector.broadcast %344 : vector<1x384xf32> to vector<8x384xf32>
    %346 = arith.addf %343, %345 : vector<8x384xf32>
    %347 = vector.extract_strided_slice %340 {offsets = [0, 0], sizes = [8, 256], strides = [1, 1]} : vector<8x384xf32> to vector<8x256xf32>
    %348 = vector.extract_strided_slice %346 {offsets = [0, 0], sizes = [8, 256], strides = [1, 1]} : vector<8x384xf32> to vector<8x256xf32>
    %349 = arith.addf %347, %348 : vector<8x256xf32>
    %350 = arith.negf %349 : vector<8x256xf32>
    %351 = math.exp %350 : vector<8x256xf32>
    %cst_125 = arith.constant 1.000000e+00 : f32
    %352 = vector.broadcast %cst_125 : f32 to vector<8x256xf32>
    %353 = arith.addf %352, %351 : vector<8x256xf32>
    %354 = arith.divf %352, %353 : vector<8x256xf32>
    %355 = vector.extract_strided_slice %340 {offsets = [0, 256], sizes = [8, 128], strides = [1, 1]} : vector<8x384xf32> to vector<8x128xf32>
    %356 = vector.extract_strided_slice %354 {offsets = [0, 0], sizes = [8, 128], strides = [1, 1]} : vector<8x256xf32> to vector<8x128xf32>
    %357 = vector.extract_strided_slice %346 {offsets = [0, 256], sizes = [8, 128], strides = [1, 1]} : vector<8x384xf32> to vector<8x128xf32>
    %358 = arith.mulf %356, %357 : vector<8x128xf32>
    %359 = arith.addf %355, %358 : vector<8x128xf32>
    %360 = math.tanh %359 : vector<8x128xf32>
    %361 = vector.extract_strided_slice %354 {offsets = [0, 128], sizes = [8, 128], strides = [1, 1]} : vector<8x256xf32> to vector<8x128xf32>
    %362 = arith.subf %309, %360 : vector<8x128xf32>
    %363 = arith.mulf %361, %362 : vector<8x128xf32>
    %364 = arith.addf %360, %363 : vector<8x128xf32>
    %365 = arith.truncf %364 : vector<8x128xf32> to vector<8x128xbf16>
    %c0_126 = arith.constant 0 : index
    %c0_127 = arith.constant 0 : index
    %366 = vector.load %arg6[%c0_126, %c0_127] : memref<128x384xbf16, #tpu.memory_space<vmem>>, vector<128x384xbf16>
    %cst_128 = arith.constant dense<0.000000e+00> : vector<8x384xf32>
    %367 = tpu.matmul %365, %366, %cst_128 {dimension_numbers = #tpu.dot_dimension_numbers<[1], [0], [0], [1], [0, 0, 1, 1], [], []>} : vector<8x128xbf16>, vector<128x384xbf16>, vector<8x384xf32> -> vector<8x384xf32>
    %c0_129 = arith.constant 0 : index
    %c0_130 = arith.constant 0 : index
    %368 = vector.load %arg7[%c0_129, %c0_130] : memref<1x384xf32, #tpu.memory_space<vmem>>, vector<1x384xf32>
    %369 = vector.broadcast %368 : vector<1x384xf32> to vector<8x384xf32>
    %370 = arith.addf %367, %369 : vector<8x384xf32>
    %371 = arith.truncf %339 : vector<8x128xf32> to vector<8x128xbf16>
    %c0_131 = arith.constant 0 : index
    %c0_132 = arith.constant 0 : index
    %372 = vector.load %arg8[%c0_131, %c0_132] : memref<128x384xbf16, #tpu.memory_space<vmem>>, vector<128x384xbf16>
    %cst_133 = arith.constant dense<0.000000e+00> : vector<8x384xf32>
    %373 = tpu.matmul %371, %372, %cst_133 {dimension_numbers = #tpu.dot_dimension_numbers<[1], [0], [0], [1], [0, 0, 1, 1], [], []>} : vector<8x128xbf16>, vector<128x384xbf16>, vector<8x384xf32> -> vector<8x384xf32>
    %c0_134 = arith.constant 0 : index
    %c0_135 = arith.constant 0 : index
    %374 = vector.load %arg9[%c0_134, %c0_135] : memref<1x384xf32, #tpu.memory_space<vmem>>, vector<1x384xf32>
    %375 = vector.broadcast %374 : vector<1x384xf32> to vector<8x384xf32>
    %376 = arith.addf %373, %375 : vector<8x384xf32>
    %377 = vector.extract_strided_slice %370 {offsets = [0, 0], sizes = [8, 256], strides = [1, 1]} : vector<8x384xf32> to vector<8x256xf32>
    %378 = vector.extract_strided_slice %376 {offsets = [0, 0], sizes = [8, 256], strides = [1, 1]} : vector<8x384xf32> to vector<8x256xf32>
    %379 = arith.addf %377, %378 : vector<8x256xf32>
    %380 = arith.negf %379 : vector<8x256xf32>
    %381 = math.exp %380 : vector<8x256xf32>
    %cst_136 = arith.constant 1.000000e+00 : f32
    %382 = vector.broadcast %cst_136 : f32 to vector<8x256xf32>
    %383 = arith.addf %382, %381 : vector<8x256xf32>
    %384 = arith.divf %382, %383 : vector<8x256xf32>
    %385 = vector.extract_strided_slice %370 {offsets = [0, 256], sizes = [8, 128], strides = [1, 1]} : vector<8x384xf32> to vector<8x128xf32>
    %386 = vector.extract_strided_slice %384 {offsets = [0, 0], sizes = [8, 128], strides = [1, 1]} : vector<8x256xf32> to vector<8x128xf32>
    %387 = vector.extract_strided_slice %376 {offsets = [0, 256], sizes = [8, 128], strides = [1, 1]} : vector<8x384xf32> to vector<8x128xf32>
    %388 = arith.mulf %386, %387 : vector<8x128xf32>
    %389 = arith.addf %385, %388 : vector<8x128xf32>
    %390 = math.tanh %389 : vector<8x128xf32>
    %391 = vector.extract_strided_slice %384 {offsets = [0, 128], sizes = [8, 128], strides = [1, 1]} : vector<8x256xf32> to vector<8x128xf32>
    %392 = arith.subf %339, %390 : vector<8x128xf32>
    %393 = arith.mulf %391, %392 : vector<8x128xf32>
    %394 = arith.addf %390, %393 : vector<8x128xf32>
    %c56 = arith.constant 56 : index
    %c0_137 = arith.constant 0 : index
    %395 = vector.load %arg16[%c56, %c0_137] : memref<64x384xf32, #tpu.memory_space<vmem>>, vector<8x384xf32>
    %396 = arith.truncf %364 : vector<8x128xf32> to vector<8x128xbf16>
    %c0_138 = arith.constant 0 : index
    %c0_139 = arith.constant 0 : index
    %397 = vector.load %arg4[%c0_138, %c0_139] : memref<128x384xbf16, #tpu.memory_space<vmem>>, vector<128x384xbf16>
    %cst_140 = arith.constant dense<0.000000e+00> : vector<8x384xf32>
    %398 = tpu.matmul %396, %397, %cst_140 {dimension_numbers = #tpu.dot_dimension_numbers<[1], [0], [0], [1], [0, 0, 1, 1], [], []>} : vector<8x128xbf16>, vector<128x384xbf16>, vector<8x384xf32> -> vector<8x384xf32>
    %c0_141 = arith.constant 0 : index
    %c0_142 = arith.constant 0 : index
    %399 = vector.load %arg5[%c0_141, %c0_142] : memref<1x384xf32, #tpu.memory_space<vmem>>, vector<1x384xf32>
    %400 = vector.broadcast %399 : vector<1x384xf32> to vector<8x384xf32>
    %401 = arith.addf %398, %400 : vector<8x384xf32>
    %402 = vector.extract_strided_slice %395 {offsets = [0, 0], sizes = [8, 256], strides = [1, 1]} : vector<8x384xf32> to vector<8x256xf32>
    %403 = vector.extract_strided_slice %401 {offsets = [0, 0], sizes = [8, 256], strides = [1, 1]} : vector<8x384xf32> to vector<8x256xf32>
    %404 = arith.addf %402, %403 : vector<8x256xf32>
    %405 = arith.negf %404 : vector<8x256xf32>
    %406 = math.exp %405 : vector<8x256xf32>
    %cst_143 = arith.constant 1.000000e+00 : f32
    %407 = vector.broadcast %cst_143 : f32 to vector<8x256xf32>
    %408 = arith.addf %407, %406 : vector<8x256xf32>
    %409 = arith.divf %407, %408 : vector<8x256xf32>
    %410 = vector.extract_strided_slice %395 {offsets = [0, 256], sizes = [8, 128], strides = [1, 1]} : vector<8x384xf32> to vector<8x128xf32>
    %411 = vector.extract_strided_slice %409 {offsets = [0, 0], sizes = [8, 128], strides = [1, 1]} : vector<8x256xf32> to vector<8x128xf32>
    %412 = vector.extract_strided_slice %401 {offsets = [0, 256], sizes = [8, 128], strides = [1, 1]} : vector<8x384xf32> to vector<8x128xf32>
    %413 = arith.mulf %411, %412 : vector<8x128xf32>
    %414 = arith.addf %410, %413 : vector<8x128xf32>
    %415 = math.tanh %414 : vector<8x128xf32>
    %416 = vector.extract_strided_slice %409 {offsets = [0, 128], sizes = [8, 128], strides = [1, 1]} : vector<8x256xf32> to vector<8x128xf32>
    %417 = arith.subf %364, %415 : vector<8x128xf32>
    %418 = arith.mulf %416, %417 : vector<8x128xf32>
    %419 = arith.addf %415, %418 : vector<8x128xf32>
    %420 = arith.truncf %419 : vector<8x128xf32> to vector<8x128xbf16>
    %c0_144 = arith.constant 0 : index
    %c0_145 = arith.constant 0 : index
    %421 = vector.load %arg6[%c0_144, %c0_145] : memref<128x384xbf16, #tpu.memory_space<vmem>>, vector<128x384xbf16>
    %cst_146 = arith.constant dense<0.000000e+00> : vector<8x384xf32>
    %422 = tpu.matmul %420, %421, %cst_146 {dimension_numbers = #tpu.dot_dimension_numbers<[1], [0], [0], [1], [0, 0, 1, 1], [], []>} : vector<8x128xbf16>, vector<128x384xbf16>, vector<8x384xf32> -> vector<8x384xf32>
    %c0_147 = arith.constant 0 : index
    %c0_148 = arith.constant 0 : index
    %423 = vector.load %arg7[%c0_147, %c0_148] : memref<1x384xf32, #tpu.memory_space<vmem>>, vector<1x384xf32>
    %424 = vector.broadcast %423 : vector<1x384xf32> to vector<8x384xf32>
    %425 = arith.addf %422, %424 : vector<8x384xf32>
    %426 = arith.truncf %394 : vector<8x128xf32> to vector<8x128xbf16>
    %c0_149 = arith.constant 0 : index
    %c0_150 = arith.constant 0 : index
    %427 = vector.load %arg8[%c0_149, %c0_150] : memref<128x384xbf16, #tpu.memory_space<vmem>>, vector<128x384xbf16>
    %cst_151 = arith.constant dense<0.000000e+00> : vector<8x384xf32>
    %428 = tpu.matmul %426, %427, %cst_151 {dimension_numbers = #tpu.dot_dimension_numbers<[1], [0], [0], [1], [0, 0, 1, 1], [], []>} : vector<8x128xbf16>, vector<128x384xbf16>, vector<8x384xf32> -> vector<8x384xf32>
    %c0_152 = arith.constant 0 : index
    %c0_153 = arith.constant 0 : index
    %429 = vector.load %arg9[%c0_152, %c0_153] : memref<1x384xf32, #tpu.memory_space<vmem>>, vector<1x384xf32>
    %430 = vector.broadcast %429 : vector<1x384xf32> to vector<8x384xf32>
    %431 = arith.addf %428, %430 : vector<8x384xf32>
    %432 = vector.extract_strided_slice %425 {offsets = [0, 0], sizes = [8, 256], strides = [1, 1]} : vector<8x384xf32> to vector<8x256xf32>
    %433 = vector.extract_strided_slice %431 {offsets = [0, 0], sizes = [8, 256], strides = [1, 1]} : vector<8x384xf32> to vector<8x256xf32>
    %434 = arith.addf %432, %433 : vector<8x256xf32>
    %435 = arith.negf %434 : vector<8x256xf32>
    %436 = math.exp %435 : vector<8x256xf32>
    %cst_154 = arith.constant 1.000000e+00 : f32
    %437 = vector.broadcast %cst_154 : f32 to vector<8x256xf32>
    %438 = arith.addf %437, %436 : vector<8x256xf32>
    %439 = arith.divf %437, %438 : vector<8x256xf32>
    %440 = vector.extract_strided_slice %425 {offsets = [0, 256], sizes = [8, 128], strides = [1, 1]} : vector<8x384xf32> to vector<8x128xf32>
    %441 = vector.extract_strided_slice %439 {offsets = [0, 0], sizes = [8, 128], strides = [1, 1]} : vector<8x256xf32> to vector<8x128xf32>
    %442 = vector.extract_strided_slice %431 {offsets = [0, 256], sizes = [8, 128], strides = [1, 1]} : vector<8x384xf32> to vector<8x128xf32>
    %443 = arith.mulf %441, %442 : vector<8x128xf32>
    %444 = arith.addf %440, %443 : vector<8x128xf32>
    %445 = math.tanh %444 : vector<8x128xf32>
    %446 = vector.extract_strided_slice %439 {offsets = [0, 128], sizes = [8, 128], strides = [1, 1]} : vector<8x256xf32> to vector<8x128xf32>
    %447 = arith.subf %394, %445 : vector<8x128xf32>
    %448 = arith.mulf %446, %447 : vector<8x128xf32>
    %449 = arith.addf %445, %448 : vector<8x128xf32>
    %450 = math.tanh %419 : vector<8x128xf32>
    %451 = arith.truncf %450 : vector<8x128xf32> to vector<8x128xbf16>
    %452 = math.tanh %449 : vector<8x128xf32>
    %453 = arith.truncf %452 : vector<8x128xf32> to vector<8x128xbf16>
    %c0_155 = arith.constant 0 : index
    %c0_156 = arith.constant 0 : index
    %454 = vector.load %arg10[%c0_155, %c0_156] : memref<128x32xbf16, #tpu.memory_space<vmem>>, vector<128x32xbf16>
    %cst_157 = arith.constant dense<0.000000e+00> : vector<8x32xf32>
    %455 = tpu.matmul %451, %454, %cst_157 {dimension_numbers = #tpu.dot_dimension_numbers<[1], [0], [0], [1], [0, 0, 1, 1], [], []>} : vector<8x128xbf16>, vector<128x32xbf16>, vector<8x32xf32> -> vector<8x32xf32>
    %c0_158 = arith.constant 0 : index
    %c0_159 = arith.constant 0 : index
    %456 = vector.load %arg11[%c0_158, %c0_159] : memref<128x32xbf16, #tpu.memory_space<vmem>>, vector<128x32xbf16>
    %cst_160 = arith.constant dense<0.000000e+00> : vector<8x32xf32>
    %457 = tpu.matmul %453, %456, %cst_160 {dimension_numbers = #tpu.dot_dimension_numbers<[1], [0], [0], [1], [0, 0, 1, 1], [], []>} : vector<8x128xbf16>, vector<128x32xbf16>, vector<8x32xf32> -> vector<8x32xf32>
    %458 = arith.addf %455, %457 : vector<8x32xf32>
    %c0_161 = arith.constant 0 : index
    %c0_162 = arith.constant 0 : index
    %459 = vector.load %arg12[%c0_161, %c0_162] : memref<1x32xf32, #tpu.memory_space<vmem>>, vector<1x32xf32>
    %460 = vector.broadcast %459 : vector<1x32xf32> to vector<8x32xf32>
    %461 = arith.addf %458, %460 : vector<8x32xf32>
    %462 = math.tanh %461 : vector<8x32xf32>
    %463 = arith.truncf %462 : vector<8x32xf32> to vector<8x32xbf16>
    %c0_163 = arith.constant 0 : index
    %c0_164 = arith.constant 0 : index
    %464 = vector.load %arg13[%c0_163, %c0_164] : memref<32x1xbf16, #tpu.memory_space<vmem>>, vector<32x1xbf16>
    %cst_165 = arith.constant dense<0.000000e+00> : vector<8x1xf32>
    %465 = tpu.matmul %463, %464, %cst_165 {dimension_numbers = #tpu.dot_dimension_numbers<[1], [0], [0], [1], [0, 0, 1, 1], [], []>} : vector<8x32xbf16>, vector<32x1xbf16>, vector<8x1xf32> -> vector<8x1xf32>
    %c0_166 = arith.constant 0 : index
    %c0_167 = arith.constant 0 : index
    %466 = vector.load %arg14[%c0_166, %c0_167] : memref<1x1xf32, #tpu.memory_space<vmem>>, vector<1x1xf32>
    %467 = vector.broadcast %466 : vector<1x1xf32> to vector<8x1xf32>
    %468 = arith.addf %465, %467 : vector<8x1xf32>
    %c0_168 = arith.constant 0 : index
    %c0_169 = arith.constant 0 : index
    %469 = vector.load %arg15[%c0_168, %c0_169] : memref<8x1xf32, #tpu.memory_space<vmem>>, vector<8x1xf32>
    tpu.vector_store %arg15[%c0_168, %c0_169], %468 {strides = array<i32>} : memref<8x1xf32, #tpu.memory_space<vmem>>, vector<8x1xf32>,
    return
  }
  func.func @transform_0(%arg0: i32) -> (i32, i32, i32) {
    %c0_i32 = arith.constant 0 : i32
    %c0_i32_0 = arith.constant 0 : i32
    %c0_i32_1 = arith.constant 0 : i32
    return %arg0, %c0_i32, %c0_i32_0 : i32, i32, i32
  }
  func.func @transform_1(%arg0: i32) -> (i32, i32) {
    %c0_i32 = arith.constant 0 : i32
    %c0_i32_0 = arith.constant 0 : i32
    %c0_i32_1 = arith.constant 0 : i32
    return %c0_i32, %c0_i32_0 : i32, i32
  }
  func.func @transform_2(%arg0: i32) -> (i32, i32) {
    %c0_i32 = arith.constant 0 : i32
    %c0_i32_0 = arith.constant 0 : i32
    %c0_i32_1 = arith.constant 0 : i32
    return %c0_i32, %c0_i32_0 : i32, i32
  }
  func.func @transform_3(%arg0: i32) -> (i32, i32) {
    %c0_i32 = arith.constant 0 : i32
    %c0_i32_0 = arith.constant 0 : i32
    %c0_i32_1 = arith.constant 0 : i32
    return %c0_i32, %c0_i32_0 : i32, i32
  }
  func.func @transform_4(%arg0: i32) -> (i32, i32) {
    %c0_i32 = arith.constant 0 : i32
    %c0_i32_0 = arith.constant 0 : i32
    %c0_i32_1 = arith.constant 0 : i32
    return %c0_i32, %c0_i32_0 : i32, i32
  }
  func.func @transform_5(%arg0: i32) -> (i32, i32) {
    %c0_i32 = arith.constant 0 : i32
    %c0_i32_0 = arith.constant 0 : i32
    %c0_i32_1 = arith.constant 0 : i32
    return %c0_i32, %c0_i32_0 : i32, i32
  }
  func.func @transform_6(%arg0: i32) -> (i32, i32) {
    %c0_i32 = arith.constant 0 : i32
    %c0_i32_0 = arith.constant 0 : i32
    %c0_i32_1 = arith.constant 0 : i32
    return %c0_i32, %c0_i32_0 : i32, i32
  }
  func.func @transform_7(%arg0: i32) -> (i32, i32) {
    %c0_i32 = arith.constant 0 : i32
    %c0_i32_0 = arith.constant 0 : i32
    %c0_i32_1 = arith.constant 0 : i32
    return %c0_i32, %c0_i32_0 : i32, i32
  }
  func.func @transform_8(%arg0: i32) -> (i32, i32) {
    %c0_i32 = arith.constant 0 : i32
    %c0_i32_0 = arith.constant 0 : i32
    %c0_i32_1 = arith.constant 0 : i32
    return %c0_i32, %c0_i32_0 : i32, i32
  }
  func.func @transform_9(%arg0: i32) -> (i32, i32) {
    %c0_i32 = arith.constant 0 : i32
    %c0_i32_0 = arith.constant 0 : i32
    %c0_i32_1 = arith.constant 0 : i32
    return %c0_i32, %c0_i32_0 : i32, i32
  }
  func.func @transform_10(%arg0: i32) -> (i32, i32) {
    %c0_i32 = arith.constant 0 : i32
    %c0_i32_0 = arith.constant 0 : i32
    %c0_i32_1 = arith.constant 0 : i32
    return %c0_i32, %c0_i32_0 : i32, i32
  }
  func.func @transform_11(%arg0: i32) -> (i32, i32) {
    %c0_i32 = arith.constant 0 : i32
    %c0_i32_0 = arith.constant 0 : i32
    %c0_i32_1 = arith.constant 0 : i32
    return %c0_i32, %c0_i32_0 : i32, i32
  }
  func.func @transform_12(%arg0: i32) -> (i32, i32) {
    %c0_i32 = arith.constant 0 : i32
    %c0_i32_0 = arith.constant 0 : i32
    %c0_i32_1 = arith.constant 0 : i32
    return %c0_i32, %c0_i32_0 : i32, i32
  }
  func.func @transform_13(%arg0: i32) -> (i32, i32) {
    %c0_i32 = arith.constant 0 : i32
    %c0_i32_0 = arith.constant 0 : i32
    %c0_i32_1 = arith.constant 0 : i32
    return %c0_i32, %c0_i32_0 : i32, i32
  }
  func.func @transform_14(%arg0: i32) -> (i32, i32) {
    %c0_i32 = arith.constant 0 : i32
    %c0_i32_0 = arith.constant 0 : i32
    return %arg0, %c0_i32 : i32, i32
  }
}

</mosaic_0001>

<bundles_post_ra>
// kernel: tpu_custom_call.1
= control target key start
LH: loop header
LB: loop body
LE: loop exit
PB: predicated region body
PF: predicated region fallthrough
CT: control target
= control target key end

     0   :  { %s7049_s0 = inlined_call_operand.vmem [shape: bf16[1,64,16], index: 0, kind: input, shape index: {}]   ;;  %s7050_s1 = inlined_call_operand.vmem [shape: bf16[16,384], index: 1, kind: input, shape index: {}]   ;;  %s7051_s2 = inlined_call_operand.vmem [shape: f32[1,384], index: 2, kind: input, shape index: {}]   ;;  %s7052_s3 = inlined_call_operand.vmem [shape: bf16[128,384], index: 3, kind: input, shape index: {}]   ;;  %s7053_s4 = inlined_call_operand.hbm [shape: f32[1,384], index: 4, kind: input, shape index: {}]   ;;  %s7054_s5 = inlined_call_operand.hbm [shape: bf16[128,384], index: 5, kind: input, shape index: {}]   ;;  %s7055_s6 = inlined_call_operand.hbm [shape: f32[1,384], index: 6, kind: input, shape index: {}]   ;;  %s7056_s7 = inlined_call_operand.hbm [shape: bf16[128,384], index: 7, kind: input, shape index: {}]   ;;  %s7057_s8 = inlined_call_operand.hbm [shape: f32[1,384], index: 8, kind: input, shape index: {}]   ;;  %s7058_s9 = inlined_call_operand.vmem [shape: bf16[128,32], index: 9, kind: input, shape index: {}]   ;;  %s7059_s10 = inlined_call_operand.vmem [shape: bf16[128,32], index: 10, kind: input, shape index: {}]   ;;  %s7060_s11 = inlined_call_operand.vmem [shape: f32[1,32], index: 11, kind: input, shape index: {}]   ;;  %s7061_s12 = inlined_call_operand.vmem [shape: bf16[32,1], index: 12, kind: input, shape index: {}]   ;;  %s7062_s13 = inlined_call_operand.<no memory space> [shape: f32[1,1], index: 13, kind: input, shape index: {}]   ;;  %s7063_s14 = inlined_call_operand.vmem [shape: f32[8,1], index: 14, kind: output, shape index: {}]  }
   0x1   :  { %v19_v0 = vstv %s7062_s13 }
   0x2   :  { %20 = vst [vmem:[#allocation3] sm:$0x1] %v19_v0 }
   0x3   :  { %21 = vsyncpa [#allocation5], 0 }
   0x4   :  { %22 = vsyncpa [#allocation7], 0 }
   0x5   :  { %23 = vsyncpa [#allocation10], 0  ;;  %s5026_s15 = smov [#allocation6]   ;;  %s4910_s19 = scalar_lea.hbm %s7054_s5, 3072 }
   0x6   :  { %s47_s16 = sshll.u32 %s5026_s15, 4  ;;  %p4911_p0 = scmp.ne.s32.totalorder %s7054_s5, %s4910_s19  ;;  %s48_s16 = int_to_ptr.vmem [resolvable:$true] %s47_s16 }
   0x7   :  { %p4914_p1 = scmp.lt.u32.totalorder %s4910_s19, %s7054_s5 }
   0x9   :  { %p4916_p2 = pnand %p4914_p1, %p4911_p0 }
   0xb   :  { %4919 = shalt.err (!%p4916_p2)
}
   0xc   :  { %s4920_s13 = scalar_lea.vmem %s48_s16, 3072  ;;  %p4925_p4 = scmp.lt.s32.totalorder %s48_s16, %s48_s16 }
   0xd   :  { %p4921_p3 = scmp.ne.s32.totalorder %s48_s16, %s4920_s13  ;;  %p4926_p5 = scmp.lt.s32.totalorder %s4920_s13, %s4920_s13 }
   0xf   :  { %p4927_p6 = por %p4926_p5, %p4925_p4 }
  0x11   :  { %p4928_p7 = pnand %p4927_p6, %p4921_p3 }
  0x13   :  { %4931 = shalt.err (!%p4928_p7)
}
  0x14   :  { %s5027_s24 = smov 192   ;;  %s5028_s25 = smov 12  }
  0x15   :  { %53 = dma.hbm_to_vmem [thread:$0]  %s7054_s5, 3072, %s48_s16, [#allocation7], %s5027_s24, %s5027_s24, %s5028_s25  }
  0x16   :  { %s5029_s28 = smov [#allocation9]   ;;  %s5030_s30 = smov [#allocation4]  }
  0x17   :  { %s69_s29 = sshll.u32 %s5029_s28, 4  ;;  %s38_s15 = sshll.u32 %s5030_s30, 4  ;;  %s70_s29 = int_to_ptr.vmem [resolvable:$true] %s69_s29  ;;  %s39_s15 = int_to_ptr.vmem [resolvable:$true] %s38_s15 }
  0x18   :  { %s4932_s19 = scalar_lea.hbm %s7056_s7, 3072 }
  0x19   :  { %p4933_p8 = scmp.ne.s32.totalorder %s7056_s7, %s4932_s19  ;;  %p4936_p9 = scmp.lt.u32.totalorder %s4932_s19, %s7056_s7 }
  0x1b   :  { %p4938_p10 = pnand %p4936_p9, %p4933_p8 }
  0x1d   :  { %4941 = shalt.err (!%p4938_p10)
}
  0x1e   :  { %s4942_s5 = scalar_lea.vmem %s70_s29, 3072  ;;  %p4947_p12 = scmp.lt.s32.totalorder %s70_s29, %s70_s29 }
  0x1f   :  { %p4943_p11 = scmp.ne.s32.totalorder %s70_s29, %s4942_s5  ;;  %p4948_p13 = scmp.lt.s32.totalorder %s4942_s5, %s4942_s5 }
  0x21   :  { %p4949_p0 = por %p4948_p13, %p4947_p12 }
  0x23   :  { %p4950_p1 = pnand %p4949_p0, %p4943_p11 }
  0x25   :  { %4953 = shalt.err (!%p4950_p1)
}
  0x26   :  { %75 = dma.hbm_to_vmem [thread:$0]  %s7056_s7, 3072, %s70_s29, [#allocation10], %s5027_s24, %s5027_s24, %s5028_s25  }
  0x27   :  { %s4954_s28 = scalar_lea.hbm %s7053_s4, 48 }
  0x28   :  { %p4955_p2 = scmp.ne.s32.totalorder %s7053_s4, %s4954_s28  ;;  %p4958_p3 = scmp.lt.u32.totalorder %s4954_s28, %s7053_s4 }
  0x2a   :  { %p4960_p4 = pnand %p4958_p3, %p4955_p2 }
  0x2c   :  { %4963 = shalt.err (!%p4960_p4)
}
  0x2d   :  { %s4964_s20 = scalar_lea.vmem %s39_s15, 48  ;;  %s4968_s21 = scalar_lea.vmem %s39_s15, 64 }
  0x2e   :  { %p4965_p5 = scmp.ne.s32.totalorder %s39_s15, %s4964_s20  ;;  %p4969_p6 = scmp.lt.s32.totalorder %s39_s15, %s39_s15 }
  0x2f   :  { %p4970_p7 = scmp.lt.s32.totalorder %s4968_s21, %s4964_s20 }
  0x31   :  { %p4971_p8 = por %p4970_p7, %p4969_p6 }
  0x33   :  { %p4972_p9 = pnand %p4971_p8, %p4965_p5 }
  0x35   :  { %4975 = shalt.err (!%p4972_p9)
}
  0x36   :  { %41 = dma.hbm_to_vmem [thread:$0]  %s7053_s4, 48, %s39_s15, [#allocation5]  }
  0x37   :  { %s5031_s25 = smov [#allocation8]   ;;  %s5032_s22 = smov [#allocation11]  }
  0x38   :  { %s60_s29 = sshll.u32 %s5031_s25, 4  ;;  %s82_s23 = sshll.u32 %s5032_s22, 4  ;;  %s61_s29 = int_to_ptr.vmem [resolvable:$true] %s60_s29  ;;  %s83_s23 = int_to_ptr.vmem [resolvable:$true] %s82_s23 }
  0x39   :  { %s4976_s13 = scalar_lea.hbm %s7055_s6, 48 }
  0x3a   :  { %p4977_p10 = scmp.ne.s32.totalorder %s7055_s6, %s4976_s13  ;;  %p4980_p11 = scmp.lt.u32.totalorder %s4976_s13, %s7055_s6 }
  0x3c   :  { %p4982_p12 = pnand %p4980_p11, %p4977_p10 }
  0x3e   :  { %4985 = shalt.err (!%p4982_p12)
}
  0x3f   :  { %s4986_s4 = scalar_lea.vmem %s61_s29, 48  ;;  %s4990_s15 = scalar_lea.vmem %s61_s29, 64 }
  0x40   :  { %p4987_p13 = scmp.ne.s32.totalorder %s61_s29, %s4986_s4  ;;  %p4991_p0 = scmp.lt.s32.totalorder %s61_s29, %s61_s29 }
  0x41   :  { %p4992_p1 = scmp.lt.s32.totalorder %s4990_s15, %s4986_s4 }
  0x43   :  { %p4993_p2 = por %p4992_p1, %p4991_p0 }
  0x45   :  { %p4994_p3 = pnand %p4993_p2, %p4987_p13 }
  0x47   :  { %4997 = shalt.err (!%p4994_p3)
}
  0x48   :  { %63 = dma.hbm_to_vmem [thread:$0]  %s7055_s6, 48, %s61_s29, [#allocation7]  }
  0x49   :  { %s4998_s21 = scalar_lea.hbm %s7057_s8, 48 }
  0x4a   :  { %p4999_p4 = scmp.ne.s32.totalorder %s7057_s8, %s4998_s21  ;;  %p5002_p5 = scmp.lt.u32.totalorder %s4998_s21, %s7057_s8 }
  0x4c   :  { %p5004_p6 = pnand %p5002_p5, %p4999_p4 }
  0x4e   :  { %5007 = shalt.err (!%p5004_p6)
}
  0x4f   :  { %s5008_s5 = scalar_lea.vmem %s83_s23, 48  ;;  %s5012_s16 = scalar_lea.vmem %s83_s23, 64 }
  0x50   :  { %p5009_p7 = scmp.ne.s32.totalorder %s83_s23, %s5008_s5  ;;  %p5013_p8 = scmp.lt.s32.totalorder %s83_s23, %s83_s23 }
  0x51   :  { %p5014_p9 = scmp.lt.s32.totalorder %s5012_s16, %s5008_s5 }
  0x53   :  { %p5015_p10 = por %p5014_p9, %p5013_p8 }
  0x55   :  { %p5016_p11 = pnand %p5015_p10, %p5009_p7 }
  0x57   :  { %5019 = shalt.err (!%p5016_p11)
}
  0x58   :  { %85 = dma.hbm_to_vmem [thread:$0]  %s7057_s8, 48, %s83_s23, [#allocation10]  }
  0x59   :  { %5020 = dma.done.wait [#allocation5], 48  }
  0x5a   :  { %5021 = vsyncadd [#allocation5], 4294967248 }
  0x5b   :  { %5022 = dma.done.wait [#allocation7], 3120  }
  0x5c   :  { %5023 = vsyncadd [#allocation7], 4294964176 }
  0x5d   :  { %5024 = dma.done.wait [#allocation10], 3120  }
  0x5e   :  { %5025 = vsyncadd [#allocation10], 4294964176  ;;  %v7064_v1 = vmov 0   ;;  %v4478_v2 = vld [vmem:[%s7050_s1 + $0x4] ss:$12 sps:$4 sm:$0xff]   ;;  %vm177_vm0 = vcmask 130048   ;;  %v126_v59 = vlaneseq }
  0x5f   :  { %222 = vmatprep.mubr.bf16.mxu0 %v7064_v1  ;;  %v4480_v3 = vld [vmem:[%s7050_s1] ss:$12 sps:$4 sm:$0xff]   ;;  %190 = vmatprep.subr.bf16.mxu0 %v4478_v2  ;;  %v5187_v5 = vld [vmem:[%s7052_s3 + $0x4] ss:$12 sps:$4 sm:$0xff]   ;;  %v5197_v7 = vld [vmem:[%s7052_s3 + $0x1c] ss:$12 sps:$4 sm:$0xff]  }
  0x60   :  { %v4481_v4 = vld [vmem:[%s7049_s0] sm:$0xff]   ;;  %191 = vmatpush1.bf16.msra.mxu0 %v4480_v3  ;;  %v4488_v10 = vld [vmem:[%s7049_s0 + $0x8] sm:$0xff]   ;;  %v5222_v11 = vld [vmem:[%s7052_s3 + $0x30] ss:$12 sps:$4 sm:$0xff]   ;;  %v7066_v18 = vmov 0.0   ;;  %vm5035_vm1 = vmmov 0  }
  0x61   :  { %v5192_v6 = vld [vmem:[%s7052_s3] ss:$12 sps:$4 sm:$0xff]   ;;  %3868 = vmatprep.mubr.msk.bf16.mxu1 %vm177_vm0, %v4481_v4  ;;  %532 = vmatprep.subr.bf16.mxu0 %v5187_v5  ;;  %v5206_v8 = vld [vmem:[%s7052_s3 + $0x18] ss:$12 sps:$4 sm:$0xff]   ;;  %v4502_v13 = vld [vmem:[%s7050_s1 + $0x8] ss:$12 sps:$4 sm:$0xff]  }
  0x62   :  { %v5213_v9 = vld [vmem:[%s7052_s3 + $0x34] ss:$12 sps:$4 sm:$0xff]   ;;  %v5228_v12 = vld [vmem:[%s7052_s3 + $0x4c] ss:$12 sps:$4 sm:$0xff]   ;;  %v5245_v15 = vld [vmem:[%s7052_s3 + $0x64] ss:$12 sps:$4 sm:$0xff]   ;;  %3866 = vmatprep.subr.bf16.mxu1 %v4502_v13 }
  0x63   :  { %3491 = vmatmul.mubr.msk.bf16.vlgmr.msra.gmra.mrb[0].mxu0 %vm177_vm0, %v4481_v4  ;;  %v5238_v14 = vld [vmem:[%s7052_s3 + $0x48] ss:$12 sps:$4 sm:$0xff]   ;;  %3867 = vmatpush3.bf16.msra.mxu1 %v4502_v13  ;;  %v5260_v19 = vld [vmem:[%s7052_s3 + $0x60] ss:$12 sps:$4 sm:$0xff]   ;;  %v5282_v22 = vld [vmem:[%s7052_s3 + $0x78] ss:$12 sps:$4 sm:$0xff]  }
  0x64   :  { %533 = vmatpush1.bf16.msra.mxu0 %v5192_v6  ;;  %232 = vmatprep.mubr.bf16.mxu0 %v7064_v1  ;;  %v5250_v16 = vld [vmem:[%s7052_s3 + $0x8] ss:$12 sps:$4 sm:$0xff]   ;;  %v5273_v21 = vld [vmem:[%s7052_s3 + $0x20] ss:$12 sps:$4 sm:$0xff]   ;;  %v4503_v23 = vld [vmem:[%s7049_s0 + $0x18] sm:$0xff]   ;;  %v127_v60 = vshrl.u32 %v126_v59, 7 }
  0x65   :  { %534 = vmatprep.subr.bf16.mxu0 %v5197_v7  ;;  %v4495_v17 = vld [vmem:[%s7049_s0 + $0x10] sm:$0xff]   ;;  %3876 = vmatprep.subr.bf16.mxu1 %v7066_v18  ;;  %v5266_v20 = vld [vmem:[%s7052_s3 + $0x7c] ss:$12 sps:$4 sm:$0xff]   ;;  %v5303_v26 = vld [vmem:[%s7052_s3 + $0x38] ss:$12 sps:$4 sm:$0xff]   ;;  %vm3431_vm2 = vcmask 261120  }
  0x66   :  { %3869 = vmatmul.mubr.msk.bf16.vlgmr.msra.gmra.mrb[0].mxu1 %vm177_vm0, %v4488_v10  ;;  %v5292_v24 = vld [vmem:[%s7052_s3 + $0x94] ss:$12 sps:$4 sm:$0xff]   ;;  %v5297_v25 = vld [vmem:[%s7052_s3 + $0x90] ss:$12 sps:$4 sm:$0xff]   ;;  %v5308_v27 = vld [vmem:[%s7052_s3 + $0xac] ss:$12 sps:$4 sm:$0xff]  }
  0x67   :  { %3877 = vmatpush3.bf16.msra.mxu1 %v5250_v16  ;;  %3872 = vmatprep.mubr.msk.bf16.mxu1 %vm177_vm0, %v4495_v17  ;;  %v5315_v28 = vld [vmem:[%s7052_s3 + $0x50] ss:$12 sps:$4 sm:$0xff]   ;;  %v5322_v29 = vld [vmem:[%s7052_s3 + $0xa8] ss:$12 sps:$4 sm:$0xff]   ;;  %v5343_v31 = vld [vmem:[%s7052_s3 + $0x80] ss:$12 sps:$4 sm:$0xff]  }
  0x68   :  { %535 = vmatpush1.bf16.msra.mxu0 %v5206_v8  ;;  %3878 = vmatprep.subr.bf16.mxu1 %v7066_v18  ;;  %v5334_v30 = vld [vmem:[%s7052_s3 + $0x68] ss:$12 sps:$4 sm:$0xff]   ;;  %v5351_v32 = vld [vmem:[%s7052_s3 + $0x98] ss:$12 sps:$4 sm:$0xff]   ;;  %v5359_v33 = vld [vmem:[%s7052_s3 + $0xb0] ss:$12 sps:$4 sm:$0xff]  }
  0x69   :  { %536 = vmatprep.subr.bf16.mxu0 %v5213_v9  ;;  %v5368_v34 = vld [vmem:[#allocation6 + $0x4] ss:$12 sps:$4 sm:$0xff]   ;;  %v5370_v35 = vld [vmem:[#allocation6] ss:$12 sps:$4 sm:$0xff]   ;;  %v5372_v36 = vld [vmem:[#allocation6 + $0x8] ss:$12 sps:$4 sm:$0xff]  }
  0x6a   :  { %v5375_v37 = vld [vmem:[#allocation6 + $0x1c] ss:$12 sps:$4 sm:$0xff]   ;;  %v5381_v38 = vld [vmem:[#allocation6 + $0x18] ss:$12 sps:$4 sm:$0xff]   ;;  %v5383_v39 = vld [vmem:[#allocation6 + $0x20] ss:$12 sps:$4 sm:$0xff]  }
  0x6b   :  { %3492 = vmatmul.mubr.msk.bf16.gmra.mrb[4].mxu0 %vm177_vm0, %v4488_v10  ;;  %3879 = vmatpush3.bf16.msra.mxu1 %v5273_v21  ;;  %v5387_v40 = vld [vmem:[#allocation6 + $0x34] ss:$12 sps:$4 sm:$0xff]   ;;  %v5390_v41 = vld [vmem:[#allocation6 + $0x30] ss:$12 sps:$4 sm:$0xff]   ;;  %v5392_v42 = vld [vmem:[#allocation6 + $0x38] ss:$12 sps:$4 sm:$0xff]  }
  0x6c   :  { %537 = vmatpush1.bf16.msra.mxu0 %v5222_v11  ;;  %242 = vmatprep.mubr.bf16.mxu0 %v7064_v1  ;;  %v5397_v43 = vld [vmem:[#allocation6 + $0x4c] ss:$12 sps:$4 sm:$0xff]   ;;  %v5400_v44 = vld [vmem:[#allocation6 + $0x48] ss:$12 sps:$4 sm:$0xff]   ;;  %v5402_v45 = vld [vmem:[#allocation6 + $0x50] ss:$12 sps:$4 sm:$0xff]  }
  0x6d   :  { %538 = vmatprep.subr.bf16.mxu0 %v5228_v12  ;;  %3880 = vmatprep.subr.bf16.mxu1 %v7066_v18  ;;  %v5407_v46 = vld [vmem:[#allocation6 + $0x64] ss:$12 sps:$4 sm:$0xff]   ;;  %v5410_v47 = vld [vmem:[#allocation6 + $0x60] ss:$12 sps:$4 sm:$0xff]   ;;  %v5412_v48 = vld [vmem:[#allocation6 + $0x68] ss:$12 sps:$4 sm:$0xff]  }
  0x6e   :  { %3873 = vmatmul.mubr.msk.bf16.gmra.mrb[4].mxu1 %vm177_vm0, %v4503_v23  ;;  %7203 = vst [vmem:[#allocation15_spill] sm:$0xff] %v5407_v46  ;;  %7204 = vst [vmem:[#allocation16_spill] sm:$0xff] %v5410_v47  ;;  %v5414_v49 = vld [vmem:[#allocation6 + $0x7c] ss:$12 sps:$4 sm:$0xff]   ;;  %v5419_v50 = vld [vmem:[#allocation6 + $0x78] ss:$12 sps:$4 sm:$0xff]  }
  0x6f   :  { %3881 = vmatpush3.bf16.msra.mxu1 %v5303_v26  ;;  %3892 = vmatprep.mubr.msk.bf16.mxu1 %vm5035_vm1, %v7066_v18  ;;  %7205 = vst [vmem:[#allocation17_spill] sm:$0xff] %v5412_v48  ;;  %7206 = vst [vmem:[#allocation18_spill] sm:$0xff] %v5414_v49  ;;  %v5421_v51 = vld [vmem:[#allocation6 + $0x80] ss:$12 sps:$4 sm:$0xff]   ;;  %v5429_v53 = vld [vmem:[#allocation6 + $0x90] ss:$12 sps:$4 sm:$0xff]  }
  0x70   :  { %539 = vmatpush1.bf16.msra.mxu0 %v5238_v14  ;;  %3882 = vmatprep.subr.bf16.mxu1 %v7066_v18  ;;  %7207 = vst [vmem:[#allocation19_spill] sm:$0xff] %v5419_v50  ;;  %7208 = vst [vmem:[#allocation20_spill] sm:$0xff] %v5421_v51  ;;  %v5425_v52 = vld [vmem:[#allocation6 + $0x94] ss:$12 sps:$4 sm:$0xff]   ;;  %v5431_v54 = vld [vmem:[#allocation6 + $0x98] ss:$12 sps:$4 sm:$0xff]  }
  0x71   :  { %540 = vmatprep.subr.bf16.mxu0 %v5245_v15  ;;  %7209 = vst [vmem:[#allocation21_spill] sm:$0xff] %v5425_v52  ;;  %7210 = vst [vmem:[#allocation22_spill] sm:$0xff] %v5429_v53  ;;  %v5435_v55 = vld [vmem:[#allocation6 + $0xac] ss:$12 sps:$4 sm:$0xff]   ;;  %v5439_v56 = vld [vmem:[#allocation6 + $0xa8] ss:$12 sps:$4 sm:$0xff]  }
  0x72   :  { %7211 = vst [vmem:[#allocation23_spill] sm:$0xff] %v5431_v54  ;;  %7212 = vst [vmem:[#allocation24_spill] sm:$0xff] %v5435_v55  ;;  %v5441_v57 = vld [vmem:[#allocation6 + $0xb0] ss:$12 sps:$4 sm:$0xff]   ;;  %v5445_v58 = vld [vmem:[#allocation9 + $0x4] ss:$12 sps:$4 sm:$0xff]  }
  0x73   :  { %3493 = vmatmul.mubr.msk.bf16.gmra.mrb[8].mxu0 %vm177_vm0, %v4495_v17  ;;  %3883 = vmatpush3.bf16.msra.mxu1 %v5315_v28  ;;  %7213 = vst [vmem:[#allocation25_spill] sm:$0xff] %v5439_v56  ;;  %7214 = vst [vmem:[#allocation26_spill] sm:$0xff] %v5441_v57  ;;  %v5451_v61 = vsub.s32 0, %v127_v60  ;;  %v124_v62 = vld [vmem:[%s7051_s2] sm:$0x7]  ;;  %v5456_v63 = vsub.s32 1, %v127_v60 }
  0x74   :  { %541 = vmatpush1.bf16.msra.mxu0 %v5260_v19  ;;  %252 = vmatprep.mubr.bf16.mxu0 %v7064_v1  ;;  %7215 = vst [vmem:[#allocation27_spill] sm:$0xff] %v5445_v58  ;;  %v5464_v59 = vsub.s32 2, %v127_v60  ;;  %vm3475_vm3 = vcmask 7168  }
  0x75   :  { %542 = vmatprep.subr.bf16.mxu0 %v5266_v20  ;;  %3884 = vmatprep.subr.bf16.mxu1 %v7066_v18  ;;  %7216 = vst [vmem:[#allocation28_spill] sm:$0xff] %v5451_v61  ;;  %7217 = vst [vmem:[#allocation29_spill] sm:$0xff] %v5456_v63  ;;  %v129_v2 = vrot.slane %v124_v62, %v5451_v61  ;;  %v133_v4 = vrot.slane %v124_v62, %v5456_v63 }
  0x77   :  { %3885 = vmatpush3.bf16.msra.mxu1 %v5334_v30 }
  0x78   :  { %543 = vmatpush1.bf16.msra.mxu0 %v5282_v22  ;;  %3886 = vmatprep.subr.bf16.mxu1 %v7066_v18 }
  0x79   :  { %544 = vmatprep.subr.bf16.mxu0 %v5292_v24 }
  0x7b   :  { %3494 = vmatmul.mubr.msk.bf16.gmra.mrb[12].mxu0 %vm177_vm0, %v4503_v23  ;;  %3887 = vmatpush3.bf16.msra.mxu1 %v5343_v31 }
  0x7c   :  { %545 = vmatpush1.bf16.msra.mxu0 %v5297_v25  ;;  %564 = vmatprep.mubr.bf16.mxu0 %v7064_v1 }
  0x7d   :  { %546 = vmatprep.subr.bf16.mxu0 %v5308_v27  ;;  %3888 = vmatprep.subr.bf16.mxu1 %v7066_v18 }
  0x7f   :  { %3889 = vmatpush3.bf16.msra.mxu1 %v5351_v32 }
  0x80   :  { %547 = vmatpush1.bf16.msra.mxu0 %v5322_v29  ;;  %3890 = vmatprep.subr.bf16.mxu1 %v7066_v18 }
  0x81   :  { %811 = vmatprep.subr.bf16.mxu0 %v5368_v34 }
  0x83   :  { %565 = vmatmul.mubr.bf16.vlgmr.msra.gmra.mrb[16].mxu0 %v7064_v1  ;;  %3891 = vmatpush3.bf16.msra.mxu1 %v5359_v33 }
  0x84   :  { %843 = vmatprep.mubr.bf16.mxu0 %v7064_v1  ;;  %3896 = vmatprep.subr.bf16.mxu1 %v7066_v18 }
  0x85   :  { %812 = vmatpush1.bf16.msra.mxu0 %v5370_v35 }
  0x86   :  { %3893 = vmatmul.mubr.bf16.vlgmr.msra.gmra.mrb[8].mxu1 %v7064_v1  ;;  %813 = vmatprep.subr.bf16.mxu0 %v5375_v37 }
  0x87   :  { %3912 = vmatprep.mubr.msk.bf16.mxu1 %vm5035_vm1, %v7066_v18  ;;  %3897 = vmatpush3.bf16.msra.mxu1 %v5372_v36 }
  0x88   :  { %3898 = vmatprep.subr.bf16.mxu1 %v7066_v18 }
  0x89   :  { %814 = vmatpush1.bf16.msra.mxu0 %v5381_v38 }
  0x8a   :  { %815 = vmatprep.subr.bf16.mxu0 %v5387_v40 }
  0x8b   :  { %3899 = vmatpush3.bf16.msra.mxu1 %v5383_v39 }
  0x8c   :  { %3900 = vmatprep.subr.bf16.mxu1 %v7066_v18 }
  0x8d   :  { %816 = vmatpush1.bf16.msra.mxu0 %v5390_v41 }
  0x8e   :  { %817 = vmatprep.subr.bf16.mxu0 %v5397_v43 }
  0x8f   :  { %3901 = vmatpush3.bf16.msra.mxu1 %v5392_v42 }
  0x90   :  { %3902 = vmatprep.subr.bf16.mxu1 %v7066_v18 }
  0x91   :  { %818 = vmatpush1.bf16.msra.mxu0 %v5400_v44 }
  0x92   :  { %819 = vmatprep.subr.bf16.mxu0 %v5407_v46 }
  0x93   :  { %3903 = vmatpush3.bf16.msra.mxu1 %v5402_v45 }
  0x94   :  { %3904 = vmatprep.subr.bf16.mxu1 %v7066_v18 }
  0x95   :  { %820 = vmatpush1.bf16.msra.mxu0 %v5410_v47 }
  0x96   :  { %821 = vmatprep.subr.bf16.mxu0 %v5414_v49 }
  0x97   :  { %3905 = vmatpush3.bf16.msra.mxu1 %v5412_v48 }
  0x98   :  { %3906 = vmatprep.subr.bf16.mxu1 %v7066_v18 }
  0x99   :  { %822 = vmatpush1.bf16.msra.mxu0 %v5419_v50 }
  0x9a   :  { %823 = vmatprep.subr.bf16.mxu0 %v5425_v52 }
  0x9b   :  { %3907 = vmatpush3.bf16.msra.mxu1 %v5421_v51 }
  0x9c   :  { %3908 = vmatprep.subr.bf16.mxu1 %v7066_v18 }
  0x9d   :  { %824 = vmatpush1.bf16.msra.mxu0 %v5429_v53  ;;  %v137_v53 = vrot.slane %v124_v62, %v5464_v59 }
  0x9e   :  { %825 = vmatprep.subr.bf16.mxu0 %v5435_v55 }
  0x9f   :  { %3909 = vmatpush3.bf16.msra.mxu1 %v5431_v54 }
  0xa0   :  { %3910 = vmatprep.subr.bf16.mxu1 %v7066_v18 }
  0xa1   :  { %826 = vmatpush1.bf16.msra.mxu0 %v5439_v56 }
  0xa2   :  { %1069 = vmatprep.subr.bf16.mxu0 %v5445_v58 }
  0xa3   :  { %3911 = vmatpush3.bf16.msra.mxu1 %v5441_v57 }
  0xa4   :  { %3916 = vmatprep.subr.bf16.mxu1 %v7066_v18 }
 0x136   :  { %v224_v0 = vpop.f32.mrb[0].mxu0 }
 0x137   :  { %v226_v3 = vpop.f32.mrb[1].mxu0 }
 0x138   :  { %v228_v10 = vpop.f32.mrb[2].mxu0 }
 0x139   :  { %v5460_v13 = vadd.f32 %v228_v10, %v129_v2  ;;  %v230_v17 = vpop.f32.mrb[3].mxu0  ;;  %v3870_v10 = vpop.f32.mrb[0].mxu1 }
 0x13a   :  { %v5462_v23 = vadd.f32 %v230_v17, %v133_v4  ;;  %v297_v17 = vpop.f32.mrb[1].mxu1 }
 0x13b   :  { %7218 = vst [vmem:[#allocation30_spill] sm:$0xff] %v5460_v13  ;;  %v5475_v13 = vadd.f32 %v3870_v10, %v137_v53 }
 0x13c   :  { %7219 = vst [vmem:[#allocation31_spill] sm:$0xff] %v5462_v23  ;;  %v3871_v23 = vpop.f32.mrb[2].mxu1 }
 0x13d   :  { %7224 = vst [vmem:[#allocation36_spill] sm:$0xff] %v5475_v13 }
 0x13e   :  { %v234_v1 = vpop.f32.mrb[4].mxu0 }
 0x13f   :  { %v5466_v18 = vadd.f32 %v234_v1, %v129_v2  ;;  %v236_v58 = vpop.f32.mrb[5].mxu0 }
 0x140   :  { %v5468_v57 = vadd.f32 %v236_v58, %v133_v4  ;;  %v238_v56 = vpop.f32.mrb[6].mxu0  ;;  %v300_v58 = vpop.f32.mrb[3].mxu1 }
 0x141   :  { %7220 = vst [vmem:[#allocation32_spill] sm:$0xff] %v5466_v18  ;;  %v5470_v55 = vadd.f32 %v238_v56, %v129_v2  ;;  %v240_v54 = vpop.f32.mrb[7].mxu0  ;;  %v5479_v18 = vadd.f32 %v3871_v23, %v137_v53  ;;  %v3874_v10 = vpop.f32.mrb[4].mxu1 }
 0x142   :  { %7221 = vst [vmem:[#allocation33_spill] sm:$0xff] %v5468_v57  ;;  %v5473_v52 = vadd.f32 %v240_v54, %v133_v4  ;;  %v5489_v13 = vadd.f32 %v3874_v10, %v137_v53  ;;  %v313_v50 = vpop.f32.mrb[5].mxu1 }
 0x143   :  { %7222 = vst [vmem:[#allocation34_spill] sm:$0xff] %v5470_v55  ;;  %7226 = vst [vmem:[#allocation38_spill] sm:$0xff] %v5479_v18  ;;  %v5483_v55 = vadd.f32 %v300_v58, %v137_v53  ;;  %v3875_v23 = vpop.f32.mrb[6].mxu1 }
 0x144   :  { %7223 = vst [vmem:[#allocation35_spill] sm:$0xff] %v5473_v52  ;;  %7231 = vst [vmem:[#allocation43_spill] sm:$0xff] %v5489_v13  ;;  %v316_v58 = vpop.f32.mrb[7].mxu1 }
 0x145   :  { %7228 = vst [vmem:[#allocation40_spill] sm:$0xff] %v5483_v55 }
 0x146   :  { %v244_v60 = vpop.f32.mrb[8].mxu0 }
 0x147   :  { %v5477_v51 = vadd.f32 %v244_v60, %v129_v2  ;;  %v246_v1 = vpop.f32.mrb[9].mxu0 }
 0x148   :  { %v5481_v57 = vadd.f32 %v246_v1, %v133_v4  ;;  %v248_v56 = vpop.f32.mrb[10].mxu0 }
 0x149   :  { %7225 = vst [vmem:[#allocation37_spill] sm:$0xff] %v5477_v51  ;;  %v5485_v62 = vadd.f32 %v248_v56, %v129_v2  ;;  %v250_v54 = vpop.f32.mrb[11].mxu0  ;;  %v5491_v51 = vadd.f32 %v313_v50, %v137_v53 }
 0x14a   :  { %7227 = vst [vmem:[#allocation39_spill] sm:$0xff] %v5481_v57  ;;  %v5487_v52 = vadd.f32 %v250_v54, %v133_v4  ;;  %v5495_v57 = vadd.f32 %v3875_v23, %v137_v53  ;;  %v5499_v54 = vadd.f32 %v316_v58, %v137_v53 }
 0x14b   :  { %7229 = vst [vmem:[#allocation41_spill] sm:$0xff] %v5485_v62  ;;  %7232 = vst [vmem:[#allocation44_spill] sm:$0xff] %v5491_v51  ;;  %v387_v62 = vld [vmem:[#allocation4] sm:$0x7] }
 0x14c   :  { %7230 = vst [vmem:[#allocation42_spill] sm:$0xff] %v5487_v52  ;;  %7234 = vst [vmem:[#allocation46_spill] sm:$0xff] %v5495_v57  ;;  %v5506_v50 = vrot.slane %v387_v62, %v5451_v61  ;;  %v225_v57 = vadd.f32 %v224_v0, %v129_v2  ;;  %v5514_v0 = vrot.slane %v387_v62, %v5464_v59 }
 0x14d   :  { %7236 = vst [vmem:[#allocation48_spill] sm:$0xff] %v5499_v54 }
 0x14e   :  { %v254_v60 = vpop.f32.mrb[12].mxu0  ;;  %7239 = vst [vmem:[#allocation51_spill] sm:$0xff] %v5506_v50 }
 0x14f   :  { %v5493_v18 = vadd.f32 %v254_v60, %v129_v2  ;;  %v256_v1 = vpop.f32.mrb[13].mxu0  ;;  %v5509_v60 = vrot.slane %v387_v62, %v5456_v63  ;;  %v5535_v62 = vld [vmem:[#allocation9 + $0x20] ss:$12 sps:$4 sm:$0xff]  }
 0x150   :  { %v5497_v55 = vadd.f32 %v256_v1, %v133_v4  ;;  %v258_v56 = vpop.f32.mrb[14].mxu0 }
 0x151   :  { %7233 = vst [vmem:[#allocation45_spill] sm:$0xff] %v5493_v18  ;;  %v5501_v52 = vadd.f32 %v258_v56, %v129_v2  ;;  %v260_v10 = vpop.f32.mrb[15].mxu0  ;;  %v227_v18 = vadd.f32 %v226_v3, %v133_v4 }
 0x152   :  { %7235 = vst [vmem:[#allocation47_spill] sm:$0xff] %v5497_v55  ;;  %v5503_v13 = vadd.f32 %v260_v10, %v133_v4 }
 0x153   :  { %7237 = vst [vmem:[#allocation49_spill] sm:$0xff] %v5501_v52 }
 0x154   :  { %7238 = vst [vmem:[#allocation50_spill] sm:$0xff] %v5503_v13 }
 0x156   :  { %v566_v23 = vpop.f32.mrb[16].mxu0 }
 0x157   :  { %v567_v1 = vadd.f32 %v566_v23, %v5506_v50  ;;  %v568_v55 = vpop.f32.mrb[17].mxu0  ;;  %v5539_v23 = vld [vmem:[#allocation9 + $0x34] ss:$12 sps:$4 sm:$0xff]  }
 0x158   :  { %v569_v58 = vadd.f32 %v568_v55, %v5509_v60  ;;  %v570_v54 = vpop.f32.mrb[18].mxu0 }
 0x159   :  { %v613_v56 = vadd.f32 %v567_v1, %v225_v57  ;;  %v571_v52 = vpop.f32.mrb[19].mxu0  ;;  %v607_v13 = vpop.f32.mrb[8].mxu1  ;;  %v7240_v54 = vmov 0.0   ;;  %v7241_v1 = vmov 0  }
 0x15a   :  { %v614_v51 = vadd.f32 %v569_v58, %v227_v18  ;;  %v3894_v49 = vpop.f32.mrb[9].mxu1  ;;  %v608_v55 = vadd.f32 %v607_v13, %v5514_v0  ;;  %v298_v52 = vadd.f32 %v297_v17, %v137_v53  ;;  %v5527_v53 = vld [vmem:[#allocation9 + $0x1c] ss:$12 sps:$4 sm:$0xff]   ;;  %v5533_v17 = vld [vmem:[#allocation9 + $0x18] ss:$12 sps:$4 sm:$0xff]  }
 0x15b   :  { %v3523_v10 = vmul.f32 -1.442695, %v613_v56  ;;  %v610_v48 = vpop.f32.mrb[10].mxu1  ;;  %v5546_v58 = vld [vmem:[#allocation9 + $0x30] ss:$12 sps:$4 sm:$0xff]  }
 0x15c   :  { %v3524_v61 = vmul.f32 -1.442695, %v614_v51  ;;  %v3895_v47 = vpop.f32.mrb[11].mxu1  ;;  %v5548_v56 = vld [vmem:[#allocation9 + $0x38] ss:$12 sps:$4 sm:$0xff]  }
 0x15d   :  { %4600 = vpow2.f32 %v3523_v10  ;;  %v5552_v10 = vld [vmem:[#allocation9 + $0x4c] ss:$12 sps:$4 sm:$0xff]  }
 0x15e   :  { %4602 = vpow2.f32 %v3524_v61  ;;  %v5521_v61 = vld [vmem:[#allocation9 + $0x8] ss:$12 sps:$4 sm:$0xff]  }
 0x167   :  { %v4601_v63 = vpop.eup %4600 }
 0x168   :  { %v621_v46 = vadd.f32 1.0, %v4601_v63  ;;  %v4603_v2 = vpop.eup %4602 }
 0x169   :  { %v622_v3 = vadd.f32 1.0, %v4603_v2  ;;  %v5558_v2 = vld [vmem:[#allocation9 + $0x50] ss:$12 sps:$4 sm:$0xff]  }
 0x16a   :  { %4604 = vrcp.f32 %v621_v46  ;;  %v5519_v46 = vld [vmem:[#allocation9] ss:$12 sps:$4 sm:$0xff]  }
 0x174   :  { %v4605_v57 = vpop.eup %4604 }
 0x175   :  { %v627_v18 = vmul.f32 %v4605_v57, %v608_v55  ;;  %v5556_v55 = vld [vmem:[#allocation9 + $0x48] ss:$12 sps:$4 sm:$0xff]   ;;  %v5562_v57 = vld [vmem:[#allocation9 + $0x64] ss:$12 sps:$4 sm:$0xff]  }
 0x177   :  { %v628_v4 = vadd.f32 %v627_v18, %v298_v52  ;;  %v5566_v52 = vld [vmem:[#allocation9 + $0x60] ss:$12 sps:$4 sm:$0xff]   ;;  %v5568_v18 = vld [vmem:[#allocation9 + $0x68] ss:$12 sps:$4 sm:$0xff]  }
 0x178   :  { %7242 = vst [vmem:[#allocation52_spill] sm:$0xff] %v5566_v52  ;;  %7243 = vst [vmem:[#allocation53_spill] sm:$0xff] %v5568_v18 }
 0x179   :  { %4606 = vtanh.f32 %v628_v4  ;;  %v5576_v4 = vld [vmem:[#allocation9 + $0x78] ss:$12 sps:$4 sm:$0xff]  }
 0x17a   :  { %4608 = vrcp.f32 %v622_v3  ;;  %v5572_v3 = vld [vmem:[#allocation9 + $0x7c] ss:$12 sps:$4 sm:$0xff]  }
 0x17b   :  { %7244 = vst [vmem:[#allocation54_spill] sm:$0xff] %v5572_v3 }
 0x183   :  { %v4607_v49 = vpop.eup %4606 }
 0x184   :  { %v630_v48 = vsub.f32 0.0, %v4607_v49  ;;  %v4609_v51 = vpop.eup %4608 }
 0x186   :  { %v631_v47 = vmul.f32 %v4609_v51, %v630_v48  ;;  %v5582_v48 = vld [vmem:[#allocation9 + $0x94] ss:$12 sps:$4 sm:$0xff]   ;;  %v5586_v51 = vld [vmem:[#allocation9 + $0x90] ss:$12 sps:$4 sm:$0xff]  }
 0x188   :  { %v5517_v63 = vadd.f32 %v4607_v49, %v631_v47  ;;  %v5578_v49 = vld [vmem:[#allocation9 + $0x80] ss:$12 sps:$4 sm:$0xff]   ;;  %v5588_v47 = vld [vmem:[#allocation9 + $0x98] ss:$12 sps:$4 sm:$0xff]  }
 0x18a   :  { %v5525_v13 = vpack.c.bf16 %v5517_v63, %v5517_v63 }
 0x18c   :  { %844 = vmatmul.mubr.bf16.vlgmr.msra.gmra.mrb[20].mxu0 %v5525_v13  ;;  %3913 = vmatmul.mubr.bf16.vlgmr.msra.gmra.mrb[12].mxu1 %v5525_v13 }
 0x18d   :  { %1070 = vmatpush1.bf16.msra.mxu0 %v5519_v46  ;;  %3917 = vmatpush3.bf16.msra.mxu1 %v5521_v61 }
 0x18e   :  { %1071 = vmatprep.subr.bf16.mxu0 %v5527_v53  ;;  %3918 = vmatprep.subr.bf16.mxu1 %v7240_v54 }
 0x18f   :  { %1101 = vmatprep.mubr.bf16.mxu0 %v7241_v1  ;;  %3932 = vmatprep.mubr.msk.bf16.mxu1 %vm5035_vm1, %v7240_v54 }
 0x191   :  { %1072 = vmatpush1.bf16.msra.mxu0 %v5533_v17  ;;  %3919 = vmatpush3.bf16.msra.mxu1 %v5535_v62 }
 0x192   :  { %1073 = vmatprep.subr.bf16.mxu0 %v5539_v23  ;;  %3920 = vmatprep.subr.bf16.mxu1 %v7240_v54 }
 0x195   :  { %1074 = vmatpush1.bf16.msra.mxu0 %v5546_v58  ;;  %3921 = vmatpush3.bf16.msra.mxu1 %v5548_v56 }
 0x196   :  { %1075 = vmatprep.subr.bf16.mxu0 %v5552_v10  ;;  %3922 = vmatprep.subr.bf16.mxu1 %v7240_v54 }
 0x199   :  { %1076 = vmatpush1.bf16.msra.mxu0 %v5556_v55  ;;  %3923 = vmatpush3.bf16.msra.mxu1 %v5558_v2 }
 0x19a   :  { %1077 = vmatprep.subr.bf16.mxu0 %v5562_v57  ;;  %3924 = vmatprep.subr.bf16.mxu1 %v7240_v54 }
 0x19d   :  { %1078 = vmatpush1.bf16.msra.mxu0 %v5566_v52  ;;  %3925 = vmatpush3.bf16.msra.mxu1 %v5568_v18  ;;  %v5592_v18 = vld [vmem:[#allocation9 + $0xac] ss:$12 sps:$4 sm:$0xff]   ;;  %v5598_v52 = vld [vmem:[#allocation9 + $0xb0] ss:$12 sps:$4 sm:$0xff]  }
 0x19e   :  { %1079 = vmatprep.subr.bf16.mxu0 %v5572_v3  ;;  %3926 = vmatprep.subr.bf16.mxu1 %v7240_v54  ;;  %v5596_v3 = vld [vmem:[#allocation9 + $0xa8] ss:$12 sps:$4 sm:$0xff]  }
 0x1a1   :  { %1080 = vmatpush1.bf16.msra.mxu0 %v5576_v4  ;;  %3927 = vmatpush3.bf16.msra.mxu1 %v5578_v49 }
 0x1a2   :  { %1081 = vmatprep.subr.bf16.mxu0 %v5582_v48  ;;  %3928 = vmatprep.subr.bf16.mxu1 %v7240_v54 }
 0x1a5   :  { %1082 = vmatpush1.bf16.msra.mxu0 %v5586_v51  ;;  %3929 = vmatpush3.bf16.msra.mxu1 %v5588_v47 }
 0x1a6   :  { %1083 = vmatprep.subr.bf16.mxu0 %v5592_v18  ;;  %3930 = vmatprep.subr.bf16.mxu1 %v7240_v54 }
 0x1a9   :  { %1084 = vmatpush1.bf16.msra.mxu0 %v5596_v3  ;;  %3931 = vmatpush3.bf16.msra.mxu1 %v5598_v52 }
 0x1aa   :  { %1173 = vmatprep.subr.bf16.mxu0 %v5187_v5  ;;  %3936 = vmatprep.subr.bf16.mxu1 %v7240_v54  ;;  %v7245_v5 = vld [vmem:[#allocation15_spill] sm:$0xff] }
 0x1ac   :  { %1102 = vmatmul.mubr.bf16.vlgmr.msra.gmra.mrb[20].mxu0 %v7241_v1  ;;  %3933 = vmatmul.mubr.bf16.vlgmr.msra.gmra.mrb[16].mxu1 %v7241_v1 }
 0x1ad   :  { %1174 = vmatpush1.bf16.msra.mxu0 %v5192_v6  ;;  %3937 = vmatpush3.bf16.msra.mxu1 %v5250_v16  ;;  %v7246_v6 = vld [vmem:[#allocation16_spill] sm:$0xff] }
 0x1ae   :  { %1175 = vmatprep.subr.bf16.mxu0 %v5197_v7  ;;  %3938 = vmatprep.subr.bf16.mxu1 %v7240_v54  ;;  %v7247_v7 = vld [vmem:[#allocation17_spill] sm:$0xff]  ;;  %v7254_v16 = vld [vmem:[#allocation24_spill] sm:$0xff] }
 0x1af   :  { %1205 = vmatprep.mubr.bf16.mxu0 %v7241_v1  ;;  %3952 = vmatprep.mubr.msk.bf16.mxu1 %vm5035_vm1, %v7240_v54 }
 0x1b1   :  { %1176 = vmatpush1.bf16.msra.mxu0 %v5206_v8  ;;  %3939 = vmatpush3.bf16.msra.mxu1 %v5273_v21  ;;  %v7248_v8 = vld [vmem:[#allocation18_spill] sm:$0xff]  ;;  %v7257_v21 = vld [vmem:[#allocation27_spill] sm:$0xff] }
 0x1b2   :  { %1177 = vmatprep.subr.bf16.mxu0 %v5213_v9  ;;  %3940 = vmatprep.subr.bf16.mxu1 %v7240_v54  ;;  %v7249_v9 = vld [vmem:[#allocation19_spill] sm:$0xff] }
 0x1b5   :  { %1178 = vmatpush1.bf16.msra.mxu0 %v5222_v11  ;;  %3941 = vmatpush3.bf16.msra.mxu1 %v5303_v26  ;;  %v7250_v11 = vld [vmem:[#allocation20_spill] sm:$0xff] }
 0x1b6   :  { %1179 = vmatprep.subr.bf16.mxu0 %v5228_v12  ;;  %3942 = vmatprep.subr.bf16.mxu1 %v7240_v54  ;;  %v7251_v12 = vld [vmem:[#allocation21_spill] sm:$0xff] }
 0x1b9   :  { %1180 = vmatpush1.bf16.msra.mxu0 %v5238_v14  ;;  %3943 = vmatpush3.bf16.msra.mxu1 %v5315_v28  ;;  %v7252_v14 = vld [vmem:[#allocation22_spill] sm:$0xff] }
 0x1ba   :  { %1181 = vmatprep.subr.bf16.mxu0 %v5245_v15  ;;  %3944 = vmatprep.subr.bf16.mxu1 %v7240_v54  ;;  %v7253_v15 = vld [vmem:[#allocation23_spill] sm:$0xff]  ;;  %v666_v28 = vld [vmem:[#allocation8] sm:$0x7] }
 0x1bd   :  { %1182 = vmatpush1.bf16.msra.mxu0 %v5260_v19  ;;  %3945 = vmatpush3.bf16.msra.mxu1 %v5334_v30  ;;  %v7255_v19 = vld [vmem:[#allocation25_spill] sm:$0xff] }
 0x1be   :  { %1183 = vmatprep.subr.bf16.mxu0 %v5266_v20  ;;  %3946 = vmatprep.subr.bf16.mxu1 %v7240_v54  ;;  %v7256_v20 = vld [vmem:[#allocation26_spill] sm:$0xff] }
 0x1c1   :  { %1184 = vmatpush1.bf16.msra.mxu0 %v5282_v22  ;;  %3947 = vmatpush3.bf16.msra.mxu1 %v5343_v31 }
 0x1c2   :  { %1185 = vmatprep.subr.bf16.mxu0 %v5292_v24  ;;  %3948 = vmatprep.subr.bf16.mxu1 %v7240_v54 }
 0x1c5   :  { %1186 = vmatpush1.bf16.msra.mxu0 %v5297_v25  ;;  %3949 = vmatpush3.bf16.msra.mxu1 %v5351_v32 }
 0x1c6   :  { %1187 = vmatprep.subr.bf16.mxu0 %v5308_v27  ;;  %3950 = vmatprep.subr.bf16.mxu1 %v7240_v54  ;;  %v924_v27 = vld [vmem:[#allocation11] sm:$0x7] }
 0x1c9   :  { %1188 = vmatpush1.bf16.msra.mxu0 %v5322_v29  ;;  %3951 = vmatpush3.bf16.msra.mxu1 %v5359_v33  ;;  %v7258_v29 = vld [vmem:[#allocation28_spill] sm:$0xff] }
 0x1ca   :  { %1275 = vmatprep.subr.bf16.mxu0 %v5368_v34  ;;  %3956 = vmatprep.subr.bf16.mxu1 %v7240_v54  ;;  %v671_v30 = vrot.slane %v666_v28, %v7258_v29 }
 0x1cc   :  { %1206 = vmatmul.mubr.bf16.vlgmr.msra.gmra.mrb[24].mxu0 %v5525_v13  ;;  %3953 = vmatmul.mubr.bf16.vlgmr.msra.gmra.mrb[20].mxu1 %v5525_v13  ;;  %v929_v13 = vrot.slane %v924_v27, %v7258_v29 }
 0x1cd   :  { %1276 = vmatpush1.bf16.msra.mxu0 %v5370_v35  ;;  %3957 = vmatpush3.bf16.msra.mxu1 %v5372_v36 }
 0x1ce   :  { %1277 = vmatprep.subr.bf16.mxu0 %v5375_v37  ;;  %3958 = vmatprep.subr.bf16.mxu1 %v7240_v54 }
 0x1cf   :  { %1307 = vmatprep.mubr.bf16.mxu0 %v7241_v1  ;;  %3972 = vmatprep.mubr.msk.bf16.mxu1 %vm5035_vm1, %v7240_v54 }
 0x1d1   :  { %1278 = vmatpush1.bf16.msra.mxu0 %v5381_v38  ;;  %3959 = vmatpush3.bf16.msra.mxu1 %v5383_v39 }
 0x1d2   :  { %1279 = vmatprep.subr.bf16.mxu0 %v5387_v40  ;;  %3960 = vmatprep.subr.bf16.mxu1 %v7240_v54 }
 0x1d5   :  { %1280 = vmatpush1.bf16.msra.mxu0 %v5390_v41  ;;  %3961 = vmatpush3.bf16.msra.mxu1 %v5392_v42 }
 0x1d6   :  { %1281 = vmatprep.subr.bf16.mxu0 %v5397_v43  ;;  %3962 = vmatprep.subr.bf16.mxu1 %v7240_v54 }
 0x1d9   :  { %1282 = vmatpush1.bf16.msra.mxu0 %v5400_v44  ;;  %3963 = vmatpush3.bf16.msra.mxu1 %v5402_v45 }
 0x1da   :  { %1283 = vmatprep.subr.bf16.mxu0 %v7245_v5  ;;  %3964 = vmatprep.subr.bf16.mxu1 %v7240_v54 }
 0x1dd   :  { %1284 = vmatpush1.bf16.msra.mxu0 %v7246_v6  ;;  %3965 = vmatpush3.bf16.msra.mxu1 %v7247_v7 }
 0x1de   :  { %1285 = vmatprep.subr.bf16.mxu0 %v7248_v8  ;;  %3966 = vmatprep.subr.bf16.mxu1 %v7240_v54 }
 0x1e1   :  { %1286 = vmatpush1.bf16.msra.mxu0 %v7249_v9  ;;  %3967 = vmatpush3.bf16.msra.mxu1 %v7250_v11 }
 0x1e2   :  { %1287 = vmatprep.subr.bf16.mxu0 %v7251_v12  ;;  %3968 = vmatprep.subr.bf16.mxu1 %v7240_v54 }
 0x1e5   :  { %1288 = vmatpush1.bf16.msra.mxu0 %v7252_v14  ;;  %3969 = vmatpush3.bf16.msra.mxu1 %v7253_v15  ;;  %v7260_v14 = vld [vmem:[#allocation29_spill] sm:$0xff] }
 0x1e6   :  { %1289 = vmatprep.subr.bf16.mxu0 %v7254_v16  ;;  %3970 = vmatprep.subr.bf16.mxu1 %v7240_v54  ;;  %v5682_v16 = vadd.f32 %v929_v13, %v671_v30  ;;  %v933_v12 = vrot.slane %v924_v27, %v7260_v14 }
 0x1e8   :  { %7259 = vst [vmem:[#allocation28_spill] sm:$0xff] %v5682_v16 }
 0x1e9   :  { %1290 = vmatpush1.bf16.msra.mxu0 %v7255_v19  ;;  %3971 = vmatpush3.bf16.msra.mxu1 %v7256_v20 }
 0x1ea   :  { %1357 = vmatprep.subr.bf16.mxu0 %v7257_v21  ;;  %3976 = vmatprep.subr.bf16.mxu1 %v7240_v54  ;;  %v675_v21 = vrot.slane %v666_v28, %v7260_v14  ;;  %v5694_v14 = vrot.slane %v666_v28, %v5464_v59 }
 0x1ec   :  { %v5687_v6 = vadd.f32 %v933_v12, %v675_v21 }
 0x1ee   :  { %7261 = vst [vmem:[#allocation29_spill] sm:$0xff] %v5687_v6 }
 0x25f   :  { %v886_v22 = vpop.f32.mrb[12].mxu1 }
 0x260   :  { %v3914_v24 = vpop.f32.mrb[13].mxu1 }
 0x261   :  { %v889_v25 = vpop.f32.mrb[14].mxu1 }
 0x262   :  { %v3915_v26 = vpop.f32.mrb[15].mxu1 }
 0x27f   :  { %v1103_v15 = vpop.f32.mrb[20].mxu0  ;;  %v1144_v19 = vpop.f32.mrb[16].mxu1 }
 0x280   :  { %v4405_v20 = vadd.f32 %v5682_v16, %v1103_v15  ;;  %v1105_v11 = vpop.f32.mrb[21].mxu0  ;;  %v3934_v24 = vpop.f32.mrb[17].mxu1  ;;  %v5691_v15 = vrot.slane %v924_v27, %v5464_v59 }
 0x281   :  { %v1107_v25 = vpop.f32.mrb[22].mxu0  ;;  %v1147_v26 = vpop.f32.mrb[18].mxu1  ;;  %v4407_v29 = vadd.f32 %v5687_v6, %v1105_v11 }
 0x282   :  { %v3573_v9 = vmul.f32 -1.442695, %v4405_v20  ;;  %v1108_v8 = vpop.f32.mrb[23].mxu0  ;;  %v3935_v7 = vpop.f32.mrb[19].mxu1  ;;  %7262 = vst [vmem:[#allocation55_spill] sm:$0xff] %v5691_v15  ;;  %v1145_v20 = vadd.f32 %v1144_v19, %v5691_v15  ;;  %v7263_v19 = vld [vmem:[#allocation30_spill] sm:$0xff] }
 0x283   :  { %v3574_v30 = vmul.f32 -1.442695, %v4407_v29 }
 0x284   :  { %4610 = vpow2.f32 %v3573_v9  ;;  %v887_v9 = vadd.f32 %v886_v22, %v5694_v14  ;;  %v7264_v22 = vld [vmem:[#allocation31_spill] sm:$0xff] }
 0x285   :  { %4612 = vpow2.f32 %v3574_v30 }
 0x28e   :  { %v4611_v13 = vpop.eup %4610 }
 0x28f   :  { %v1158_v5 = vadd.f32 1.0, %v4611_v13  ;;  %v4613_v8 = vpop.eup %4612 }
 0x290   :  { %v1159_v21 = vadd.f32 1.0, %v4613_v8 }
 0x291   :  { %4614 = vrcp.f32 %v1158_v5 }
 0x29b   :  { %v4615_v7 = vpop.eup %4614 }
 0x29c   :  { %v1164_v12 = vmul.f32 %v4615_v7, %v1145_v20 }
 0x29e   :  { %v1165_v11 = vadd.f32 %v1164_v12, %v887_v9 }
 0x29f   :  { %v1207_v24 = vpop.f32.mrb[24].mxu0  ;;  %v1248_v25 = vpop.f32.mrb[20].mxu1 }
 0x2a0   :  { %4616 = vtanh.f32 %v1165_v11  ;;  %v1208_v5 = vadd.f32 %v1207_v24, %v5506_v50  ;;  %v1209_v26 = vpop.f32.mrb[25].mxu0  ;;  %v3954_v27 = vpop.f32.mrb[21].mxu1 }
 0x2a1   :  { %v1210_v29 = vadd.f32 %v1209_v26, %v5509_v60  ;;  %v1211_v59 = vpop.f32.mrb[26].mxu0  ;;  %v1251_v28 = vpop.f32.mrb[22].mxu1  ;;  %4618 = vrcp.f32 %v1159_v21 }
 0x2a2   :  { %v1254_v30 = vadd.f32 %v1208_v5, %v7263_v19  ;;  %v1212_v13 = vpop.f32.mrb[27].mxu0  ;;  %v3955_v15 = vpop.f32.mrb[23].mxu1  ;;  %v1249_v5 = vadd.f32 %v1248_v25, %v5514_v0  ;;  %v7265_v28 = vld [vmem:[#allocation40_spill] sm:$0xff]  ;;  %v7267_v25 = vld [vmem:[#allocation53_spill] sm:$0xff] }
 0x2a3   :  { %v1255_v20 = vadd.f32 %v1210_v29, %v7264_v22 }
 0x2a4   :  { %v3575_v8 = vmul.f32 -1.442695, %v1254_v30 }
 0x2a5   :  { %v3576_v24 = vmul.f32 -1.442695, %v1255_v20 }
 0x2a6   :  { %4620 = vpow2.f32 %v3575_v8 }
 0x2a7   :  { %4622 = vpow2.f32 %v3576_v24  ;;  %v5760_v24 = vld [vmem:[%s7052_s3] ss:$12 sps:$4 sm:$0xff]  }
 0x2aa   :  { %v4617_v7 = vpop.eup %4616 }
 0x2ab   :  { %v1167_v9 = vsub.f32 0.0, %v4617_v7  ;;  %v4619_v12 = vpop.eup %4618 }
 0x2ad   :  { %v1168_v11 = vmul.f32 %v4619_v12, %v1167_v9  ;;  %v7268_v9 = vld [vmem:[#allocation54_spill] sm:$0xff] }
 0x2af   :  { %v5702_v50 = vadd.f32 %v4617_v7, %v1168_v11  ;;  %v5753_v11 = vld [vmem:[%s7052_s3 + $0x4] ss:$12 sps:$4 sm:$0xff]  }
 0x2b0   :  { %v4621_v27 = vpop.eup %4620 }
 0x2b1   :  { %v1262_v26 = vadd.f32 1.0, %v4621_v27  ;;  %v4623_v21 = vpop.eup %4622  ;;  %v1356_v12 = vpack.c.bf16 %v5702_v50, %v5702_v50  ;;  %v5766_v27 = vld [vmem:[%s7052_s3 + $0x8] ss:$12 sps:$4 sm:$0xff]  }
 0x2b2   :  { %v1263_v19 = vadd.f32 1.0, %v4623_v21  ;;  %v5782_v21 = vld [vmem:[%s7052_s3 + $0x18] ss:$12 sps:$4 sm:$0xff]  }
 0x2b3   :  { %4624 = vrcp.f32 %v1262_v26  ;;  %v5772_v26 = vld [vmem:[%s7052_s3 + $0x1c] ss:$12 sps:$4 sm:$0xff]  }
 0x2bd   :  { %v4625_v59 = vpop.eup %4624 }
 0x2be   :  { %v1268_v15 = vmul.f32 %v4625_v59, %v1249_v5  ;;  %v5788_v5 = vld [vmem:[%s7052_s3 + $0x20] ss:$12 sps:$4 sm:$0xff]  }
 0x2bf   :  { %v5794_v59 = vld [vmem:[%s7052_s3 + $0x34] ss:$12 sps:$4 sm:$0xff]  }
 0x2c0   :  { %v1269_v29 = vadd.f32 %v1268_v15, %v7265_v28  ;;  %v5801_v15 = vld [vmem:[%s7052_s3 + $0x30] ss:$12 sps:$4 sm:$0xff]   ;;  %v5807_v28 = vld [vmem:[%s7052_s3 + $0x38] ss:$12 sps:$4 sm:$0xff]  }
 0x2c2   :  { %4626 = vtanh.f32 %v1269_v29  ;;  %v5813_v29 = vld [vmem:[%s7052_s3 + $0x4c] ss:$12 sps:$4 sm:$0xff]  }
 0x2c3   :  { %4628 = vrcp.f32 %v1263_v19  ;;  %v5820_v19 = vld [vmem:[%s7052_s3 + $0x48] ss:$12 sps:$4 sm:$0xff]  }
 0x2cc   :  { %v4627_v30 = vpop.eup %4626 }
 0x2cd   :  { %v1271_v13 = vsub.f32 %v5517_v63, %v4627_v30  ;;  %v4629_v22 = vpop.eup %4628  ;;  %v7266_v63 = vld [vmem:[#allocation52_spill] sm:$0xff] }
 0x2cf   :  { %v1272_v20 = vmul.f32 %v4629_v22, %v1271_v13  ;;  %v5832_v13 = vld [vmem:[%s7052_s3 + $0x64] ss:$12 sps:$4 sm:$0xff]   ;;  %v5839_v22 = vld [vmem:[%s7052_s3 + $0x60] ss:$12 sps:$4 sm:$0xff]  }
 0x2d0   :  { %7269 = vst [vmem:[#allocation30_spill] sm:$0xff] %v5839_v22 }
 0x2d1   :  { %v5707_v8 = vadd.f32 %v4627_v30, %v1272_v20  ;;  %v5826_v30 = vld [vmem:[%s7052_s3 + $0x50] ss:$12 sps:$4 sm:$0xff]   ;;  %v5845_v20 = vld [vmem:[%s7052_s3 + $0x68] ss:$12 sps:$4 sm:$0xff]  }
 0x2d2   :  { %7270 = vst [vmem:[#allocation31_spill] sm:$0xff] %v5845_v20 }
 0x2d3   :  { %v5711_v7 = vpack.c.bf16 %v5707_v8, %v5707_v8 }
 0x2d5   :  { %1308 = vmatmul.mubr.bf16.vlgmr.msra.gmra.mrb[28].mxu0 %v5711_v7  ;;  %3973 = vmatmul.mubr.bf16.vlgmr.msra.gmra.mrb[24].mxu1 %v5711_v7 }
 0x2d6   :  { %1358 = vmatpush1.bf16.msra.mxu0 %v5519_v46  ;;  %3977 = vmatpush3.bf16.msra.mxu1 %v5521_v61 }
 0x2d7   :  { %1359 = vmatprep.subr.bf16.mxu0 %v5527_v53  ;;  %3978 = vmatprep.subr.bf16.mxu1 %v7240_v54 }
 0x2d8   :  { %1389 = vmatprep.mubr.bf16.mxu0 %v7241_v1  ;;  %3992 = vmatprep.mubr.msk.bf16.mxu1 %vm5035_vm1, %v7240_v54 }
 0x2da   :  { %1360 = vmatpush1.bf16.msra.mxu0 %v5533_v17  ;;  %3979 = vmatpush3.bf16.msra.mxu1 %v5535_v62 }
 0x2db   :  { %1361 = vmatprep.subr.bf16.mxu0 %v5539_v23  ;;  %3980 = vmatprep.subr.bf16.mxu1 %v7240_v54 }
 0x2de   :  { %1362 = vmatpush1.bf16.msra.mxu0 %v5546_v58  ;;  %3981 = vmatpush3.bf16.msra.mxu1 %v5548_v56 }
 0x2df   :  { %1363 = vmatprep.subr.bf16.mxu0 %v5552_v10  ;;  %3982 = vmatprep.subr.bf16.mxu1 %v7240_v54 }
 0x2e2   :  { %1364 = vmatpush1.bf16.msra.mxu0 %v5556_v55  ;;  %3983 = vmatpush3.bf16.msra.mxu1 %v5558_v2 }
 0x2e3   :  { %1365 = vmatprep.subr.bf16.mxu0 %v5562_v57  ;;  %3984 = vmatprep.subr.bf16.mxu1 %v7240_v54 }
 0x2e6   :  { %1366 = vmatpush1.bf16.msra.mxu0 %v7266_v63  ;;  %3985 = vmatpush3.bf16.msra.mxu1 %v7267_v25 }
 0x2e7   :  { %1367 = vmatprep.subr.bf16.mxu0 %v7268_v9  ;;  %3986 = vmatprep.subr.bf16.mxu1 %v7240_v54 }
 0x2ea   :  { %1368 = vmatpush1.bf16.msra.mxu0 %v5576_v4  ;;  %3987 = vmatpush3.bf16.msra.mxu1 %v5578_v49 }
 0x2eb   :  { %1369 = vmatprep.subr.bf16.mxu0 %v5582_v48  ;;  %3988 = vmatprep.subr.bf16.mxu1 %v7240_v54 }
 0x2ee   :  { %1370 = vmatpush1.bf16.msra.mxu0 %v5586_v51  ;;  %3989 = vmatpush3.bf16.msra.mxu1 %v5588_v47 }
 0x2ef   :  { %1371 = vmatprep.subr.bf16.mxu0 %v5592_v18  ;;  %3990 = vmatprep.subr.bf16.mxu1 %v7240_v54 }
 0x2f2   :  { %1372 = vmatpush1.bf16.msra.mxu0 %v5596_v3  ;;  %3991 = vmatpush3.bf16.msra.mxu1 %v5598_v52 }
 0x2f3   :  { %1461 = vmatprep.subr.bf16.mxu0 %v5753_v11  ;;  %3996 = vmatprep.subr.bf16.mxu1 %v7240_v54 }
 0x2f5   :  { %1390 = vmatmul.mubr.bf16.vlgmr.msra.gmra.mrb[28].mxu0 %v1356_v12  ;;  %3993 = vmatmul.mubr.bf16.vlgmr.msra.gmra.mrb[28].mxu1 %v1356_v12  ;;  %v5851_v12 = vld [vmem:[%s7052_s3 + $0x7c] ss:$12 sps:$4 sm:$0xff]  }
 0x2f6   :  { %1462 = vmatpush1.bf16.msra.mxu0 %v5760_v24  ;;  %3997 = vmatpush3.bf16.msra.mxu1 %v5766_v27  ;;  %7271 = vst [vmem:[#allocation40_spill] sm:$0xff] %v5851_v12 }
 0x2f7   :  { %1463 = vmatprep.subr.bf16.mxu0 %v5772_v26  ;;  %3998 = vmatprep.subr.bf16.mxu1 %v7240_v54 }
 0x2f8   :  { %1493 = vmatprep.mubr.bf16.mxu0 %v7241_v1  ;;  %4012 = vmatprep.mubr.msk.bf16.mxu1 %vm5035_vm1, %v7240_v54 }
 0x2fa   :  { %1464 = vmatpush1.bf16.msra.mxu0 %v5782_v21  ;;  %3999 = vmatpush3.bf16.msra.mxu1 %v5788_v5 }
 0x2fb   :  { %1465 = vmatprep.subr.bf16.mxu0 %v5794_v59  ;;  %4000 = vmatprep.subr.bf16.mxu1 %v7240_v54 }
 0x2fe   :  { %1466 = vmatpush1.bf16.msra.mxu0 %v5801_v15  ;;  %4001 = vmatpush3.bf16.msra.mxu1 %v5807_v28 }
 0x2ff   :  { %1467 = vmatprep.subr.bf16.mxu0 %v5813_v29  ;;  %4002 = vmatprep.subr.bf16.mxu1 %v7240_v54 }
 0x302   :  { %1468 = vmatpush1.bf16.msra.mxu0 %v5820_v19  ;;  %4003 = vmatpush3.bf16.msra.mxu1 %v5826_v30 }
 0x303   :  { %1469 = vmatprep.subr.bf16.mxu0 %v5832_v13  ;;  %4004 = vmatprep.subr.bf16.mxu1 %v7240_v54 }
 0x306   :  { %1470 = vmatpush1.bf16.msra.mxu0 %v5839_v22  ;;  %4005 = vmatpush3.bf16.msra.mxu1 %v5845_v20  ;;  %v5858_v22 = vld [vmem:[%s7052_s3 + $0x78] ss:$12 sps:$4 sm:$0xff]   ;;  %v5865_v20 = vld [vmem:[%s7052_s3 + $0x94] ss:$12 sps:$4 sm:$0xff]  }
 0x307   :  { %1471 = vmatprep.subr.bf16.mxu0 %v5851_v12  ;;  %4006 = vmatprep.subr.bf16.mxu1 %v7240_v54  ;;  %7272 = vst [vmem:[#allocation52_spill] sm:$0xff] %v5858_v22  ;;  %7273 = vst [vmem:[#allocation53_spill] sm:$0xff] %v5865_v20  ;;  %v5872_v12 = vld [vmem:[%s7052_s3 + $0x90] ss:$12 sps:$4 sm:$0xff]  }
 0x308   :  { %7274 = vst [vmem:[#allocation54_spill] sm:$0xff] %v5872_v12 }
 0x30a   :  { %1472 = vmatpush1.bf16.msra.mxu0 %v5858_v22  ;;  %4007 = vmatpush3.bf16.msra.mxu1 %v5343_v31  ;;  %v5879_v31 = vld [vmem:[%s7052_s3 + $0xac] ss:$12 sps:$4 sm:$0xff]  }
 0x30b   :  { %1473 = vmatprep.subr.bf16.mxu0 %v5865_v20  ;;  %4008 = vmatprep.subr.bf16.mxu1 %v7240_v54  ;;  %7275 = vst [vmem:[#allocation56_spill] sm:$0xff] %v5879_v31  ;;  %v5886_v20 = vld [vmem:[%s7052_s3 + $0xa8] ss:$12 sps:$4 sm:$0xff]  }
 0x30c   :  { %7276 = vst [vmem:[#allocation57_spill] sm:$0xff] %v5886_v20 }
 0x30e   :  { %1474 = vmatpush1.bf16.msra.mxu0 %v5872_v12  ;;  %4009 = vmatpush3.bf16.msra.mxu1 %v5351_v32  ;;  %v7277_v32 = vld [vmem:[#allocation15_spill] sm:$0xff] }
 0x30f   :  { %1475 = vmatprep.subr.bf16.mxu0 %v5879_v31  ;;  %4010 = vmatprep.subr.bf16.mxu1 %v7240_v54 }
 0x312   :  { %1476 = vmatpush1.bf16.msra.mxu0 %v5886_v20  ;;  %4011 = vmatpush3.bf16.msra.mxu1 %v5359_v33  ;;  %v7278_v33 = vld [vmem:[#allocation16_spill] sm:$0xff] }
 0x313   :  { %1563 = vmatprep.subr.bf16.mxu0 %v5368_v34  ;;  %4016 = vmatprep.subr.bf16.mxu1 %v7240_v54  ;;  %v7279_v34 = vld [vmem:[#allocation17_spill] sm:$0xff] }
 0x315   :  { %1494 = vmatmul.mubr.bf16.vlgmr.msra.gmra.mrb[32].mxu0 %v5711_v7  ;;  %4013 = vmatmul.mubr.bf16.vlgmr.msra.gmra.mrb[32].mxu1 %v5711_v7 }
 0x316   :  { %1564 = vmatpush1.bf16.msra.mxu0 %v5370_v35  ;;  %4017 = vmatpush3.bf16.msra.mxu1 %v5372_v36  ;;  %v7280_v35 = vld [vmem:[#allocation18_spill] sm:$0xff]  ;;  %v7281_v36 = vld [vmem:[#allocation19_spill] sm:$0xff] }
 0x317   :  { %1565 = vmatprep.subr.bf16.mxu0 %v5375_v37  ;;  %4018 = vmatprep.subr.bf16.mxu1 %v7240_v54  ;;  %v7282_v37 = vld [vmem:[#allocation20_spill] sm:$0xff] }
 0x318   :  { %1595 = vmatprep.mubr.bf16.mxu0 %v7241_v1  ;;  %4032 = vmatprep.mubr.msk.bf16.mxu1 %vm5035_vm1, %v7240_v54 }
 0x31a   :  { %1566 = vmatpush1.bf16.msra.mxu0 %v5381_v38  ;;  %4019 = vmatpush3.bf16.msra.mxu1 %v5383_v39  ;;  %v7283_v38 = vld [vmem:[#allocation21_spill] sm:$0xff]  ;;  %v7284_v39 = vld [vmem:[#allocation22_spill] sm:$0xff] }
 0x31b   :  { %1567 = vmatprep.subr.bf16.mxu0 %v5387_v40  ;;  %4020 = vmatprep.subr.bf16.mxu1 %v7240_v54  ;;  %v7285_v40 = vld [vmem:[#allocation23_spill] sm:$0xff] }
 0x31e   :  { %1568 = vmatpush1.bf16.msra.mxu0 %v5390_v41  ;;  %4021 = vmatpush3.bf16.msra.mxu1 %v5392_v42  ;;  %v7286_v41 = vld [vmem:[#allocation24_spill] sm:$0xff]  ;;  %v7287_v42 = vld [vmem:[#allocation25_spill] sm:$0xff] }
 0x31f   :  { %1569 = vmatprep.subr.bf16.mxu0 %v5397_v43  ;;  %4022 = vmatprep.subr.bf16.mxu1 %v7240_v54  ;;  %v7288_v43 = vld [vmem:[#allocation26_spill] sm:$0xff] }
 0x322   :  { %1570 = vmatpush1.bf16.msra.mxu0 %v5400_v44  ;;  %4023 = vmatpush3.bf16.msra.mxu1 %v5402_v45  ;;  %v7289_v44 = vld [vmem:[#allocation27_spill] sm:$0xff] }
 0x323   :  { %1571 = vmatprep.subr.bf16.mxu0 %v7277_v32  ;;  %4024 = vmatprep.subr.bf16.mxu1 %v7240_v54 }
 0x326   :  { %1572 = vmatpush1.bf16.msra.mxu0 %v7278_v33  ;;  %4025 = vmatpush3.bf16.msra.mxu1 %v7279_v34 }
 0x327   :  { %1573 = vmatprep.subr.bf16.mxu0 %v7280_v35  ;;  %4026 = vmatprep.subr.bf16.mxu1 %v7240_v54 }
 0x32a   :  { %1574 = vmatpush1.bf16.msra.mxu0 %v7281_v36  ;;  %4027 = vmatpush3.bf16.msra.mxu1 %v7282_v37 }
 0x32b   :  { %1575 = vmatprep.subr.bf16.mxu0 %v7283_v38  ;;  %4028 = vmatprep.subr.bf16.mxu1 %v7240_v54 }
 0x32e   :  { %1576 = vmatpush1.bf16.msra.mxu0 %v7284_v39  ;;  %4029 = vmatpush3.bf16.msra.mxu1 %v7285_v40 }
 0x32f   :  { %1577 = vmatprep.subr.bf16.mxu0 %v7286_v41  ;;  %4030 = vmatprep.subr.bf16.mxu1 %v7240_v54 }
 0x332   :  { %1578 = vmatpush1.bf16.msra.mxu0 %v7287_v42  ;;  %4031 = vmatpush3.bf16.msra.mxu1 %v7288_v43 }
 0x333   :  { %1645 = vmatprep.subr.bf16.mxu0 %v7289_v44  ;;  %4036 = vmatprep.subr.bf16.mxu1 %v7240_v54 }
 0x3a8   :  { %v1350_v45 = vpop.f32.mrb[24].mxu1 }
 0x3a9   :  { %v3974_v7 = vpop.f32.mrb[25].mxu1 }
 0x3aa   :  { %v1353_v32 = vpop.f32.mrb[26].mxu1 }
 0x3ab   :  { %v3975_v33 = vpop.f32.mrb[27].mxu1  ;;  %v7290_v32 = vld [vmem:[#allocation55_spill] sm:$0xff] }
 0x3c8   :  { %v1391_v34 = vpop.f32.mrb[28].mxu0  ;;  %v1432_v35 = vpop.f32.mrb[28].mxu1 }
 0x3c9   :  { %v4409_v36 = vadd.f32 %v5682_v16, %v1391_v34  ;;  %v1393_v37 = vpop.f32.mrb[29].mxu0  ;;  %v3994_v38 = vpop.f32.mrb[29].mxu1  ;;  %v1433_v33 = vadd.f32 %v1432_v35, %v7290_v32  ;;  %v1351_v34 = vadd.f32 %v1350_v45, %v5694_v14  ;;  %v7293_v45 = vld [vmem:[#allocation33_spill] sm:$0xff] }
 0x3ca   :  { %v1395_v39 = vpop.f32.mrb[30].mxu0  ;;  %v1435_v40 = vpop.f32.mrb[30].mxu1  ;;  %v4411_v43 = vadd.f32 %v5687_v6, %v1393_v37  ;;  %v7292_v6 = vld [vmem:[#allocation32_spill] sm:$0xff] }
 0x3cb   :  { %v3577_v41 = vmul.f32 -1.442695, %v4409_v36  ;;  %v1396_v42 = vpop.f32.mrb[31].mxu0  ;;  %v3995_v20 = vpop.f32.mrb[31].mxu1 }
 0x3cc   :  { %v3578_v44 = vmul.f32 -1.442695, %v4411_v43  ;;  %v7291_v20 = vld [vmem:[#allocation51_spill] sm:$0xff] }
 0x3cd   :  { %4630 = vpow2.f32 %v3577_v41 }
 0x3ce   :  { %4632 = vpow2.f32 %v3578_v44 }
 0x3d7   :  { %v4631_v31 = vpop.eup %4630 }
 0x3d8   :  { %v1446_v12 = vadd.f32 1.0, %v4631_v31  ;;  %v4633_v7 = vpop.eup %4632 }
 0x3d9   :  { %v1447_v40 = vadd.f32 1.0, %v4633_v7 }
 0x3da   :  { %4634 = vrcp.f32 %v1446_v12 }
 0x3e4   :  { %v4635_v22 = vpop.eup %4634 }
 0x3e5   :  { %v1452_v38 = vmul.f32 %v4635_v22, %v1433_v33 }
 0x3e7   :  { %v1453_v39 = vadd.f32 %v1452_v38, %v1351_v34 }
 0x3e8   :  { %v1495_v36 = vpop.f32.mrb[32].mxu0  ;;  %v1536_v42 = vpop.f32.mrb[32].mxu1 }
 0x3e9   :  { %4636 = vtanh.f32 %v1453_v39  ;;  %v1496_v41 = vadd.f32 %v1495_v36, %v7291_v20  ;;  %v1497_v37 = vpop.f32.mrb[33].mxu0  ;;  %v4014_v43 = vpop.f32.mrb[33].mxu1 }
 0x3ea   :  { %v1498_v31 = vadd.f32 %v1497_v37, %v5509_v60  ;;  %v1499_v44 = vpop.f32.mrb[34].mxu0  ;;  %v1539_v12 = vpop.f32.mrb[34].mxu1  ;;  %4638 = vrcp.f32 %v1447_v40 }
 0x3eb   :  { %v1542_v35 = vadd.f32 %v1496_v41, %v7292_v6  ;;  %v1500_v32 = vpop.f32.mrb[35].mxu0  ;;  %v4015_v16 = vpop.f32.mrb[35].mxu1  ;;  %v1537_v6 = vadd.f32 %v1536_v42, %v5514_v0  ;;  %v7294_v41 = vld [vmem:[#allocation36_spill] sm:$0xff] }
 0x3ec   :  { %v1543_v22 = vadd.f32 %v1498_v31, %v7293_v45  ;;  %v6081_v42 = vld [vmem:[#allocation6 + $0x64] ss:$12 sps:$4 sm:$0xff]  }
 0x3ed   :  { %v3579_v33 = vmul.f32 -1.442695, %v1542_v35  ;;  %7304 = vst [vmem:[#allocation16_spill] sm:$0xff] %v6081_v42 }
 0x3ee   :  { %v3580_v36 = vmul.f32 -1.442695, %v1543_v22 }
 0x3ef   :  { %4640 = vpow2.f32 %v3579_v33 }
 0x3f0   :  { %4642 = vpow2.f32 %v3580_v36  ;;  %v6095_v36 = vld [vmem:[#allocation6 + $0x78] ss:$12 sps:$4 sm:$0xff]  }
 0x3f1   :  { %7308 = vst [vmem:[#allocation20_spill] sm:$0xff] %v6095_v36 }
 0x3f3   :  { %v4637_v7 = vpop.eup %4636 }
 0x3f4   :  { %v1455_v34 = vsub.f32 %v5702_v50, %v4637_v7  ;;  %v4639_v38 = vpop.eup %4638 }
 0x3f6   :  { %v1456_v39 = vmul.f32 %v4639_v38, %v1455_v34  ;;  %v6085_v34 = vld [vmem:[#allocation6 + $0x60] ss:$12 sps:$4 sm:$0xff]   ;;  %v6088_v38 = vld [vmem:[#allocation6 + $0x68] ss:$12 sps:$4 sm:$0xff]  }
 0x3f7   :  { %7305 = vst [vmem:[#allocation17_spill] sm:$0xff] %v6085_v34  ;;  %7306 = vst [vmem:[#allocation18_spill] sm:$0xff] %v6088_v38 }
 0x3f8   :  { %v5938_v43 = vadd.f32 %v4637_v7, %v1456_v39  ;;  %v6091_v39 = vld [vmem:[#allocation6 + $0x7c] ss:$12 sps:$4 sm:$0xff]  }
 0x3f9   :  { %v4641_v37 = vpop.eup %4640  ;;  %7307 = vst [vmem:[#allocation19_spill] sm:$0xff] %v6091_v39 }
 0x3fa   :  { %v1550_v44 = vadd.f32 1.0, %v4641_v37  ;;  %v4643_v40 = vpop.eup %4642  ;;  %v6098_v37 = vld [vmem:[#allocation6 + $0x80] ss:$12 sps:$4 sm:$0xff]  }
 0x3fb   :  { %v1551_v12 = vadd.f32 1.0, %v4643_v40  ;;  %7309 = vst [vmem:[#allocation21_spill] sm:$0xff] %v6098_v37  ;;  %v6105_v40 = vld [vmem:[#allocation6 + $0x90] ss:$12 sps:$4 sm:$0xff]  }
 0x3fc   :  { %4644 = vrcp.f32 %v1550_v44  ;;  %v6101_v44 = vld [vmem:[#allocation6 + $0x94] ss:$12 sps:$4 sm:$0xff]   ;;  %7311 = vst [vmem:[#allocation23_spill] sm:$0xff] %v6105_v40 }
 0x3fd   :  { %7310 = vst [vmem:[#allocation22_spill] sm:$0xff] %v6101_v44 }
 0x406   :  { %v4645_v16 = vpop.eup %4644 }
 0x407   :  { %v1556_v32 = vmul.f32 %v4645_v16, %v1537_v6  ;;  %v6108_v6 = vld [vmem:[#allocation6 + $0x98] ss:$12 sps:$4 sm:$0xff]  }
 0x408   :  { %7312 = vst [vmem:[#allocation24_spill] sm:$0xff] %v6108_v6  ;;  %v6111_v16 = vld [vmem:[#allocation6 + $0xac] ss:$12 sps:$4 sm:$0xff]  }
 0x409   :  { %v1557_v31 = vadd.f32 %v1556_v32, %v7294_v41  ;;  %7313 = vst [vmem:[#allocation25_spill] sm:$0xff] %v6111_v16  ;;  %v6115_v32 = vld [vmem:[#allocation6 + $0xa8] ss:$12 sps:$4 sm:$0xff]   ;;  %v6118_v41 = vld [vmem:[#allocation6 + $0xb0] ss:$12 sps:$4 sm:$0xff]  }
 0x40a   :  { %7314 = vst [vmem:[#allocation26_spill] sm:$0xff] %v6115_v32  ;;  %7315 = vst [vmem:[#allocation27_spill] sm:$0xff] %v6118_v41 }
 0x40b   :  { %4646 = vtanh.f32 %v1557_v31  ;;  %v6121_v31 = vld [vmem:[#allocation9 + $0x4] ss:$12 sps:$4 sm:$0xff]  }
 0x40c   :  { %4648 = vrcp.f32 %v1551_v12  ;;  %7316 = vst [vmem:[#allocation51_spill] sm:$0xff] %v6121_v31 }
 0x415   :  { %v4647_v50 = vpop.eup %4646 }
 0x416   :  { %v1559_v35 = vsub.f32 %v5707_v8, %v4647_v50  ;;  %v4649_v45 = vpop.eup %4648  ;;  %v6068_v8 = vld [vmem:[#allocation6 + $0x38] ss:$12 sps:$4 sm:$0xff]  }
 0x418   :  { %v1560_v22 = vmul.f32 %v4649_v45, %v1559_v35 }
 0x41a   :  { %v5943_v33 = vadd.f32 %v4647_v50, %v1560_v22 }
 0x41c   :  { %v5947_v7 = vpack.c.bf16 %v5943_v33, %v5943_v33 }
 0x41e   :  { %1596 = vmatmul.mubr.bf16.vlgmr.msra.gmra.mrb[36].mxu0 %v5947_v7  ;;  %4033 = vmatmul.mubr.bf16.vlgmr.msra.gmra.mrb[36].mxu1 %v5947_v7 }
 0x41f   :  { %1646 = vmatpush1.bf16.msra.mxu0 %v5519_v46  ;;  %4037 = vmatpush3.bf16.msra.mxu1 %v5521_v61  ;;  %v1644_v46 = vpack.c.bf16 %v5938_v43, %v5938_v43  ;;  %v7295_v61 = vld [vmem:[#allocation30_spill] sm:$0xff] }
 0x420   :  { %1647 = vmatprep.subr.bf16.mxu0 %v5527_v53  ;;  %4038 = vmatprep.subr.bf16.mxu1 %v7240_v54  ;;  %v7296_v53 = vld [vmem:[#allocation31_spill] sm:$0xff] }
 0x421   :  { %1677 = vmatprep.mubr.bf16.mxu0 %v7241_v1  ;;  %4052 = vmatprep.mubr.msk.bf16.mxu1 %vm5035_vm1, %v7240_v54 }
 0x423   :  { %1648 = vmatpush1.bf16.msra.mxu0 %v5533_v17  ;;  %4039 = vmatpush3.bf16.msra.mxu1 %v5535_v62  ;;  %v7297_v17 = vld [vmem:[#allocation40_spill] sm:$0xff] }
 0x424   :  { %1649 = vmatprep.subr.bf16.mxu0 %v5539_v23  ;;  %4040 = vmatprep.subr.bf16.mxu1 %v7240_v54  ;;  %v7298_v62 = vld [vmem:[#allocation52_spill] sm:$0xff]  ;;  %v6015_v23 = vld [vmem:[%s7052_s3 + $0x80] ss:$12 sps:$4 sm:$0xff]  }
 0x427   :  { %1650 = vmatpush1.bf16.msra.mxu0 %v5546_v58  ;;  %4041 = vmatpush3.bf16.msra.mxu1 %v5548_v56  ;;  %v7299_v58 = vld [vmem:[#allocation53_spill] sm:$0xff]  ;;  %v7300_v56 = vld [vmem:[#allocation54_spill] sm:$0xff] }
 0x428   :  { %1651 = vmatprep.subr.bf16.mxu0 %v5552_v10  ;;  %4042 = vmatprep.subr.bf16.mxu1 %v7240_v54  ;;  %v6024_v10 = vld [vmem:[%s7052_s3 + $0x98] ss:$12 sps:$4 sm:$0xff]  }
 0x42b   :  { %1652 = vmatpush1.bf16.msra.mxu0 %v5556_v55  ;;  %4043 = vmatpush3.bf16.msra.mxu1 %v5558_v2  ;;  %v7301_v55 = vld [vmem:[#allocation56_spill] sm:$0xff]  ;;  %v7302_v2 = vld [vmem:[#allocation57_spill] sm:$0xff] }
 0x42c   :  { %1653 = vmatprep.subr.bf16.mxu0 %v5562_v57  ;;  %4044 = vmatprep.subr.bf16.mxu1 %v7240_v54  ;;  %v6033_v57 = vld [vmem:[%s7052_s3 + $0xb0] ss:$12 sps:$4 sm:$0xff]  }
 0x42f   :  { %1654 = vmatpush1.bf16.msra.mxu0 %v7266_v63  ;;  %4045 = vmatpush3.bf16.msra.mxu1 %v7267_v25  ;;  %v6071_v63 = vld [vmem:[#allocation6 + $0x4c] ss:$12 sps:$4 sm:$0xff]   ;;  %v6075_v25 = vld [vmem:[#allocation6 + $0x48] ss:$12 sps:$4 sm:$0xff]  }
 0x430   :  { %1655 = vmatprep.subr.bf16.mxu0 %v7268_v9  ;;  %4046 = vmatprep.subr.bf16.mxu1 %v7240_v54  ;;  %v6078_v9 = vld [vmem:[#allocation6 + $0x50] ss:$12 sps:$4 sm:$0xff]  }
 0x431   :  { %7303 = vst [vmem:[#allocation15_spill] sm:$0xff] %v6078_v9 }
 0x433   :  { %1656 = vmatpush1.bf16.msra.mxu0 %v5576_v4  ;;  %4047 = vmatpush3.bf16.msra.mxu1 %v5578_v49  ;;  %v6048_v4 = vld [vmem:[#allocation6 + $0x1c] ss:$12 sps:$4 sm:$0xff]   ;;  %v6055_v49 = vld [vmem:[#allocation6 + $0x18] ss:$12 sps:$4 sm:$0xff]  }
 0x434   :  { %1657 = vmatprep.subr.bf16.mxu0 %v5582_v48  ;;  %4048 = vmatprep.subr.bf16.mxu1 %v7240_v54  ;;  %v6058_v48 = vld [vmem:[#allocation6 + $0x20] ss:$12 sps:$4 sm:$0xff]  }
 0x437   :  { %1658 = vmatpush1.bf16.msra.mxu0 %v5586_v51  ;;  %4049 = vmatpush3.bf16.msra.mxu1 %v5588_v47  ;;  %v6061_v51 = vld [vmem:[#allocation6 + $0x34] ss:$12 sps:$4 sm:$0xff]   ;;  %v6065_v47 = vld [vmem:[#allocation6 + $0x30] ss:$12 sps:$4 sm:$0xff]  }
 0x438   :  { %1659 = vmatprep.subr.bf16.mxu0 %v5592_v18  ;;  %4050 = vmatprep.subr.bf16.mxu1 %v7240_v54  ;;  %v6042_v18 = vld [vmem:[#allocation6] ss:$12 sps:$4 sm:$0xff]  }
 0x43b   :  { %1660 = vmatpush1.bf16.msra.mxu0 %v5596_v3  ;;  %4051 = vmatpush3.bf16.msra.mxu1 %v5598_v52  ;;  %v6036_v52 = vld [vmem:[#allocation6 + $0x4] ss:$12 sps:$4 sm:$0xff]   ;;  %v6045_v3 = vld [vmem:[#allocation6 + $0x8] ss:$12 sps:$4 sm:$0xff]  }
 0x43c   :  { %1749 = vmatprep.subr.bf16.mxu0 %v5753_v11  ;;  %4056 = vmatprep.subr.bf16.mxu1 %v7240_v54 }
 0x43e   :  { %1678 = vmatmul.mubr.bf16.vlgmr.msra.gmra.mrb[36].mxu0 %v1644_v46  ;;  %4053 = vmatmul.mubr.bf16.vlgmr.msra.gmra.mrb[40].mxu1 %v1644_v46  ;;  %v7317_v46 = vld [vmem:[#allocation28_spill] sm:$0xff] }
 0x43f   :  { %1750 = vmatpush1.bf16.msra.mxu0 %v5760_v24  ;;  %4057 = vmatpush3.bf16.msra.mxu1 %v5766_v27 }
 0x440   :  { %1751 = vmatprep.subr.bf16.mxu0 %v5772_v26  ;;  %4058 = vmatprep.subr.bf16.mxu1 %v7240_v54 }
 0x441   :  { %1781 = vmatprep.mubr.bf16.mxu0 %v7241_v1  ;;  %4072 = vmatprep.mubr.msk.bf16.mxu1 %vm5035_vm1, %v7240_v54 }
 0x443   :  { %1752 = vmatpush1.bf16.msra.mxu0 %v5782_v21  ;;  %4059 = vmatpush3.bf16.msra.mxu1 %v5788_v5 }
 0x444   :  { %1753 = vmatprep.subr.bf16.mxu0 %v5794_v59  ;;  %4060 = vmatprep.subr.bf16.mxu1 %v7240_v54 }
 0x447   :  { %1754 = vmatpush1.bf16.msra.mxu0 %v5801_v15  ;;  %4061 = vmatpush3.bf16.msra.mxu1 %v5807_v28 }
 0x448   :  { %1755 = vmatprep.subr.bf16.mxu0 %v5813_v29  ;;  %4062 = vmatprep.subr.bf16.mxu1 %v7240_v54 }
 0x44b   :  { %1756 = vmatpush1.bf16.msra.mxu0 %v5820_v19  ;;  %4063 = vmatpush3.bf16.msra.mxu1 %v5826_v30 }
 0x44c   :  { %1757 = vmatprep.subr.bf16.mxu0 %v5832_v13  ;;  %4064 = vmatprep.subr.bf16.mxu1 %v7240_v54 }
 0x44f   :  { %1758 = vmatpush1.bf16.msra.mxu0 %v7295_v61  ;;  %4065 = vmatpush3.bf16.msra.mxu1 %v7296_v53 }
 0x450   :  { %1759 = vmatprep.subr.bf16.mxu0 %v7297_v17  ;;  %4066 = vmatprep.subr.bf16.mxu1 %v7240_v54 }
 0x453   :  { %1760 = vmatpush1.bf16.msra.mxu0 %v7298_v62  ;;  %4067 = vmatpush3.bf16.msra.mxu1 %v6015_v23 }
 0x454   :  { %1761 = vmatprep.subr.bf16.mxu0 %v7299_v58  ;;  %4068 = vmatprep.subr.bf16.mxu1 %v7240_v54 }
 0x457   :  { %1762 = vmatpush1.bf16.msra.mxu0 %v7300_v56  ;;  %4069 = vmatpush3.bf16.msra.mxu1 %v6024_v10 }
 0x458   :  { %1763 = vmatprep.subr.bf16.mxu0 %v7301_v55  ;;  %4070 = vmatprep.subr.bf16.mxu1 %v7240_v54 }
 0x45b   :  { %1764 = vmatpush1.bf16.msra.mxu0 %v7302_v2  ;;  %4071 = vmatpush3.bf16.msra.mxu1 %v6033_v57 }
 0x45c   :  { %1851 = vmatprep.subr.bf16.mxu0 %v6036_v52  ;;  %4076 = vmatprep.subr.bf16.mxu1 %v7240_v54 }
 0x45e   :  { %1782 = vmatmul.mubr.bf16.vlgmr.msra.gmra.mrb[40].mxu0 %v5947_v7  ;;  %4073 = vmatmul.mubr.bf16.vlgmr.msra.gmra.mrb[44].mxu1 %v5947_v7 }
 0x45f   :  { %1852 = vmatpush1.bf16.msra.mxu0 %v6042_v18  ;;  %4077 = vmatpush3.bf16.msra.mxu1 %v6045_v3 }
 0x460   :  { %1853 = vmatprep.subr.bf16.mxu0 %v6048_v4  ;;  %4078 = vmatprep.subr.bf16.mxu1 %v7240_v54 }
 0x461   :  { %1883 = vmatprep.mubr.bf16.mxu0 %v7241_v1  ;;  %4092 = vmatprep.mubr.msk.bf16.mxu1 %vm5035_vm1, %v7240_v54 }
 0x463   :  { %1854 = vmatpush1.bf16.msra.mxu0 %v6055_v49  ;;  %4079 = vmatpush3.bf16.msra.mxu1 %v6058_v48 }
 0x464   :  { %1855 = vmatprep.subr.bf16.mxu0 %v6061_v51  ;;  %4080 = vmatprep.subr.bf16.mxu1 %v7240_v54 }
 0x467   :  { %1856 = vmatpush1.bf16.msra.mxu0 %v6065_v47  ;;  %4081 = vmatpush3.bf16.msra.mxu1 %v6068_v8 }
 0x468   :  { %1857 = vmatprep.subr.bf16.mxu0 %v6071_v63  ;;  %4082 = vmatprep.subr.bf16.mxu1 %v7240_v54 }
 0x46b   :  { %1858 = vmatpush1.bf16.msra.mxu0 %v6075_v25  ;;  %4083 = vmatpush3.bf16.msra.mxu1 %v6078_v9 }
 0x46c   :  { %1859 = vmatprep.subr.bf16.mxu0 %v6081_v42  ;;  %4084 = vmatprep.subr.bf16.mxu1 %v7240_v54 }
 0x46f   :  { %1860 = vmatpush1.bf16.msra.mxu0 %v6085_v34  ;;  %4085 = vmatpush3.bf16.msra.mxu1 %v6088_v38 }
 0x470   :  { %1861 = vmatprep.subr.bf16.mxu0 %v6091_v39  ;;  %4086 = vmatprep.subr.bf16.mxu1 %v7240_v54  ;;  %v7318_v39 = vld [vmem:[#allocation29_spill] sm:$0xff] }
 0x473   :  { %1862 = vmatpush1.bf16.msra.mxu0 %v6095_v36  ;;  %4087 = vmatpush3.bf16.msra.mxu1 %v6098_v37 }
 0x474   :  { %1863 = vmatprep.subr.bf16.mxu0 %v6101_v44  ;;  %4088 = vmatprep.subr.bf16.mxu1 %v7240_v54 }
 0x477   :  { %1864 = vmatpush1.bf16.msra.mxu0 %v6105_v40  ;;  %4089 = vmatpush3.bf16.msra.mxu1 %v6108_v6 }
 0x478   :  { %1865 = vmatprep.subr.bf16.mxu0 %v6111_v16  ;;  %4090 = vmatprep.subr.bf16.mxu1 %v7240_v54 }
 0x47b   :  { %1866 = vmatpush1.bf16.msra.mxu0 %v6115_v32  ;;  %4091 = vmatpush3.bf16.msra.mxu1 %v6118_v41 }
 0x47c   :  { %1933 = vmatprep.subr.bf16.mxu0 %v6121_v31  ;;  %4096 = vmatprep.subr.bf16.mxu1 %v7240_v54 }
 0x4f1   :  { %v1638_v12 = vpop.f32.mrb[36].mxu1 }
 0x4f2   :  { %v4034_v50 = vpop.f32.mrb[37].mxu1 }
 0x4f3   :  { %v1641_v35 = vpop.f32.mrb[38].mxu1 }
 0x4f4   :  { %v4035_v45 = vpop.f32.mrb[39].mxu1  ;;  %v7319_v35 = vld [vmem:[#allocation55_spill] sm:$0xff] }
 0x511   :  { %v1679_v22 = vpop.f32.mrb[36].mxu0  ;;  %v1720_v7 = vpop.f32.mrb[40].mxu1 }
 0x512   :  { %v4413_v16 = vadd.f32 %v7317_v46, %v1679_v22  ;;  %v1681_v6 = vpop.f32.mrb[37].mxu0  ;;  %v4054_v32 = vpop.f32.mrb[41].mxu1  ;;  %v1721_v45 = vadd.f32 %v1720_v7, %v7319_v35  ;;  %v1639_v22 = vadd.f32 %v1638_v12, %v5694_v14  ;;  %v7321_v12 = vld [vmem:[#allocation35_spill] sm:$0xff] }
 0x513   :  { %v1683_v40 = vpop.f32.mrb[38].mxu0  ;;  %v1723_v44 = vpop.f32.mrb[42].mxu1  ;;  %v4415_v31 = vadd.f32 %v7318_v39, %v1681_v6 }
 0x514   :  { %v3581_v37 = vmul.f32 -1.442695, %v4413_v16  ;;  %v1684_v41 = vpop.f32.mrb[39].mxu0  ;;  %v4055_v36 = vpop.f32.mrb[43].mxu1 }
 0x515   :  { %v3582_v38 = vmul.f32 -1.442695, %v4415_v31  ;;  %v7320_v31 = vld [vmem:[#allocation34_spill] sm:$0xff] }
 0x516   :  { %4650 = vpow2.f32 %v3581_v37 }
 0x517   :  { %4652 = vpow2.f32 %v3582_v38 }
 0x520   :  { %v4651_v34 = vpop.eup %4650 }
 0x521   :  { %v1734_v42 = vadd.f32 1.0, %v4651_v34  ;;  %v4653_v50 = vpop.eup %4652 }
 0x522   :  { %v1735_v44 = vadd.f32 1.0, %v4653_v50 }
 0x523   :  { %4654 = vrcp.f32 %v1734_v42 }
 0x52d   :  { %v4655_v9 = vpop.eup %4654 }
 0x52e   :  { %v1740_v32 = vmul.f32 %v4655_v9, %v1721_v45 }
 0x530   :  { %v1741_v40 = vadd.f32 %v1740_v32, %v1639_v22 }
 0x531   :  { %v1783_v16 = vpop.f32.mrb[40].mxu0  ;;  %v1824_v41 = vpop.f32.mrb[44].mxu1 }
 0x532   :  { %4656 = vtanh.f32 %v1741_v40  ;;  %v1784_v36 = vadd.f32 %v1783_v16, %v7291_v20  ;;  %v1785_v37 = vpop.f32.mrb[41].mxu0  ;;  %v4074_v6 = vpop.f32.mrb[45].mxu1 }
 0x533   :  { %v1786_v34 = vadd.f32 %v1785_v37, %v5509_v60  ;;  %v1787_v38 = vpop.f32.mrb[42].mxu0  ;;  %v1827_v42 = vpop.f32.mrb[46].mxu1  ;;  %4658 = vrcp.f32 %v1735_v44 }
 0x534   :  { %v1830_v7 = vadd.f32 %v1784_v36, %v7320_v31  ;;  %v1788_v35 = vpop.f32.mrb[43].mxu0  ;;  %v4075_v39 = vpop.f32.mrb[47].mxu1 }
 0x535   :  { %v1831_v9 = vadd.f32 %v1786_v34, %v7321_v12  ;;  %v1825_v35 = vadd.f32 %v1824_v41, %v5514_v0  ;;  %v7322_v34 = vld [vmem:[#allocation38_spill] sm:$0xff] }
 0x536   :  { %v3583_v45 = vmul.f32 -1.442695, %v1830_v7  ;;  %v6147_v41 = vld [vmem:[#allocation9] ss:$12 sps:$4 sm:$0xff]  }
 0x537   :  { %v3584_v16 = vmul.f32 -1.442695, %v1831_v9 }
 0x538   :  { %4660 = vpow2.f32 %v3583_v45 }
 0x539   :  { %4662 = vpow2.f32 %v3584_v16  ;;  %v6166_v16 = vld [vmem:[#allocation9 + $0x34] ss:$12 sps:$4 sm:$0xff]  }
 0x53c   :  { %v4657_v50 = vpop.eup %4656 }
 0x53d   :  { %v1743_v22 = vsub.f32 %v5938_v43, %v4657_v50  ;;  %v4659_v32 = vpop.eup %4658 }
 0x53f   :  { %v1744_v40 = vmul.f32 %v4659_v32, %v1743_v22  ;;  %v6150_v22 = vld [vmem:[#allocation9 + $0x8] ss:$12 sps:$4 sm:$0xff]   ;;  %v6160_v32 = vld [vmem:[#allocation9 + $0x18] ss:$12 sps:$4 sm:$0xff]  }
 0x541   :  { %v6134_v6 = vadd.f32 %v4657_v50, %v1744_v40  ;;  %v6163_v40 = vld [vmem:[#allocation9 + $0x20] ss:$12 sps:$4 sm:$0xff]  }
 0x542   :  { %v4661_v37 = vpop.eup %4660 }
 0x543   :  { %v1838_v38 = vadd.f32 1.0, %v4661_v37  ;;  %v4663_v44 = vpop.eup %4662  ;;  %v6170_v37 = vld [vmem:[#allocation9 + $0x30] ss:$12 sps:$4 sm:$0xff]  }
 0x544   :  { %v1839_v31 = vadd.f32 1.0, %v4663_v44  ;;  %v6176_v44 = vld [vmem:[#allocation9 + $0x4c] ss:$12 sps:$4 sm:$0xff]  }
 0x545   :  { %4664 = vrcp.f32 %v1838_v38  ;;  %v6173_v38 = vld [vmem:[#allocation9 + $0x38] ss:$12 sps:$4 sm:$0xff]  }
 0x54f   :  { %v4665_v39 = vpop.eup %4664 }
 0x550   :  { %v1844_v36 = vmul.f32 %v4665_v39, %v1825_v35  ;;  %v6180_v35 = vld [vmem:[#allocation9 + $0x48] ss:$12 sps:$4 sm:$0xff]   ;;  %v6183_v39 = vld [vmem:[#allocation9 + $0x50] ss:$12 sps:$4 sm:$0xff]  }
 0x552   :  { %v1845_v42 = vadd.f32 %v1844_v36, %v7322_v34  ;;  %v6186_v36 = vld [vmem:[#allocation9 + $0x64] ss:$12 sps:$4 sm:$0xff]   ;;  %v6190_v34 = vld [vmem:[#allocation9 + $0x60] ss:$12 sps:$4 sm:$0xff]  }
 0x554   :  { %4666 = vtanh.f32 %v1845_v42  ;;  %v6193_v42 = vld [vmem:[#allocation9 + $0x68] ss:$12 sps:$4 sm:$0xff]  }
 0x555   :  { %4668 = vrcp.f32 %v1839_v31  ;;  %7323 = vst [vmem:[#allocation32_spill] sm:$0xff] %v6193_v42  ;;  %v6196_v31 = vld [vmem:[#allocation9 + $0x7c] ss:$12 sps:$4 sm:$0xff]  }
 0x556   :  { %7324 = vst [vmem:[#allocation33_spill] sm:$0xff] %v6196_v31 }
 0x55e   :  { %v4667_v43 = vpop.eup %4666 }
 0x55f   :  { %v1847_v7 = vsub.f32 %v5943_v33, %v4667_v43  ;;  %v4669_v12 = vpop.eup %4668  ;;  %v6153_v33 = vld [vmem:[#allocation9 + $0x1c] ss:$12 sps:$4 sm:$0xff]  }
 0x561   :  { %v1848_v9 = vmul.f32 %v4669_v12, %v1847_v7  ;;  %v6203_v7 = vld [vmem:[#allocation9 + $0x80] ss:$12 sps:$4 sm:$0xff]  }
 0x562   :  { %7325 = vst [vmem:[#allocation36_spill] sm:$0xff] %v6203_v7  ;;  %v6206_v12 = vld [vmem:[#allocation9 + $0x94] ss:$12 sps:$4 sm:$0xff]  }
 0x563   :  { %v6139_v45 = vadd.f32 %v4667_v43, %v1848_v9  ;;  %v6200_v43 = vld [vmem:[#allocation9 + $0x78] ss:$12 sps:$4 sm:$0xff]   ;;  %7326 = vst [vmem:[#allocation30_spill] sm:$0xff] %v6206_v12  ;;  %v6210_v9 = vld [vmem:[#allocation9 + $0x90] ss:$12 sps:$4 sm:$0xff]  }
 0x564   :  { %7327 = vst [vmem:[#allocation31_spill] sm:$0xff] %v6210_v9 }
 0x565   :  { %v6143_v50 = vpack.c.bf16 %v6139_v45, %v6139_v45 }
 0x567   :  { %1884 = vmatmul.mubr.bf16.vlgmr.msra.gmra.mrb[44].mxu0 %v6143_v50  ;;  %4093 = vmatmul.mubr.bf16.vlgmr.msra.gmra.mrb[48].mxu1 %v6143_v50 }
 0x568   :  { %1934 = vmatpush1.bf16.msra.mxu0 %v6147_v41  ;;  %4097 = vmatpush3.bf16.msra.mxu1 %v6150_v22 }
 0x569   :  { %1935 = vmatprep.subr.bf16.mxu0 %v6153_v33  ;;  %4098 = vmatprep.subr.bf16.mxu1 %v7240_v54 }
 0x56a   :  { %1965 = vmatprep.mubr.bf16.mxu0 %v7241_v1  ;;  %4112 = vmatprep.mubr.msk.bf16.mxu1 %vm5035_vm1, %v7240_v54 }
 0x56c   :  { %1936 = vmatpush1.bf16.msra.mxu0 %v6160_v32  ;;  %4099 = vmatpush3.bf16.msra.mxu1 %v6163_v40 }
 0x56d   :  { %1937 = vmatprep.subr.bf16.mxu0 %v6166_v16  ;;  %4100 = vmatprep.subr.bf16.mxu1 %v7240_v54 }
 0x570   :  { %1938 = vmatpush1.bf16.msra.mxu0 %v6170_v37  ;;  %4101 = vmatpush3.bf16.msra.mxu1 %v6173_v38 }
 0x571   :  { %1939 = vmatprep.subr.bf16.mxu0 %v6176_v44  ;;  %4102 = vmatprep.subr.bf16.mxu1 %v7240_v54 }
 0x574   :  { %1940 = vmatpush1.bf16.msra.mxu0 %v6180_v35  ;;  %4103 = vmatpush3.bf16.msra.mxu1 %v6183_v39 }
 0x575   :  { %1941 = vmatprep.subr.bf16.mxu0 %v6186_v36  ;;  %4104 = vmatprep.subr.bf16.mxu1 %v7240_v54 }
 0x578   :  { %1942 = vmatpush1.bf16.msra.mxu0 %v6190_v34  ;;  %4105 = vmatpush3.bf16.msra.mxu1 %v6193_v42  ;;  %v6216_v42 = vld [vmem:[#allocation9 + $0xac] ss:$12 sps:$4 sm:$0xff]  }
 0x579   :  { %1943 = vmatprep.subr.bf16.mxu0 %v6196_v31  ;;  %4106 = vmatprep.subr.bf16.mxu1 %v7240_v54  ;;  %v6213_v31 = vld [vmem:[#allocation9 + $0x98] ss:$12 sps:$4 sm:$0xff]  }
 0x57c   :  { %1944 = vmatpush1.bf16.msra.mxu0 %v6200_v43  ;;  %4107 = vmatpush3.bf16.msra.mxu1 %v6203_v7  ;;  %v6220_v7 = vld [vmem:[#allocation9 + $0xa8] ss:$12 sps:$4 sm:$0xff]  }
 0x57d   :  { %1945 = vmatprep.subr.bf16.mxu0 %v6206_v12  ;;  %4108 = vmatprep.subr.bf16.mxu1 %v7240_v54  ;;  %v6223_v12 = vld [vmem:[#allocation9 + $0xb0] ss:$12 sps:$4 sm:$0xff]  }
 0x580   :  { %1946 = vmatpush1.bf16.msra.mxu0 %v6210_v9  ;;  %4109 = vmatpush3.bf16.msra.mxu1 %v6213_v31  ;;  %v1932_v9 = vpack.c.bf16 %v6134_v6, %v6134_v6 }
 0x581   :  { %1947 = vmatprep.subr.bf16.mxu0 %v6216_v42  ;;  %4110 = vmatprep.subr.bf16.mxu1 %v7240_v54 }
 0x584   :  { %1948 = vmatpush1.bf16.msra.mxu0 %v6220_v7  ;;  %4111 = vmatpush3.bf16.msra.mxu1 %v6223_v12 }
 0x585   :  { %2037 = vmatprep.subr.bf16.mxu0 %v5753_v11  ;;  %4116 = vmatprep.subr.bf16.mxu1 %v7240_v54  ;;  %v7328_v11 = vld [vmem:[#allocation15_spill] sm:$0xff] }
 0x587   :  { %1966 = vmatmul.mubr.bf16.vlgmr.msra.gmra.mrb[44].mxu0 %v1932_v9  ;;  %4113 = vmatmul.mubr.bf16.vlgmr.msra.gmra.mrb[52].mxu1 %v1932_v9 }
 0x588   :  { %2038 = vmatpush1.bf16.msra.mxu0 %v5760_v24  ;;  %4117 = vmatpush3.bf16.msra.mxu1 %v5766_v27  ;;  %v7329_v24 = vld [vmem:[#allocation16_spill] sm:$0xff]  ;;  %v7330_v27 = vld [vmem:[#allocation17_spill] sm:$0xff] }
 0x589   :  { %2039 = vmatprep.subr.bf16.mxu0 %v5772_v26  ;;  %4118 = vmatprep.subr.bf16.mxu1 %v7240_v54  ;;  %v7331_v26 = vld [vmem:[#allocation18_spill] sm:$0xff] }
 0x58a   :  { %2069 = vmatprep.mubr.bf16.mxu0 %v7241_v1  ;;  %4132 = vmatprep.mubr.msk.bf16.mxu1 %vm5035_vm1, %v7240_v54 }
 0x58c   :  { %2040 = vmatpush1.bf16.msra.mxu0 %v5782_v21  ;;  %4119 = vmatpush3.bf16.msra.mxu1 %v5788_v5  ;;  %v7332_v21 = vld [vmem:[#allocation19_spill] sm:$0xff]  ;;  %v7333_v5 = vld [vmem:[#allocation20_spill] sm:$0xff] }
 0x58d   :  { %2041 = vmatprep.subr.bf16.mxu0 %v5794_v59  ;;  %4120 = vmatprep.subr.bf16.mxu1 %v7240_v54  ;;  %v7334_v59 = vld [vmem:[#allocation21_spill] sm:$0xff] }
 0x590   :  { %2042 = vmatpush1.bf16.msra.mxu0 %v5801_v15  ;;  %4121 = vmatpush3.bf16.msra.mxu1 %v5807_v28  ;;  %v7335_v15 = vld [vmem:[#allocation22_spill] sm:$0xff]  ;;  %v7336_v28 = vld [vmem:[#allocation23_spill] sm:$0xff] }
 0x591   :  { %2043 = vmatprep.subr.bf16.mxu0 %v5813_v29  ;;  %4122 = vmatprep.subr.bf16.mxu1 %v7240_v54  ;;  %v7337_v29 = vld [vmem:[#allocation24_spill] sm:$0xff] }
 0x594   :  { %2044 = vmatpush1.bf16.msra.mxu0 %v5820_v19  ;;  %4123 = vmatpush3.bf16.msra.mxu1 %v5826_v30  ;;  %v7338_v19 = vld [vmem:[#allocation25_spill] sm:$0xff]  ;;  %v7339_v30 = vld [vmem:[#allocation26_spill] sm:$0xff] }
 0x595   :  { %2045 = vmatprep.subr.bf16.mxu0 %v5832_v13  ;;  %4124 = vmatprep.subr.bf16.mxu1 %v7240_v54  ;;  %v7340_v13 = vld [vmem:[#allocation27_spill] sm:$0xff] }
 0x598   :  { %2046 = vmatpush1.bf16.msra.mxu0 %v7295_v61  ;;  %4125 = vmatpush3.bf16.msra.mxu1 %v7296_v53  ;;  %v7341_v61 = vld [vmem:[#allocation51_spill] sm:$0xff] }
 0x599   :  { %2047 = vmatprep.subr.bf16.mxu0 %v7297_v17  ;;  %4126 = vmatprep.subr.bf16.mxu1 %v7240_v54 }
 0x59c   :  { %2048 = vmatpush1.bf16.msra.mxu0 %v7298_v62  ;;  %4127 = vmatpush3.bf16.msra.mxu1 %v6015_v23 }
 0x59d   :  { %2049 = vmatprep.subr.bf16.mxu0 %v7299_v58  ;;  %4128 = vmatprep.subr.bf16.mxu1 %v7240_v54 }
 0x5a0   :  { %2050 = vmatpush1.bf16.msra.mxu0 %v7300_v56  ;;  %4129 = vmatpush3.bf16.msra.mxu1 %v6024_v10 }
 0x5a1   :  { %2051 = vmatprep.subr.bf16.mxu0 %v7301_v55  ;;  %4130 = vmatprep.subr.bf16.mxu1 %v7240_v54 }
 0x5a4   :  { %2052 = vmatpush1.bf16.msra.mxu0 %v7302_v2  ;;  %4131 = vmatpush3.bf16.msra.mxu1 %v6033_v57 }
 0x5a5   :  { %2139 = vmatprep.subr.bf16.mxu0 %v6036_v52  ;;  %4136 = vmatprep.subr.bf16.mxu1 %v7240_v54 }
 0x5a7   :  { %2070 = vmatmul.mubr.bf16.vlgmr.msra.gmra.mrb[48].mxu0 %v6143_v50  ;;  %4133 = vmatmul.mubr.bf16.vlgmr.msra.gmra.mrb[56].mxu1 %v6143_v50 }
 0x5a8   :  { %2140 = vmatpush1.bf16.msra.mxu0 %v6042_v18  ;;  %4137 = vmatpush3.bf16.msra.mxu1 %v6045_v3 }
 0x5a9   :  { %2141 = vmatprep.subr.bf16.mxu0 %v6048_v4  ;;  %4138 = vmatprep.subr.bf16.mxu1 %v7240_v54 }
 0x5aa   :  { %2171 = vmatprep.mubr.bf16.mxu0 %v7241_v1  ;;  %4152 = vmatprep.mubr.msk.bf16.mxu1 %vm5035_vm1, %v7240_v54 }
 0x5ac   :  { %2142 = vmatpush1.bf16.msra.mxu0 %v6055_v49  ;;  %4139 = vmatpush3.bf16.msra.mxu1 %v6058_v48 }
 0x5ad   :  { %2143 = vmatprep.subr.bf16.mxu0 %v6061_v51  ;;  %4140 = vmatprep.subr.bf16.mxu1 %v7240_v54 }
 0x5b0   :  { %2144 = vmatpush1.bf16.msra.mxu0 %v6065_v47  ;;  %4141 = vmatpush3.bf16.msra.mxu1 %v6068_v8 }
 0x5b1   :  { %2145 = vmatprep.subr.bf16.mxu0 %v6071_v63  ;;  %4142 = vmatprep.subr.bf16.mxu1 %v7240_v54 }
 0x5b4   :  { %2146 = vmatpush1.bf16.msra.mxu0 %v6075_v25  ;;  %4143 = vmatpush3.bf16.msra.mxu1 %v7328_v11 }
 0x5b5   :  { %2147 = vmatprep.subr.bf16.mxu0 %v7329_v24  ;;  %4144 = vmatprep.subr.bf16.mxu1 %v7240_v54 }
 0x5b8   :  { %2148 = vmatpush1.bf16.msra.mxu0 %v7330_v27  ;;  %4145 = vmatpush3.bf16.msra.mxu1 %v7331_v26 }
 0x5b9   :  { %2149 = vmatprep.subr.bf16.mxu0 %v7332_v21  ;;  %4146 = vmatprep.subr.bf16.mxu1 %v7240_v54 }
 0x5bc   :  { %2150 = vmatpush1.bf16.msra.mxu0 %v7333_v5  ;;  %4147 = vmatpush3.bf16.msra.mxu1 %v7334_v59 }
 0x5bd   :  { %2151 = vmatprep.subr.bf16.mxu0 %v7335_v15  ;;  %4148 = vmatprep.subr.bf16.mxu1 %v7240_v54 }
 0x5c0   :  { %2152 = vmatpush1.bf16.msra.mxu0 %v7336_v28  ;;  %4149 = vmatpush3.bf16.msra.mxu1 %v7337_v29 }
 0x5c1   :  { %2153 = vmatprep.subr.bf16.mxu0 %v7338_v19  ;;  %4150 = vmatprep.subr.bf16.mxu1 %v7240_v54 }
 0x5c4   :  { %2154 = vmatpush1.bf16.msra.mxu0 %v7339_v30  ;;  %4151 = vmatpush3.bf16.msra.mxu1 %v7340_v13  ;;  %v7342_v13 = vld [vmem:[#allocation29_spill] sm:$0xff] }
 0x5c5   :  { %2221 = vmatprep.subr.bf16.mxu0 %v7341_v61  ;;  %4156 = vmatprep.subr.bf16.mxu1 %v7240_v54 }
 0x63a   :  { %v1926_v53 = vpop.f32.mrb[48].mxu1 }
 0x63b   :  { %v4094_v17 = vpop.f32.mrb[49].mxu1 }
 0x63c   :  { %v1929_v62 = vpop.f32.mrb[50].mxu1 }
 0x63d   :  { %v4095_v58 = vpop.f32.mrb[51].mxu1  ;;  %v7343_v62 = vld [vmem:[#allocation55_spill] sm:$0xff] }
 0x65a   :  { %v1967_v56 = vpop.f32.mrb[44].mxu0  ;;  %v2008_v55 = vpop.f32.mrb[52].mxu1 }
 0x65b   :  { %v4417_v2 = vadd.f32 %v7317_v46, %v1967_v56  ;;  %v1969_v50 = vpop.f32.mrb[45].mxu0  ;;  %v4114_v9 = vpop.f32.mrb[53].mxu1  ;;  %v2009_v58 = vadd.f32 %v2008_v55, %v7343_v62  ;;  %v1927_v56 = vadd.f32 %v1926_v53, %v5694_v14  ;;  %v7345_v53 = vld [vmem:[#allocation39_spill] sm:$0xff] }
 0x65c   :  { %v1971_v19 = vpop.f32.mrb[46].mxu0  ;;  %v2011_v29 = vpop.f32.mrb[54].mxu1  ;;  %v4419_v61 = vadd.f32 %v7342_v13, %v1969_v50  ;;  %v7344_v50 = vld [vmem:[#allocation37_spill] sm:$0xff] }
 0x65d   :  { %v3585_v28 = vmul.f32 -1.442695, %v4417_v2  ;;  %v1972_v30 = vpop.f32.mrb[47].mxu0  ;;  %v4115_v15 = vpop.f32.mrb[55].mxu1 }
 0x65e   :  { %v3586_v59 = vmul.f32 -1.442695, %v4419_v61 }
 0x65f   :  { %4670 = vpow2.f32 %v3585_v28 }
 0x660   :  { %4672 = vpow2.f32 %v3586_v59 }
 0x669   :  { %v4671_v5 = vpop.eup %4670 }
 0x66a   :  { %v2022_v21 = vadd.f32 1.0, %v4671_v5  ;;  %v4673_v17 = vpop.eup %4672 }
 0x66b   :  { %v2023_v29 = vadd.f32 1.0, %v4673_v17 }
 0x66c   :  { %4674 = vrcp.f32 %v2022_v21 }
 0x676   :  { %v4675_v26 = vpop.eup %4674 }
 0x677   :  { %v2028_v9 = vmul.f32 %v4675_v26, %v2009_v58 }
 0x679   :  { %v2029_v19 = vadd.f32 %v2028_v9, %v1927_v56 }
 0x67a   :  { %v2071_v2 = vpop.f32.mrb[48].mxu0  ;;  %v2112_v30 = vpop.f32.mrb[56].mxu1 }
 0x67b   :  { %4676 = vtanh.f32 %v2029_v19  ;;  %v2072_v15 = vadd.f32 %v2071_v2, %v7291_v20  ;;  %v2073_v28 = vpop.f32.mrb[49].mxu0  ;;  %v4134_v61 = vpop.f32.mrb[57].mxu1 }
 0x67c   :  { %v2074_v5 = vadd.f32 %v2073_v28, %v5509_v60  ;;  %v2075_v59 = vpop.f32.mrb[50].mxu0  ;;  %v2115_v21 = vpop.f32.mrb[58].mxu1  ;;  %4678 = vrcp.f32 %v2023_v29 }
 0x67d   :  { %v2118_v55 = vadd.f32 %v2072_v15, %v7344_v50  ;;  %v2076_v62 = vpop.f32.mrb[51].mxu0  ;;  %v4135_v13 = vpop.f32.mrb[59].mxu1 }
 0x67e   :  { %v2119_v26 = vadd.f32 %v2074_v5, %v7345_v53  ;;  %v2113_v62 = vadd.f32 %v2112_v30, %v5514_v0  ;;  %v7346_v5 = vld [vmem:[#allocation44_spill] sm:$0xff]  ;;  %v7348_v30 = vld [vmem:[#allocation33_spill] sm:$0xff] }
 0x67f   :  { %v3587_v58 = vmul.f32 -1.442695, %v2118_v55 }
 0x680   :  { %v3588_v2 = vmul.f32 -1.442695, %v2119_v26 }
 0x681   :  { %4680 = vpow2.f32 %v3587_v58 }
 0x682   :  { %4682 = vpow2.f32 %v3588_v2 }
 0x685   :  { %v4677_v17 = vpop.eup %4676 }
 0x686   :  { %v2031_v56 = vsub.f32 %v6134_v6, %v4677_v17  ;;  %v4679_v9 = vpop.eup %4678 }
 0x688   :  { %v2032_v19 = vmul.f32 %v4679_v9, %v2031_v56  ;;  %v7349_v56 = vld [vmem:[#allocation36_spill] sm:$0xff]  ;;  %v7350_v9 = vld [vmem:[#allocation30_spill] sm:$0xff] }
 0x68a   :  { %v6311_v61 = vadd.f32 %v4677_v17, %v2032_v19  ;;  %v7351_v19 = vld [vmem:[#allocation31_spill] sm:$0xff] }
 0x68b   :  { %v4681_v28 = vpop.eup %4680 }
 0x68c   :  { %v2126_v59 = vadd.f32 1.0, %v4681_v28  ;;  %v4683_v29 = vpop.eup %4682  ;;  %v2220_v2 = vpack.c.bf16 %v6311_v61, %v6311_v61  ;;  %v6362_v28 = vld [vmem:[%s7052_s3 + $0x4] ss:$12 sps:$4 sm:$0xff]  }
 0x68d   :  { %v2127_v50 = vadd.f32 1.0, %v4683_v29  ;;  %v6375_v29 = vld [vmem:[%s7052_s3 + $0x8] ss:$12 sps:$4 sm:$0xff]  }
 0x68e   :  { %4684 = vrcp.f32 %v2126_v59  ;;  %v6369_v59 = vld [vmem:[%s7052_s3] ss:$12 sps:$4 sm:$0xff]  }
 0x698   :  { %v4685_v13 = vpop.eup %4684 }
 0x699   :  { %v2132_v15 = vmul.f32 %v4685_v13, %v2113_v62  ;;  %v6381_v62 = vld [vmem:[%s7052_s3 + $0x1c] ss:$12 sps:$4 sm:$0xff]   ;;  %v6391_v13 = vld [vmem:[%s7052_s3 + $0x18] ss:$12 sps:$4 sm:$0xff]  }
 0x69b   :  { %v2133_v21 = vadd.f32 %v2132_v15, %v7346_v5  ;;  %v6397_v15 = vld [vmem:[%s7052_s3 + $0x20] ss:$12 sps:$4 sm:$0xff]  }
 0x69c   :  { %v6403_v5 = vld [vmem:[%s7052_s3 + $0x34] ss:$12 sps:$4 sm:$0xff]  }
 0x69d   :  { %4686 = vtanh.f32 %v2133_v21  ;;  %v6410_v21 = vld [vmem:[%s7052_s3 + $0x30] ss:$12 sps:$4 sm:$0xff]  }
 0x69e   :  { %4688 = vrcp.f32 %v2127_v50  ;;  %v6416_v50 = vld [vmem:[%s7052_s3 + $0x38] ss:$12 sps:$4 sm:$0xff]  }
 0x6a7   :  { %v4687_v6 = vpop.eup %4686 }
 0x6a8   :  { %v2135_v55 = vsub.f32 %v6139_v45, %v4687_v6  ;;  %v4689_v53 = vpop.eup %4688  ;;  %v7347_v45 = vld [vmem:[#allocation32_spill] sm:$0xff] }
 0x6aa   :  { %v2136_v26 = vmul.f32 %v4689_v53, %v2135_v55  ;;  %v6429_v55 = vld [vmem:[%s7052_s3 + $0x48] ss:$12 sps:$4 sm:$0xff]   ;;  %v6435_v53 = vld [vmem:[%s7052_s3 + $0x50] ss:$12 sps:$4 sm:$0xff]  }
 0x6ab   :  { %7352 = vst [vmem:[#allocation40_spill] sm:$0xff] %v6435_v53 }
 0x6ac   :  { %v6316_v58 = vadd.f32 %v4687_v6, %v2136_v26  ;;  %v6422_v6 = vld [vmem:[%s7052_s3 + $0x4c] ss:$12 sps:$4 sm:$0xff]   ;;  %v6441_v26 = vld [vmem:[%s7052_s3 + $0x64] ss:$12 sps:$4 sm:$0xff]  }
 0x6ad   :  { %7353 = vst [vmem:[#allocation52_spill] sm:$0xff] %v6441_v26 }
 0x6ae   :  { %v6320_v17 = vpack.c.bf16 %v6316_v58, %v6316_v58 }
 0x6b0   :  { %2172 = vmatmul.mubr.bf16.vlgmr.msra.gmra.mrb[52].mxu0 %v6320_v17  ;;  %4153 = vmatmul.mubr.bf16.vlgmr.msra.gmra.mrb[60].mxu1 %v6320_v17 }
 0x6b1   :  { %2222 = vmatpush1.bf16.msra.mxu0 %v6147_v41  ;;  %4157 = vmatpush3.bf16.msra.mxu1 %v6150_v22 }
 0x6b2   :  { %2223 = vmatprep.subr.bf16.mxu0 %v6153_v33  ;;  %4158 = vmatprep.subr.bf16.mxu1 %v7240_v54 }
 0x6b3   :  { %2253 = vmatprep.mubr.bf16.mxu0 %v7241_v1  ;;  %4172 = vmatprep.mubr.msk.bf16.mxu1 %vm5035_vm1, %v7240_v54 }
 0x6b5   :  { %2224 = vmatpush1.bf16.msra.mxu0 %v6160_v32  ;;  %4159 = vmatpush3.bf16.msra.mxu1 %v6163_v40 }
 0x6b6   :  { %2225 = vmatprep.subr.bf16.mxu0 %v6166_v16  ;;  %4160 = vmatprep.subr.bf16.mxu1 %v7240_v54 }
 0x6b9   :  { %2226 = vmatpush1.bf16.msra.mxu0 %v6170_v37  ;;  %4161 = vmatpush3.bf16.msra.mxu1 %v6173_v38 }
 0x6ba   :  { %2227 = vmatprep.subr.bf16.mxu0 %v6176_v44  ;;  %4162 = vmatprep.subr.bf16.mxu1 %v7240_v54 }
 0x6bd   :  { %2228 = vmatpush1.bf16.msra.mxu0 %v6180_v35  ;;  %4163 = vmatpush3.bf16.msra.mxu1 %v6183_v39 }
 0x6be   :  { %2229 = vmatprep.subr.bf16.mxu0 %v6186_v36  ;;  %4164 = vmatprep.subr.bf16.mxu1 %v7240_v54 }
 0x6c1   :  { %2230 = vmatpush1.bf16.msra.mxu0 %v6190_v34  ;;  %4165 = vmatpush3.bf16.msra.mxu1 %v7347_v45 }
 0x6c2   :  { %2231 = vmatprep.subr.bf16.mxu0 %v7348_v30  ;;  %4166 = vmatprep.subr.bf16.mxu1 %v7240_v54 }
 0x6c5   :  { %2232 = vmatpush1.bf16.msra.mxu0 %v6200_v43  ;;  %4167 = vmatpush3.bf16.msra.mxu1 %v7349_v56 }
 0x6c6   :  { %2233 = vmatprep.subr.bf16.mxu0 %v7350_v9  ;;  %4168 = vmatprep.subr.bf16.mxu1 %v7240_v54 }
 0x6c9   :  { %2234 = vmatpush1.bf16.msra.mxu0 %v7351_v19  ;;  %4169 = vmatpush3.bf16.msra.mxu1 %v6213_v31 }
 0x6ca   :  { %2235 = vmatprep.subr.bf16.mxu0 %v6216_v42  ;;  %4170 = vmatprep.subr.bf16.mxu1 %v7240_v54 }
 0x6cd   :  { %2236 = vmatpush1.bf16.msra.mxu0 %v6220_v7  ;;  %4171 = vmatpush3.bf16.msra.mxu1 %v6223_v12 }
 0x6ce   :  { %2325 = vmatprep.subr.bf16.mxu0 %v6362_v28  ;;  %4176 = vmatprep.subr.bf16.mxu1 %v7240_v54 }
 0x6d0   :  { %2254 = vmatmul.mubr.bf16.vlgmr.msra.gmra.mrb[52].mxu0 %v2220_v2  ;;  %4173 = vmatmul.mubr.bf16.vlgmr.msra.gmra.mrb[64].mxu1 %v2220_v2  ;;  %v6448_v2 = vld [vmem:[%s7052_s3 + $0x60] ss:$12 sps:$4 sm:$0xff]  }
 0x6d1   :  { %2326 = vmatpush1.bf16.msra.mxu0 %v6369_v59  ;;  %4177 = vmatpush3.bf16.msra.mxu1 %v6375_v29  ;;  %7354 = vst [vmem:[#allocation53_spill] sm:$0xff] %v6448_v2 }
 0x6d2   :  { %2327 = vmatprep.subr.bf16.mxu0 %v6381_v62  ;;  %4178 = vmatprep.subr.bf16.mxu1 %v7240_v54 }
 0x6d3   :  { %2357 = vmatprep.mubr.bf16.mxu0 %v7241_v1  ;;  %4192 = vmatprep.mubr.msk.bf16.mxu1 %vm5035_vm1, %v7240_v54 }
 0x6d5   :  { %2328 = vmatpush1.bf16.msra.mxu0 %v6391_v13  ;;  %4179 = vmatpush3.bf16.msra.mxu1 %v6397_v15 }
 0x6d6   :  { %2329 = vmatprep.subr.bf16.mxu0 %v6403_v5  ;;  %4180 = vmatprep.subr.bf16.mxu1 %v7240_v54 }
 0x6d9   :  { %2330 = vmatpush1.bf16.msra.mxu0 %v6410_v21  ;;  %4181 = vmatpush3.bf16.msra.mxu1 %v6416_v50 }
 0x6da   :  { %2331 = vmatprep.subr.bf16.mxu0 %v6422_v6  ;;  %4182 = vmatprep.subr.bf16.mxu1 %v7240_v54 }
 0x6dd   :  { %2332 = vmatpush1.bf16.msra.mxu0 %v6429_v55  ;;  %4183 = vmatpush3.bf16.msra.mxu1 %v6435_v53  ;;  %v6454_v53 = vld [vmem:[%s7052_s3 + $0x68] ss:$12 sps:$4 sm:$0xff]  }
 0x6de   :  { %2333 = vmatprep.subr.bf16.mxu0 %v6441_v26  ;;  %4184 = vmatprep.subr.bf16.mxu1 %v7240_v54  ;;  %7355 = vst [vmem:[#allocation54_spill] sm:$0xff] %v6454_v53  ;;  %v6460_v26 = vld [vmem:[%s7052_s3 + $0x7c] ss:$12 sps:$4 sm:$0xff]  }
 0x6df   :  { %7356 = vst [vmem:[#allocation56_spill] sm:$0xff] %v6460_v26 }
 0x6e1   :  { %2334 = vmatpush1.bf16.msra.mxu0 %v6448_v2  ;;  %4185 = vmatpush3.bf16.msra.mxu1 %v6454_v53  ;;  %v6467_v2 = vld [vmem:[%s7052_s3 + $0x78] ss:$12 sps:$4 sm:$0xff]   ;;  %v6474_v53 = vld [vmem:[%s7052_s3 + $0x94] ss:$12 sps:$4 sm:$0xff]  }
 0x6e2   :  { %2335 = vmatprep.subr.bf16.mxu0 %v6460_v26  ;;  %4186 = vmatprep.subr.bf16.mxu1 %v7240_v54  ;;  %7357 = vst [vmem:[#allocation57_spill] sm:$0xff] %v6474_v53  ;;  %v6481_v26 = vld [vmem:[%s7052_s3 + $0x90] ss:$12 sps:$4 sm:$0xff]  }
 0x6e3   :  { %7358 = vst [vmem:[#allocation28_spill] sm:$0xff] %v6481_v26 }
 0x6e5   :  { %2336 = vmatpush1.bf16.msra.mxu0 %v6467_v2  ;;  %4187 = vmatpush3.bf16.msra.mxu1 %v6015_v23  ;;  %v6488_v23 = vld [vmem:[%s7052_s3 + $0xac] ss:$12 sps:$4 sm:$0xff]  }
 0x6e6   :  { %2337 = vmatprep.subr.bf16.mxu0 %v6474_v53  ;;  %4188 = vmatprep.subr.bf16.mxu1 %v7240_v54  ;;  %7359 = vst [vmem:[#allocation34_spill] sm:$0xff] %v6488_v23  ;;  %v6495_v53 = vld [vmem:[%s7052_s3 + $0xa8] ss:$12 sps:$4 sm:$0xff]  }
 0x6e7   :  { %7360 = vst [vmem:[#allocation35_spill] sm:$0xff] %v6495_v53 }
 0x6e9   :  { %2338 = vmatpush1.bf16.msra.mxu0 %v6481_v26  ;;  %4189 = vmatpush3.bf16.msra.mxu1 %v6024_v10  ;;  %v7361_v10 = vld [vmem:[#allocation18_spill] sm:$0xff] }
 0x6ea   :  { %2339 = vmatprep.subr.bf16.mxu0 %v6488_v23  ;;  %4190 = vmatprep.subr.bf16.mxu1 %v7240_v54 }
 0x6ed   :  { %2340 = vmatpush1.bf16.msra.mxu0 %v6495_v53  ;;  %4191 = vmatpush3.bf16.msra.mxu1 %v6033_v57  ;;  %v7362_v57 = vld [vmem:[#allocation19_spill] sm:$0xff] }
 0x6ee   :  { %2427 = vmatprep.subr.bf16.mxu0 %v6036_v52  ;;  %4196 = vmatprep.subr.bf16.mxu1 %v7240_v54  ;;  %v7363_v52 = vld [vmem:[#allocation20_spill] sm:$0xff] }
 0x6f0   :  { %2358 = vmatmul.mubr.bf16.vlgmr.msra.gmra.mrb[56].mxu0 %v6320_v17  ;;  %4193 = vmatmul.mubr.bf16.vlgmr.msra.gmra.mrb[68].mxu1 %v6320_v17 }
 0x6f1   :  { %2428 = vmatpush1.bf16.msra.mxu0 %v6042_v18  ;;  %4197 = vmatpush3.bf16.msra.mxu1 %v6045_v3  ;;  %v7364_v18 = vld [vmem:[#allocation21_spill] sm:$0xff]  ;;  %v7365_v3 = vld [vmem:[#allocation22_spill] sm:$0xff] }
 0x6f2   :  { %2429 = vmatprep.subr.bf16.mxu0 %v6048_v4  ;;  %4198 = vmatprep.subr.bf16.mxu1 %v7240_v54  ;;  %v7366_v4 = vld [vmem:[#allocation23_spill] sm:$0xff] }
 0x6f3   :  { %2459 = vmatprep.mubr.bf16.mxu0 %v7241_v1  ;;  %4212 = vmatprep.mubr.msk.bf16.mxu1 %vm5035_vm1, %v7240_v54 }
 0x6f5   :  { %2430 = vmatpush1.bf16.msra.mxu0 %v6055_v49  ;;  %4199 = vmatpush3.bf16.msra.mxu1 %v6058_v48  ;;  %v7367_v49 = vld [vmem:[#allocation24_spill] sm:$0xff]  ;;  %v7368_v48 = vld [vmem:[#allocation25_spill] sm:$0xff] }
 0x6f6   :  { %2431 = vmatprep.subr.bf16.mxu0 %v6061_v51  ;;  %4200 = vmatprep.subr.bf16.mxu1 %v7240_v54  ;;  %v7369_v51 = vld [vmem:[#allocation26_spill] sm:$0xff] }
 0x6f9   :  { %2432 = vmatpush1.bf16.msra.mxu0 %v6065_v47  ;;  %4201 = vmatpush3.bf16.msra.mxu1 %v6068_v8  ;;  %v7370_v47 = vld [vmem:[#allocation27_spill] sm:$0xff] }
 0x6fa   :  { %2433 = vmatprep.subr.bf16.mxu0 %v6071_v63  ;;  %4202 = vmatprep.subr.bf16.mxu1 %v7240_v54  ;;  %v7371_v8 = vld [vmem:[#allocation51_spill] sm:$0xff] }
 0x6fd   :  { %2434 = vmatpush1.bf16.msra.mxu0 %v6075_v25  ;;  %4203 = vmatpush3.bf16.msra.mxu1 %v7328_v11 }
 0x6fe   :  { %2435 = vmatprep.subr.bf16.mxu0 %v7329_v24  ;;  %4204 = vmatprep.subr.bf16.mxu1 %v7240_v54 }
 0x701   :  { %2436 = vmatpush1.bf16.msra.mxu0 %v7330_v27  ;;  %4205 = vmatpush3.bf16.msra.mxu1 %v7361_v10 }
 0x702   :  { %2437 = vmatprep.subr.bf16.mxu0 %v7362_v57  ;;  %4206 = vmatprep.subr.bf16.mxu1 %v7240_v54 }
 0x705   :  { %2438 = vmatpush1.bf16.msra.mxu0 %v7363_v52  ;;  %4207 = vmatpush3.bf16.msra.mxu1 %v7364_v18 }
 0x706   :  { %2439 = vmatprep.subr.bf16.mxu0 %v7365_v3  ;;  %4208 = vmatprep.subr.bf16.mxu1 %v7240_v54 }
 0x709   :  { %2440 = vmatpush1.bf16.msra.mxu0 %v7366_v4  ;;  %4209 = vmatpush3.bf16.msra.mxu1 %v7367_v49 }
 0x70a   :  { %2441 = vmatprep.subr.bf16.mxu0 %v7368_v48  ;;  %4210 = vmatprep.subr.bf16.mxu1 %v7240_v54 }
 0x70d   :  { %2442 = vmatpush1.bf16.msra.mxu0 %v7369_v51  ;;  %4211 = vmatpush3.bf16.msra.mxu1 %v7370_v47  ;;  %v7372_v51 = vld [vmem:[#allocation29_spill] sm:$0xff] }
 0x70e   :  { %2509 = vmatprep.subr.bf16.mxu0 %v7371_v8  ;;  %4216 = vmatprep.subr.bf16.mxu1 %v7240_v54 }
 0x783   :  { %v2214_v63 = vpop.f32.mrb[60].mxu1 }
 0x784   :  { %v4154_v25 = vpop.f32.mrb[61].mxu1 }
 0x785   :  { %v2217_v11 = vpop.f32.mrb[62].mxu1 }
 0x786   :  { %v4155_v24 = vpop.f32.mrb[63].mxu1  ;;  %v7373_v11 = vld [vmem:[#allocation55_spill] sm:$0xff] }
 0x7a3   :  { %v2255_v27 = vpop.f32.mrb[52].mxu0  ;;  %v2296_v17 = vpop.f32.mrb[64].mxu1 }
 0x7a4   :  { %v4421_v10 = vadd.f32 %v7317_v46, %v2255_v27  ;;  %v2257_v57 = vpop.f32.mrb[53].mxu0  ;;  %v4174_v52 = vpop.f32.mrb[65].mxu1  ;;  %v2297_v24 = vadd.f32 %v2296_v17, %v7373_v11  ;;  %v2215_v27 = vadd.f32 %v2214_v63, %v5694_v14  ;;  %v7375_v63 = vld [vmem:[#allocation42_spill] sm:$0xff] }
 0x7a5   :  { %v2259_v18 = vpop.f32.mrb[54].mxu0  ;;  %v2299_v3 = vpop.f32.mrb[66].mxu1  ;;  %v4423_v47 = vadd.f32 %v7372_v51, %v2257_v57 }
 0x7a6   :  { %v3589_v4 = vmul.f32 -1.442695, %v4421_v10  ;;  %v2260_v49 = vpop.f32.mrb[55].mxu0  ;;  %v4175_v48 = vpop.f32.mrb[67].mxu1 }
 0x7a7   :  { %v3590_v8 = vmul.f32 -1.442695, %v4423_v47 }
 0x7a8   :  { %4690 = vpow2.f32 %v3589_v4 }
 0x7a9   :  { %4692 = vpow2.f32 %v3590_v8  ;;  %v7374_v8 = vld [vmem:[#allocation41_spill] sm:$0xff] }
 0x7b2   :  { %v4691_v53 = vpop.eup %4690 }
 0x7b3   :  { %v2310_v23 = vadd.f32 1.0, %v4691_v53  ;;  %v4693_v25 = vpop.eup %4692 }
 0x7b4   :  { %v2311_v3 = vadd.f32 1.0, %v4693_v25 }
 0x7b5   :  { %4694 = vrcp.f32 %v2310_v23 }
 0x7bf   :  { %v4695_v26 = vpop.eup %4694 }
 0x7c0   :  { %v2316_v52 = vmul.f32 %v4695_v26, %v2297_v24 }
 0x7c2   :  { %v2317_v18 = vadd.f32 %v2316_v52, %v2215_v27 }
 0x7c3   :  { %v2359_v10 = vpop.f32.mrb[56].mxu0  ;;  %v2400_v49 = vpop.f32.mrb[68].mxu1 }
 0x7c4   :  { %4696 = vtanh.f32 %v2317_v18  ;;  %v2360_v4 = vadd.f32 %v2359_v10, %v7291_v20  ;;  %v2361_v57 = vpop.f32.mrb[57].mxu0  ;;  %v4194_v48 = vpop.f32.mrb[69].mxu1 }
 0x7c5   :  { %v2362_v53 = vadd.f32 %v2361_v57, %v5509_v60  ;;  %v2363_v47 = vpop.f32.mrb[58].mxu0  ;;  %v2403_v23 = vpop.f32.mrb[70].mxu1  ;;  %4698 = vrcp.f32 %v2311_v3 }
 0x7c6   :  { %v2406_v17 = vadd.f32 %v2360_v4, %v7374_v8  ;;  %v2364_v11 = vpop.f32.mrb[59].mxu0  ;;  %v4195_v51 = vpop.f32.mrb[71].mxu1 }
 0x7c7   :  { %v2407_v26 = vadd.f32 %v2362_v53, %v7375_v63  ;;  %v2401_v11 = vadd.f32 %v2400_v49, %v5514_v0  ;;  %v7376_v53 = vld [vmem:[#allocation48_spill] sm:$0xff] }
 0x7c8   :  { %v3591_v24 = vmul.f32 -1.442695, %v2406_v17  ;;  %v6687_v49 = vld [vmem:[#allocation6 + $0x50] ss:$12 sps:$4 sm:$0xff]  }
 0x7c9   :  { %v3592_v10 = vmul.f32 -1.442695, %v2407_v26  ;;  %7386 = vst [vmem:[#allocation38_spill] sm:$0xff] %v6687_v49 }
 0x7ca   :  { %4700 = vpow2.f32 %v3591_v24 }
 0x7cb   :  { %4702 = vpow2.f32 %v3592_v10  ;;  %v6700_v10 = vld [vmem:[#allocation6 + $0x7c] ss:$12 sps:$4 sm:$0xff]  }
 0x7cc   :  { %7390 = vst [vmem:[#allocation37_spill] sm:$0xff] %v6700_v10 }
 0x7ce   :  { %v4697_v25 = vpop.eup %4696 }
 0x7cf   :  { %v2319_v27 = vsub.f32 %v6311_v61, %v4697_v25  ;;  %v4699_v52 = vpop.eup %4698 }
 0x7d1   :  { %v2320_v18 = vmul.f32 %v4699_v52, %v2319_v27  ;;  %v6690_v27 = vld [vmem:[#allocation6 + $0x64] ss:$12 sps:$4 sm:$0xff]   ;;  %v6694_v52 = vld [vmem:[#allocation6 + $0x60] ss:$12 sps:$4 sm:$0xff]  }
 0x7d2   :  { %7387 = vst [vmem:[#allocation15_spill] sm:$0xff] %v6690_v27  ;;  %7388 = vst [vmem:[#allocation16_spill] sm:$0xff] %v6694_v52 }
 0x7d3   :  { %v6547_v48 = vadd.f32 %v4697_v25, %v2320_v18  ;;  %v6697_v18 = vld [vmem:[#allocation6 + $0x68] ss:$12 sps:$4 sm:$0xff]  }
 0x7d4   :  { %v4701_v57 = vpop.eup %4700  ;;  %7389 = vst [vmem:[#allocation17_spill] sm:$0xff] %v6697_v18 }
 0x7d5   :  { %v2414_v47 = vadd.f32 1.0, %v4701_v57  ;;  %v4703_v3 = vpop.eup %4702  ;;  %v6704_v57 = vld [vmem:[#allocation6 + $0x78] ss:$12 sps:$4 sm:$0xff]  }
 0x7d6   :  { %v2415_v8 = vadd.f32 1.0, %v4703_v3  ;;  %7391 = vst [vmem:[#allocation39_spill] sm:$0xff] %v6704_v57  ;;  %v6710_v3 = vld [vmem:[#allocation6 + $0x94] ss:$12 sps:$4 sm:$0xff]  }
 0x7d7   :  { %4704 = vrcp.f32 %v2414_v47  ;;  %v6707_v47 = vld [vmem:[#allocation6 + $0x80] ss:$12 sps:$4 sm:$0xff]   ;;  %7393 = vst [vmem:[#allocation32_spill] sm:$0xff] %v6710_v3 }
 0x7d8   :  { %7392 = vst [vmem:[#allocation44_spill] sm:$0xff] %v6707_v47 }
 0x7e1   :  { %v4705_v51 = vpop.eup %4704 }
 0x7e2   :  { %v2420_v4 = vmul.f32 %v4705_v51, %v2401_v11  ;;  %v6714_v11 = vld [vmem:[#allocation6 + $0x90] ss:$12 sps:$4 sm:$0xff]   ;;  %v6717_v51 = vld [vmem:[#allocation6 + $0x98] ss:$12 sps:$4 sm:$0xff]  }
 0x7e3   :  { %7394 = vst [vmem:[#allocation33_spill] sm:$0xff] %v6714_v11  ;;  %7395 = vst [vmem:[#allocation36_spill] sm:$0xff] %v6717_v51 }
 0x7e4   :  { %v2421_v23 = vadd.f32 %v2420_v4, %v7376_v53  ;;  %v6720_v4 = vld [vmem:[#allocation6 + $0xac] ss:$12 sps:$4 sm:$0xff]   ;;  %v6724_v53 = vld [vmem:[#allocation6 + $0xa8] ss:$12 sps:$4 sm:$0xff]  }
 0x7e5   :  { %7396 = vst [vmem:[#allocation30_spill] sm:$0xff] %v6720_v4  ;;  %7397 = vst [vmem:[#allocation31_spill] sm:$0xff] %v6724_v53 }
 0x7e6   :  { %4706 = vtanh.f32 %v2421_v23  ;;  %v6727_v23 = vld [vmem:[#allocation6 + $0xb0] ss:$12 sps:$4 sm:$0xff]  }
 0x7e7   :  { %4708 = vrcp.f32 %v2415_v8  ;;  %7398 = vst [vmem:[#allocation18_spill] sm:$0xff] %v6727_v23  ;;  %v6730_v8 = vld [vmem:[#allocation9 + $0x4] ss:$12 sps:$4 sm:$0xff]  }
 0x7e8   :  { %7399 = vst [vmem:[#allocation19_spill] sm:$0xff] %v6730_v8 }
 0x7f0   :  { %v4707_v61 = vpop.eup %4706 }
 0x7f1   :  { %v2423_v17 = vsub.f32 %v6316_v58, %v4707_v61  ;;  %v4709_v63 = vpop.eup %4708  ;;  %v6667_v58 = vld [vmem:[#allocation6 + $0x20] ss:$12 sps:$4 sm:$0xff]  }
 0x7f3   :  { %v2424_v26 = vmul.f32 %v4709_v63, %v2423_v17 }
 0x7f5   :  { %v6552_v24 = vadd.f32 %v4707_v61, %v2424_v26 }
 0x7f7   :  { %v6556_v25 = vpack.c.bf16 %v6552_v24, %v6552_v24 }
 0x7f9   :  { %2460 = vmatmul.mubr.bf16.vlgmr.msra.gmra.mrb[60].mxu0 %v6556_v25  ;;  %4213 = vmatmul.mubr.bf16.vlgmr.msra.gmra.mrb[72].mxu1 %v6556_v25 }
 0x7fa   :  { %2510 = vmatpush1.bf16.msra.mxu0 %v6147_v41  ;;  %4217 = vmatpush3.bf16.msra.mxu1 %v6150_v22  ;;  %v2508_v41 = vpack.c.bf16 %v6547_v48, %v6547_v48  ;;  %v7377_v22 = vld [vmem:[#allocation40_spill] sm:$0xff] }
 0x7fb   :  { %2511 = vmatprep.subr.bf16.mxu0 %v6153_v33  ;;  %4218 = vmatprep.subr.bf16.mxu1 %v7240_v54  ;;  %v7378_v33 = vld [vmem:[#allocation52_spill] sm:$0xff] }
 0x7fc   :  { %2541 = vmatprep.mubr.bf16.mxu0 %v7241_v1  ;;  %4232 = vmatprep.mubr.msk.bf16.mxu1 %vm5035_vm1, %v7240_v54 }
 0x7fe   :  { %2512 = vmatpush1.bf16.msra.mxu0 %v6160_v32  ;;  %4219 = vmatpush3.bf16.msra.mxu1 %v6163_v40  ;;  %v7379_v32 = vld [vmem:[#allocation53_spill] sm:$0xff]  ;;  %v7380_v40 = vld [vmem:[#allocation54_spill] sm:$0xff] }
 0x7ff   :  { %2513 = vmatprep.subr.bf16.mxu0 %v6166_v16  ;;  %4220 = vmatprep.subr.bf16.mxu1 %v7240_v54  ;;  %v7381_v16 = vld [vmem:[#allocation56_spill] sm:$0xff] }
 0x802   :  { %2514 = vmatpush1.bf16.msra.mxu0 %v6170_v37  ;;  %4221 = vmatpush3.bf16.msra.mxu1 %v6173_v38  ;;  %v6624_v37 = vld [vmem:[%s7052_s3 + $0x80] ss:$12 sps:$4 sm:$0xff]  }
 0x803   :  { %2515 = vmatprep.subr.bf16.mxu0 %v6176_v44  ;;  %4222 = vmatprep.subr.bf16.mxu1 %v7240_v54  ;;  %v7382_v38 = vld [vmem:[#allocation57_spill] sm:$0xff]  ;;  %v7383_v44 = vld [vmem:[#allocation28_spill] sm:$0xff] }
 0x806   :  { %2516 = vmatpush1.bf16.msra.mxu0 %v6180_v35  ;;  %4223 = vmatpush3.bf16.msra.mxu1 %v6183_v39  ;;  %v6633_v35 = vld [vmem:[%s7052_s3 + $0x98] ss:$12 sps:$4 sm:$0xff]  }
 0x807   :  { %2517 = vmatprep.subr.bf16.mxu0 %v6186_v36  ;;  %4224 = vmatprep.subr.bf16.mxu1 %v7240_v54  ;;  %v7384_v39 = vld [vmem:[#allocation34_spill] sm:$0xff]  ;;  %v7385_v36 = vld [vmem:[#allocation35_spill] sm:$0xff] }
 0x80a   :  { %2518 = vmatpush1.bf16.msra.mxu0 %v6190_v34  ;;  %4225 = vmatpush3.bf16.msra.mxu1 %v7347_v45  ;;  %v6642_v34 = vld [vmem:[%s7052_s3 + $0xb0] ss:$12 sps:$4 sm:$0xff]  }
 0x80b   :  { %2519 = vmatprep.subr.bf16.mxu0 %v7348_v30  ;;  %4226 = vmatprep.subr.bf16.mxu1 %v7240_v54  ;;  %v6670_v45 = vld [vmem:[#allocation6 + $0x34] ss:$12 sps:$4 sm:$0xff]   ;;  %v6674_v30 = vld [vmem:[#allocation6 + $0x30] ss:$12 sps:$4 sm:$0xff]  }
 0x80e   :  { %2520 = vmatpush1.bf16.msra.mxu0 %v6200_v43  ;;  %4227 = vmatpush3.bf16.msra.mxu1 %v7349_v56  ;;  %v6654_v43 = vld [vmem:[#allocation6 + $0x8] ss:$12 sps:$4 sm:$0xff]   ;;  %v6677_v56 = vld [vmem:[#allocation6 + $0x38] ss:$12 sps:$4 sm:$0xff]  }
 0x80f   :  { %2521 = vmatprep.subr.bf16.mxu0 %v7350_v9  ;;  %4228 = vmatprep.subr.bf16.mxu1 %v7240_v54  ;;  %v6680_v9 = vld [vmem:[#allocation6 + $0x4c] ss:$12 sps:$4 sm:$0xff]  }
 0x812   :  { %2522 = vmatpush1.bf16.msra.mxu0 %v7351_v19  ;;  %4229 = vmatpush3.bf16.msra.mxu1 %v6213_v31  ;;  %v6651_v31 = vld [vmem:[#allocation6] ss:$12 sps:$4 sm:$0xff]   ;;  %v6684_v19 = vld [vmem:[#allocation6 + $0x48] ss:$12 sps:$4 sm:$0xff]  }
 0x813   :  { %2523 = vmatprep.subr.bf16.mxu0 %v6216_v42  ;;  %4230 = vmatprep.subr.bf16.mxu1 %v7240_v54  ;;  %v6645_v42 = vld [vmem:[#allocation6 + $0x4] ss:$12 sps:$4 sm:$0xff]  }
 0x816   :  { %2524 = vmatpush1.bf16.msra.mxu0 %v6220_v7  ;;  %4231 = vmatpush3.bf16.msra.mxu1 %v6223_v12  ;;  %v6657_v7 = vld [vmem:[#allocation6 + $0x1c] ss:$12 sps:$4 sm:$0xff]   ;;  %v6664_v12 = vld [vmem:[#allocation6 + $0x18] ss:$12 sps:$4 sm:$0xff]  }
 0x817   :  { %2613 = vmatprep.subr.bf16.mxu0 %v6362_v28  ;;  %4236 = vmatprep.subr.bf16.mxu1 %v7240_v54 }
 0x819   :  { %2542 = vmatmul.mubr.bf16.vlgmr.msra.gmra.mrb[60].mxu0 %v2508_v41  ;;  %4233 = vmatmul.mubr.bf16.vlgmr.msra.gmra.mrb[76].mxu1 %v2508_v41 }
 0x81a   :  { %2614 = vmatpush1.bf16.msra.mxu0 %v6369_v59  ;;  %4237 = vmatpush3.bf16.msra.mxu1 %v6375_v29 }
 0x81b   :  { %2615 = vmatprep.subr.bf16.mxu0 %v6381_v62  ;;  %4238 = vmatprep.subr.bf16.mxu1 %v7240_v54 }
 0x81c   :  { %2645 = vmatprep.mubr.bf16.mxu0 %v7241_v1  ;;  %4252 = vmatprep.mubr.msk.bf16.mxu1 %vm5035_vm1, %v7240_v54 }
 0x81e   :  { %2616 = vmatpush1.bf16.msra.mxu0 %v6391_v13  ;;  %4239 = vmatpush3.bf16.msra.mxu1 %v6397_v15 }
 0x81f   :  { %2617 = vmatprep.subr.bf16.mxu0 %v6403_v5  ;;  %4240 = vmatprep.subr.bf16.mxu1 %v7240_v54 }
 0x822   :  { %2618 = vmatpush1.bf16.msra.mxu0 %v6410_v21  ;;  %4241 = vmatpush3.bf16.msra.mxu1 %v6416_v50 }
 0x823   :  { %2619 = vmatprep.subr.bf16.mxu0 %v6422_v6  ;;  %4242 = vmatprep.subr.bf16.mxu1 %v7240_v54 }
 0x826   :  { %2620 = vmatpush1.bf16.msra.mxu0 %v6429_v55  ;;  %4243 = vmatpush3.bf16.msra.mxu1 %v7377_v22 }
 0x827   :  { %2621 = vmatprep.subr.bf16.mxu0 %v7378_v33  ;;  %4244 = vmatprep.subr.bf16.mxu1 %v7240_v54 }
 0x82a   :  { %2622 = vmatpush1.bf16.msra.mxu0 %v7379_v32  ;;  %4245 = vmatpush3.bf16.msra.mxu1 %v7380_v40 }
 0x82b   :  { %2623 = vmatprep.subr.bf16.mxu0 %v7381_v16  ;;  %4246 = vmatprep.subr.bf16.mxu1 %v7240_v54 }
 0x82e   :  { %2624 = vmatpush1.bf16.msra.mxu0 %v6467_v2  ;;  %4247 = vmatpush3.bf16.msra.mxu1 %v6624_v37 }
 0x82f   :  { %2625 = vmatprep.subr.bf16.mxu0 %v7382_v38  ;;  %4248 = vmatprep.subr.bf16.mxu1 %v7240_v54 }
 0x832   :  { %2626 = vmatpush1.bf16.msra.mxu0 %v7383_v44  ;;  %4249 = vmatpush3.bf16.msra.mxu1 %v6633_v35 }
 0x833   :  { %2627 = vmatprep.subr.bf16.mxu0 %v7384_v39  ;;  %4250 = vmatprep.subr.bf16.mxu1 %v7240_v54 }
 0x836   :  { %2628 = vmatpush1.bf16.msra.mxu0 %v7385_v36  ;;  %4251 = vmatpush3.bf16.msra.mxu1 %v6642_v34 }
 0x837   :  { %2715 = vmatprep.subr.bf16.mxu0 %v6645_v42  ;;  %4256 = vmatprep.subr.bf16.mxu1 %v7240_v54 }
 0x839   :  { %2646 = vmatmul.mubr.bf16.vlgmr.msra.gmra.mrb[64].mxu0 %v6556_v25  ;;  %4253 = vmatmul.mubr.bf16.vlgmr.msra.gmra.mrb[80].mxu1 %v6556_v25 }
 0x83a   :  { %2716 = vmatpush1.bf16.msra.mxu0 %v6651_v31  ;;  %4257 = vmatpush3.bf16.msra.mxu1 %v6654_v43 }
 0x83b   :  { %2717 = vmatprep.subr.bf16.mxu0 %v6657_v7  ;;  %4258 = vmatprep.subr.bf16.mxu1 %v7240_v54 }
 0x83c   :  { %2747 = vmatprep.mubr.bf16.mxu0 %v7241_v1  ;;  %4272 = vmatprep.mubr.msk.bf16.mxu1 %vm5035_vm1, %v7240_v54 }
 0x83e   :  { %2718 = vmatpush1.bf16.msra.mxu0 %v6664_v12  ;;  %4259 = vmatpush3.bf16.msra.mxu1 %v6667_v58 }
 0x83f   :  { %2719 = vmatprep.subr.bf16.mxu0 %v6670_v45  ;;  %4260 = vmatprep.subr.bf16.mxu1 %v7240_v54 }
 0x842   :  { %2720 = vmatpush1.bf16.msra.mxu0 %v6674_v30  ;;  %4261 = vmatpush3.bf16.msra.mxu1 %v6677_v56 }
 0x843   :  { %2721 = vmatprep.subr.bf16.mxu0 %v6680_v9  ;;  %4262 = vmatprep.subr.bf16.mxu1 %v7240_v54 }
 0x846   :  { %2722 = vmatpush1.bf16.msra.mxu0 %v6684_v19  ;;  %4263 = vmatpush3.bf16.msra.mxu1 %v6687_v49 }
 0x847   :  { %2723 = vmatprep.subr.bf16.mxu0 %v6690_v27  ;;  %4264 = vmatprep.subr.bf16.mxu1 %v7240_v54 }
 0x84a   :  { %2724 = vmatpush1.bf16.msra.mxu0 %v6694_v52  ;;  %4265 = vmatpush3.bf16.msra.mxu1 %v6697_v18 }
 0x84b   :  { %2725 = vmatprep.subr.bf16.mxu0 %v6700_v10  ;;  %4266 = vmatprep.subr.bf16.mxu1 %v7240_v54  ;;  %v7400_v10 = vld [vmem:[#allocation29_spill] sm:$0xff] }
 0x84e   :  { %2726 = vmatpush1.bf16.msra.mxu0 %v6704_v57  ;;  %4267 = vmatpush3.bf16.msra.mxu1 %v6707_v47 }
 0x84f   :  { %2727 = vmatprep.subr.bf16.mxu0 %v6710_v3  ;;  %4268 = vmatprep.subr.bf16.mxu1 %v7240_v54 }
 0x852   :  { %2728 = vmatpush1.bf16.msra.mxu0 %v6714_v11  ;;  %4269 = vmatpush3.bf16.msra.mxu1 %v6717_v51 }
 0x853   :  { %2729 = vmatprep.subr.bf16.mxu0 %v6720_v4  ;;  %4270 = vmatprep.subr.bf16.mxu1 %v7240_v54 }
 0x856   :  { %2730 = vmatpush1.bf16.msra.mxu0 %v6724_v53  ;;  %4271 = vmatpush3.bf16.msra.mxu1 %v6727_v23 }
 0x857   :  { %2797 = vmatprep.subr.bf16.mxu0 %v6730_v8  ;;  %4276 = vmatprep.subr.bf16.mxu1 %v7240_v54 }
 0x8cc   :  { %v2502_v61 = vpop.f32.mrb[72].mxu1 }
 0x8cd   :  { %v4214_v17 = vpop.f32.mrb[73].mxu1 }
 0x8ce   :  { %v2505_v63 = vpop.f32.mrb[74].mxu1 }
 0x8cf   :  { %v4215_v26 = vpop.f32.mrb[75].mxu1  ;;  %v7401_v63 = vld [vmem:[#allocation55_spill] sm:$0xff] }
 0x8ec   :  { %v2543_v25 = vpop.f32.mrb[60].mxu0  ;;  %v2584_v41 = vpop.f32.mrb[76].mxu1 }
 0x8ed   :  { %v4425_v4 = vadd.f32 %v7317_v46, %v2543_v25  ;;  %v2545_v51 = vpop.f32.mrb[61].mxu0  ;;  %v4234_v53 = vpop.f32.mrb[77].mxu1  ;;  %v2585_v26 = vadd.f32 %v2584_v41, %v7401_v63  ;;  %v2503_v25 = vadd.f32 %v2502_v61, %v5694_v14  ;;  %v7403_v61 = vld [vmem:[#allocation47_spill] sm:$0xff] }
 0x8ee   :  { %v2547_v11 = vpop.f32.mrb[62].mxu0  ;;  %v2587_v3 = vpop.f32.mrb[78].mxu1  ;;  %v4427_v8 = vadd.f32 %v7400_v10, %v2545_v51 }
 0x8ef   :  { %v3593_v47 = vmul.f32 -1.442695, %v4425_v4  ;;  %v2548_v23 = vpop.f32.mrb[63].mxu0  ;;  %v4235_v57 = vpop.f32.mrb[79].mxu1 }
 0x8f0   :  { %v3594_v18 = vmul.f32 -1.442695, %v4427_v8  ;;  %v7402_v8 = vld [vmem:[#allocation45_spill] sm:$0xff] }
 0x8f1   :  { %4710 = vpow2.f32 %v3593_v47 }
 0x8f2   :  { %4712 = vpow2.f32 %v3594_v18 }
 0x8fb   :  { %v4711_v52 = vpop.eup %4710 }
 0x8fc   :  { %v2598_v27 = vadd.f32 1.0, %v4711_v52  ;;  %v4713_v17 = vpop.eup %4712 }
 0x8fd   :  { %v2599_v3 = vadd.f32 1.0, %v4713_v17 }
 0x8fe   :  { %4714 = vrcp.f32 %v2598_v27 }
 0x908   :  { %v4715_v49 = vpop.eup %4714 }
 0x909   :  { %v2604_v53 = vmul.f32 %v4715_v49, %v2585_v26 }
 0x90b   :  { %v2605_v11 = vadd.f32 %v2604_v53, %v2503_v25 }
 0x90c   :  { %v2647_v4 = vpop.f32.mrb[64].mxu0  ;;  %v2688_v23 = vpop.f32.mrb[80].mxu1 }
 0x90d   :  { %4716 = vtanh.f32 %v2605_v11  ;;  %v2648_v57 = vadd.f32 %v2647_v4, %v7291_v20  ;;  %v2649_v47 = vpop.f32.mrb[65].mxu0  ;;  %v4254_v51 = vpop.f32.mrb[81].mxu1 }
 0x90e   :  { %v2650_v52 = vadd.f32 %v2649_v47, %v5509_v60  ;;  %v2651_v18 = vpop.f32.mrb[66].mxu0  ;;  %v2691_v27 = vpop.f32.mrb[82].mxu1  ;;  %4718 = vrcp.f32 %v2599_v3 }
 0x90f   :  { %v2694_v41 = vadd.f32 %v2648_v57, %v7402_v8  ;;  %v2652_v63 = vpop.f32.mrb[67].mxu0  ;;  %v4255_v10 = vpop.f32.mrb[83].mxu1 }
 0x910   :  { %v2695_v49 = vadd.f32 %v2650_v52, %v7403_v61  ;;  %v2689_v63 = vadd.f32 %v2688_v23, %v5514_v0  ;;  %v7404_v52 = vld [vmem:[#allocation43_spill] sm:$0xff]  ;;  %v6756_v23 = vld [vmem:[#allocation9] ss:$12 sps:$4 sm:$0xff]  }
 0x911   :  { %v3595_v26 = vmul.f32 -1.442695, %v2694_v41 }
 0x912   :  { %v3596_v4 = vmul.f32 -1.442695, %v2695_v49 }
 0x913   :  { %4720 = vpow2.f32 %v3595_v26 }
 0x914   :  { %4722 = vpow2.f32 %v3596_v4  ;;  %v6775_v4 = vld [vmem:[#allocation9 + $0x34] ss:$12 sps:$4 sm:$0xff]  }
 0x917   :  { %v4717_v17 = vpop.eup %4716 }
 0x918   :  { %v2607_v25 = vsub.f32 %v6547_v48, %v4717_v17  ;;  %v4719_v53 = vpop.eup %4718 }
 0x91a   :  { %v2608_v11 = vmul.f32 %v4719_v53, %v2607_v25  ;;  %v6759_v25 = vld [vmem:[#allocation9 + $0x8] ss:$12 sps:$4 sm:$0xff]   ;;  %v6769_v53 = vld [vmem:[#allocation9 + $0x18] ss:$12 sps:$4 sm:$0xff]  }
 0x91c   :  { %v6743_v51 = vadd.f32 %v4717_v17, %v2608_v11  ;;  %v6772_v11 = vld [vmem:[#allocation9 + $0x20] ss:$12 sps:$4 sm:$0xff]  }
 0x91d   :  { %v4721_v47 = vpop.eup %4720 }
 0x91e   :  { %v2702_v18 = vadd.f32 1.0, %v4721_v47  ;;  %v4723_v3 = vpop.eup %4722  ;;  %v6779_v47 = vld [vmem:[#allocation9 + $0x30] ss:$12 sps:$4 sm:$0xff]  }
 0x91f   :  { %v2703_v8 = vadd.f32 1.0, %v4723_v3  ;;  %v6785_v3 = vld [vmem:[#allocation9 + $0x4c] ss:$12 sps:$4 sm:$0xff]  }
 0x920   :  { %4724 = vrcp.f32 %v2702_v18  ;;  %v6782_v18 = vld [vmem:[#allocation9 + $0x38] ss:$12 sps:$4 sm:$0xff]  }
 0x92a   :  { %v4725_v10 = vpop.eup %4724 }
 0x92b   :  { %v2708_v57 = vmul.f32 %v4725_v10, %v2689_v63  ;;  %v6789_v63 = vld [vmem:[#allocation9 + $0x48] ss:$12 sps:$4 sm:$0xff]   ;;  %v6792_v10 = vld [vmem:[#allocation9 + $0x50] ss:$12 sps:$4 sm:$0xff]  }
 0x92d   :  { %v2709_v27 = vadd.f32 %v2708_v57, %v7404_v52  ;;  %v6795_v57 = vld [vmem:[#allocation9 + $0x64] ss:$12 sps:$4 sm:$0xff]   ;;  %v6799_v52 = vld [vmem:[#allocation9 + $0x60] ss:$12 sps:$4 sm:$0xff]  }
 0x92f   :  { %4726 = vtanh.f32 %v2709_v27  ;;  %v6802_v27 = vld [vmem:[#allocation9 + $0x68] ss:$12 sps:$4 sm:$0xff]  }
 0x930   :  { %4728 = vrcp.f32 %v2703_v8  ;;  %7405 = vst [vmem:[#allocation20_spill] sm:$0xff] %v6802_v27  ;;  %v6805_v8 = vld [vmem:[#allocation9 + $0x7c] ss:$12 sps:$4 sm:$0xff]  }
 0x931   :  { %7406 = vst [vmem:[#allocation21_spill] sm:$0xff] %v6805_v8 }
 0x939   :  { %v4727_v48 = vpop.eup %4726 }
 0x93a   :  { %v2711_v41 = vsub.f32 %v6552_v24, %v4727_v48  ;;  %v4729_v61 = vpop.eup %4728  ;;  %v6762_v24 = vld [vmem:[#allocation9 + $0x1c] ss:$12 sps:$4 sm:$0xff]  }
 0x93c   :  { %v2712_v49 = vmul.f32 %v4729_v61, %v2711_v41  ;;  %v6812_v41 = vld [vmem:[#allocation9 + $0x80] ss:$12 sps:$4 sm:$0xff]  }
 0x93d   :  { %7407 = vst [vmem:[#allocation22_spill] sm:$0xff] %v6812_v41  ;;  %v6815_v61 = vld [vmem:[#allocation9 + $0x94] ss:$12 sps:$4 sm:$0xff]  }
 0x93e   :  { %v6748_v26 = vadd.f32 %v4727_v48, %v2712_v49  ;;  %v6809_v48 = vld [vmem:[#allocation9 + $0x78] ss:$12 sps:$4 sm:$0xff]   ;;  %7408 = vst [vmem:[#allocation23_spill] sm:$0xff] %v6815_v61  ;;  %v6819_v49 = vld [vmem:[#allocation9 + $0x90] ss:$12 sps:$4 sm:$0xff]  }
 0x93f   :  { %7409 = vst [vmem:[#allocation24_spill] sm:$0xff] %v6819_v49 }
 0x940   :  { %v6752_v17 = vpack.c.bf16 %v6748_v26, %v6748_v26 }
 0x942   :  { %2748 = vmatmul.mubr.bf16.vlgmr.msra.gmra.mrb[68].mxu0 %v6752_v17  ;;  %4273 = vmatmul.mubr.bf16.vlgmr.msra.gmra.mrb[84].mxu1 %v6752_v17 }
 0x943   :  { %2798 = vmatpush1.bf16.msra.mxu0 %v6756_v23  ;;  %4277 = vmatpush3.bf16.msra.mxu1 %v6759_v25 }
 0x944   :  { %2799 = vmatprep.subr.bf16.mxu0 %v6762_v24  ;;  %4278 = vmatprep.subr.bf16.mxu1 %v7240_v54 }
 0x945   :  { %2829 = vmatprep.mubr.bf16.mxu0 %v7241_v1  ;;  %4292 = vmatprep.mubr.msk.bf16.mxu1 %vm5035_vm1, %v7240_v54 }
 0x947   :  { %2800 = vmatpush1.bf16.msra.mxu0 %v6769_v53  ;;  %4279 = vmatpush3.bf16.msra.mxu1 %v6772_v11 }
 0x948   :  { %2801 = vmatprep.subr.bf16.mxu0 %v6775_v4  ;;  %4280 = vmatprep.subr.bf16.mxu1 %v7240_v54 }
 0x94b   :  { %2802 = vmatpush1.bf16.msra.mxu0 %v6779_v47  ;;  %4281 = vmatpush3.bf16.msra.mxu1 %v6782_v18 }
 0x94c   :  { %2803 = vmatprep.subr.bf16.mxu0 %v6785_v3  ;;  %4282 = vmatprep.subr.bf16.mxu1 %v7240_v54 }
 0x94f   :  { %2804 = vmatpush1.bf16.msra.mxu0 %v6789_v63  ;;  %4283 = vmatpush3.bf16.msra.mxu1 %v6792_v10 }
 0x950   :  { %2805 = vmatprep.subr.bf16.mxu0 %v6795_v57  ;;  %4284 = vmatprep.subr.bf16.mxu1 %v7240_v54 }
 0x953   :  { %2806 = vmatpush1.bf16.msra.mxu0 %v6799_v52  ;;  %4285 = vmatpush3.bf16.msra.mxu1 %v6802_v27  ;;  %v6825_v27 = vld [vmem:[#allocation9 + $0xac] ss:$12 sps:$4 sm:$0xff]  }
 0x954   :  { %2807 = vmatprep.subr.bf16.mxu0 %v6805_v8  ;;  %4286 = vmatprep.subr.bf16.mxu1 %v7240_v54  ;;  %v6822_v8 = vld [vmem:[#allocation9 + $0x98] ss:$12 sps:$4 sm:$0xff]  }
 0x957   :  { %2808 = vmatpush1.bf16.msra.mxu0 %v6809_v48  ;;  %4287 = vmatpush3.bf16.msra.mxu1 %v6812_v41  ;;  %v6829_v41 = vld [vmem:[#allocation9 + $0xa8] ss:$12 sps:$4 sm:$0xff]  }
 0x958   :  { %2809 = vmatprep.subr.bf16.mxu0 %v6815_v61  ;;  %4288 = vmatprep.subr.bf16.mxu1 %v7240_v54  ;;  %v6832_v61 = vld [vmem:[#allocation9 + $0xb0] ss:$12 sps:$4 sm:$0xff]  }
 0x95b   :  { %2810 = vmatpush1.bf16.msra.mxu0 %v6819_v49  ;;  %4289 = vmatpush3.bf16.msra.mxu1 %v6822_v8  ;;  %v2796_v49 = vpack.c.bf16 %v6743_v51, %v6743_v51 }
 0x95c   :  { %2811 = vmatprep.subr.bf16.mxu0 %v6825_v27  ;;  %4290 = vmatprep.subr.bf16.mxu1 %v7240_v54 }
 0x95f   :  { %2812 = vmatpush1.bf16.msra.mxu0 %v6829_v41  ;;  %4291 = vmatpush3.bf16.msra.mxu1 %v6832_v61 }
 0x960   :  { %2901 = vmatprep.subr.bf16.mxu0 %v6362_v28  ;;  %4296 = vmatprep.subr.bf16.mxu1 %v7240_v54  ;;  %v7410_v28 = vld [vmem:[#allocation38_spill] sm:$0xff] }
 0x962   :  { %2830 = vmatmul.mubr.bf16.vlgmr.msra.gmra.mrb[68].mxu0 %v2796_v49  ;;  %4293 = vmatmul.mubr.bf16.vlgmr.msra.gmra.mrb[88].mxu1 %v2796_v49 }
 0x963   :  { %2902 = vmatpush1.bf16.msra.mxu0 %v6369_v59  ;;  %4297 = vmatpush3.bf16.msra.mxu1 %v6375_v29  ;;  %v7411_v59 = vld [vmem:[#allocation15_spill] sm:$0xff]  ;;  %v7412_v29 = vld [vmem:[#allocation16_spill] sm:$0xff] }
 0x964   :  { %2903 = vmatprep.subr.bf16.mxu0 %v6381_v62  ;;  %4298 = vmatprep.subr.bf16.mxu1 %v7240_v54  ;;  %v7413_v62 = vld [vmem:[#allocation17_spill] sm:$0xff] }
 0x965   :  { %2933 = vmatprep.mubr.bf16.mxu0 %v7241_v1  ;;  %4312 = vmatprep.mubr.msk.bf16.mxu1 %vm5035_vm1, %v7240_v54 }
 0x967   :  { %2904 = vmatpush1.bf16.msra.mxu0 %v6391_v13  ;;  %4299 = vmatpush3.bf16.msra.mxu1 %v6397_v15  ;;  %v7414_v13 = vld [vmem:[#allocation37_spill] sm:$0xff]  ;;  %v7415_v15 = vld [vmem:[#allocation39_spill] sm:$0xff] }
 0x968   :  { %2905 = vmatprep.subr.bf16.mxu0 %v6403_v5  ;;  %4300 = vmatprep.subr.bf16.mxu1 %v7240_v54  ;;  %v7416_v5 = vld [vmem:[#allocation44_spill] sm:$0xff] }
 0x96b   :  { %2906 = vmatpush1.bf16.msra.mxu0 %v6410_v21  ;;  %4301 = vmatpush3.bf16.msra.mxu1 %v6416_v50  ;;  %v7417_v21 = vld [vmem:[#allocation32_spill] sm:$0xff]  ;;  %v7418_v50 = vld [vmem:[#allocation33_spill] sm:$0xff] }
 0x96c   :  { %2907 = vmatprep.subr.bf16.mxu0 %v6422_v6  ;;  %4302 = vmatprep.subr.bf16.mxu1 %v7240_v54  ;;  %v7419_v6 = vld [vmem:[#allocation36_spill] sm:$0xff] }
 0x96f   :  { %2908 = vmatpush1.bf16.msra.mxu0 %v6429_v55  ;;  %4303 = vmatpush3.bf16.msra.mxu1 %v7377_v22  ;;  %v7420_v55 = vld [vmem:[#allocation30_spill] sm:$0xff] }
 0x970   :  { %2909 = vmatprep.subr.bf16.mxu0 %v7378_v33  ;;  %4304 = vmatprep.subr.bf16.mxu1 %v7240_v54  ;;  %v7422_v22 = vld [vmem:[#allocation18_spill] sm:$0xff]  ;;  %v7423_v33 = vld [vmem:[#allocation19_spill] sm:$0xff] }
 0x973   :  { %2910 = vmatpush1.bf16.msra.mxu0 %v7379_v32  ;;  %4305 = vmatpush3.bf16.msra.mxu1 %v7380_v40 }
 0x974   :  { %2911 = vmatprep.subr.bf16.mxu0 %v7381_v16  ;;  %4306 = vmatprep.subr.bf16.mxu1 %v7240_v54 }
 0x977   :  { %2912 = vmatpush1.bf16.msra.mxu0 %v6467_v2  ;;  %4307 = vmatpush3.bf16.msra.mxu1 %v6624_v37  ;;  %v7421_v2 = vld [vmem:[#allocation31_spill] sm:$0xff] }
 0x978   :  { %2913 = vmatprep.subr.bf16.mxu0 %v7382_v38  ;;  %4308 = vmatprep.subr.bf16.mxu1 %v7240_v54 }
 0x97b   :  { %2914 = vmatpush1.bf16.msra.mxu0 %v7383_v44  ;;  %4309 = vmatpush3.bf16.msra.mxu1 %v6633_v35 }
 0x97c   :  { %2915 = vmatprep.subr.bf16.mxu0 %v7384_v39  ;;  %4310 = vmatprep.subr.bf16.mxu1 %v7240_v54 }
 0x97f   :  { %2916 = vmatpush1.bf16.msra.mxu0 %v7385_v36  ;;  %4311 = vmatpush3.bf16.msra.mxu1 %v6642_v34 }
 0x980   :  { %3003 = vmatprep.subr.bf16.mxu0 %v6645_v42  ;;  %4316 = vmatprep.subr.bf16.mxu1 %v7240_v54 }
 0x982   :  { %2934 = vmatmul.mubr.bf16.vlgmr.msra.gmra.mrb[72].mxu0 %v6752_v17  ;;  %4313 = vmatmul.mubr.bf16.vlgmr.msra.gmra.mrb[92].mxu1 %v6752_v17 }
 0x983   :  { %3004 = vmatpush1.bf16.msra.mxu0 %v6651_v31  ;;  %4317 = vmatpush3.bf16.msra.mxu1 %v6654_v43 }
 0x984   :  { %3005 = vmatprep.subr.bf16.mxu0 %v6657_v7  ;;  %4318 = vmatprep.subr.bf16.mxu1 %v7240_v54 }
 0x985   :  { %3035 = vmatprep.mubr.bf16.mxu0 %v7241_v1  ;;  %4332 = vmatprep.mubr.msk.bf16.mxu1 %vm5035_vm1, %v7240_v54 }
 0x987   :  { %3006 = vmatpush1.bf16.msra.mxu0 %v6664_v12  ;;  %4319 = vmatpush3.bf16.msra.mxu1 %v6667_v58  ;;  %v7424_v12 = vld [vmem:[#allocation29_spill] sm:$0xff] }
 0x988   :  { %3007 = vmatprep.subr.bf16.mxu0 %v6670_v45  ;;  %4320 = vmatprep.subr.bf16.mxu1 %v7240_v54 }
 0x98b   :  { %3008 = vmatpush1.bf16.msra.mxu0 %v6674_v30  ;;  %4321 = vmatpush3.bf16.msra.mxu1 %v6677_v56 }
 0x98c   :  { %3009 = vmatprep.subr.bf16.mxu0 %v6680_v9  ;;  %4322 = vmatprep.subr.bf16.mxu1 %v7240_v54 }
 0x98f   :  { %3010 = vmatpush1.bf16.msra.mxu0 %v6684_v19  ;;  %4323 = vmatpush3.bf16.msra.mxu1 %v7410_v28  ;;  %v7425_v19 = vld [vmem:[#allocation55_spill] sm:$0xff] }
 0x990   :  { %3011 = vmatprep.subr.bf16.mxu0 %v7411_v59  ;;  %4324 = vmatprep.subr.bf16.mxu1 %v7240_v54 }
 0x993   :  { %3012 = vmatpush1.bf16.msra.mxu0 %v7412_v29  ;;  %4325 = vmatpush3.bf16.msra.mxu1 %v7413_v62 }
 0x994   :  { %3013 = vmatprep.subr.bf16.mxu0 %v7414_v13  ;;  %4326 = vmatprep.subr.bf16.mxu1 %v7240_v54 }
 0x997   :  { %3014 = vmatpush1.bf16.msra.mxu0 %v7415_v15  ;;  %4327 = vmatpush3.bf16.msra.mxu1 %v7416_v5 }
 0x998   :  { %3015 = vmatprep.subr.bf16.mxu0 %v7417_v21  ;;  %4328 = vmatprep.subr.bf16.mxu1 %v7240_v54 }
 0x99b   :  { %3016 = vmatpush1.bf16.msra.mxu0 %v7418_v50  ;;  %4329 = vmatpush3.bf16.msra.mxu1 %v7419_v6 }
 0x99c   :  { %3017 = vmatprep.subr.bf16.mxu0 %v7420_v55  ;;  %4330 = vmatprep.subr.bf16.mxu1 %v7240_v54 }
 0x99f   :  { %3018 = vmatpush1.bf16.msra.mxu0 %v7421_v2  ;;  %4331 = vmatpush3.bf16.msra.mxu1 %v7422_v22  ;;  %v7426_v22 = vld [vmem:[#allocation49_spill] sm:$0xff] }
 0x9a0   :  { %3085 = vmatprep.subr.bf16.mxu0 %v7423_v33  ;;  %4336 = vmatprep.subr.bf16.mxu1 %v7240_v54 }
 0xa15   :  { %v2790_v32 = vpop.f32.mrb[84].mxu1 }
 0xa16   :  { %v4274_v40 = vpop.f32.mrb[85].mxu1  ;;  %v2791_v28 = vadd.f32 %v2790_v32, %v5694_v14  ;;  %v7427_v32 = vld [vmem:[#allocation50_spill] sm:$0xff] }
 0xa17   :  { %v2793_v16 = vpop.f32.mrb[86].mxu1 }
 0xa18   :  { %v4275_v37 = vpop.f32.mrb[87].mxu1 }
 0xa35   :  { %v2831_v38 = vpop.f32.mrb[68].mxu0  ;;  %v2872_v44 = vpop.f32.mrb[88].mxu1 }
 0xa36   :  { %v4429_v35 = vadd.f32 %v7317_v46, %v2831_v38  ;;  %v2833_v39 = vpop.f32.mrb[69].mxu0  ;;  %v4294_v36 = vpop.f32.mrb[89].mxu1  ;;  %v2873_v17 = vadd.f32 %v2872_v44, %v7425_v19 }
 0xa37   :  { %v2835_v34 = vpop.f32.mrb[70].mxu0  ;;  %v2875_v42 = vpop.f32.mrb[90].mxu1  ;;  %v4431_v58 = vadd.f32 %v7424_v12, %v2833_v39 }
 0xa38   :  { %v3597_v31 = vmul.f32 -1.442695, %v4429_v35  ;;  %v2836_v43 = vpop.f32.mrb[71].mxu0  ;;  %v4295_v7 = vpop.f32.mrb[91].mxu1 }
 0xa39   :  { %v3598_v45 = vmul.f32 -1.442695, %v4431_v58 }
 0xa3a   :  { %4730 = vpow2.f32 %v3597_v31 }
 0xa3b   :  { %4732 = vpow2.f32 %v3598_v45  ;;  %v7428_v45 = vld [vmem:[#allocation46_spill] sm:$0xff] }
 0xa44   :  { %v4731_v30 = vpop.eup %4730 }
 0xa45   :  { %v2886_v56 = vadd.f32 1.0, %v4731_v30  ;;  %v4733_v9 = vpop.eup %4732 }
 0xa46   :  { %v2887_v62 = vadd.f32 1.0, %v4733_v9 }
 0xa47   :  { %4734 = vrcp.f32 %v2886_v56 }
 0xa51   :  { %v4735_v49 = vpop.eup %4734 }
 0xa52   :  { %v2892_v59 = vmul.f32 %v4735_v49, %v2873_v17 }
 0xa54   :  { %v2893_v29 = vadd.f32 %v2892_v59, %v2791_v28 }
 0xa55   :  { %v2935_v13 = vpop.f32.mrb[72].mxu0  ;;  %v2976_v15 = vpop.f32.mrb[92].mxu1 }
 0xa56   :  { %4736 = vtanh.f32 %v2893_v29  ;;  %v2936_v5 = vadd.f32 %v2935_v13, %v7291_v20  ;;  %v2937_v21 = vpop.f32.mrb[73].mxu0  ;;  %v4314_v50 = vpop.f32.mrb[93].mxu1  ;;  %v2977_v43 = vadd.f32 %v2976_v15, %v5514_v0  ;;  %v7429_v0 = vld [vmem:[#allocation20_spill] sm:$0xff]  ;;  %v4595_v29 = vld [vmem:[%s7059_s10 + $0x28] sm:$0xff]  }
 0xa57   :  { %v2938_v6 = vadd.f32 %v2937_v21, %v5509_v60  ;;  %v2939_v55 = vpop.f32.mrb[74].mxu0  ;;  %v2979_v2 = vpop.f32.mrb[94].mxu1  ;;  %4738 = vrcp.f32 %v2887_v62  ;;  %v4596_v62 = vld [vmem:[%s7059_s10 + $0x30] sm:$0xff]   ;;  %v4597_v13 = vld [vmem:[%s7059_s10 + $0x38] sm:$0xff]  }
 0xa58   :  { %v2982_v33 = vadd.f32 %v2936_v5, %v7426_v22  ;;  %v2940_v40 = vpop.f32.mrb[75].mxu0  ;;  %v4315_v16 = vpop.f32.mrb[95].mxu1 }
 0xa59   :  { %v2983_v37 = vadd.f32 %v2938_v6, %v7427_v32 }
 0xa5a   :  { %v3599_v38 = vmul.f32 -1.442695, %v2982_v33 }
 0xa5b   :  { %v3600_v36 = vmul.f32 -1.442695, %v2983_v37 }
 0xa5c   :  { %4740 = vpow2.f32 %v3599_v38 }
 0xa5d   :  { %4742 = vpow2.f32 %v3600_v36 }
 0xa60   :  { %v4737_v44 = vpop.eup %4736 }
 0xa61   :  { %v2895_v35 = vsub.f32 %v6743_v51, %v4737_v44  ;;  %v4739_v39 = vpop.eup %4738 }
 0xa63   :  { %v2896_v20 = vmul.f32 %v4739_v39, %v2895_v35 }
 0xa65   :  { %v6920_v34 = vadd.f32 %v4737_v44, %v2896_v20 }
 0xa66   :  { %v4741_v60 = vpop.eup %4740 }
 0xa67   :  { %v2990_v42 = vadd.f32 1.0, %v4741_v60  ;;  %v4743_v31 = vpop.eup %4742 }
 0xa68   :  { %v2991_v56 = vadd.f32 1.0, %v4743_v31 }
 0xa69   :  { %4744 = vrcp.f32 %v2990_v42 }
 0xa73   :  { %v4745_v7 = vpop.eup %4744 }
 0xa74   :  { %v2996_v58 = vmul.f32 %v4745_v7, %v2977_v43 }
 0xa76   :  { %v2997_v30 = vadd.f32 %v2996_v58, %v7428_v45 }
 0xa78   :  { %4746 = vtanh.f32 %v2997_v30 }
 0xa79   :  { %4748 = vrcp.f32 %v2991_v56 }
 0xa82   :  { %v4747_v51 = vpop.eup %4746 }
 0xa83   :  { %v2999_v9 = vsub.f32 %v6748_v26, %v4747_v51  ;;  %v4749_v17 = vpop.eup %4748  ;;  %v7431_v26 = vld [vmem:[#allocation22_spill] sm:$0xff] }
 0xa85   :  { %v3000_v49 = vmul.f32 %v4749_v17, %v2999_v9 }
 0xa87   :  { %v3001_v28 = vadd.f32 %v4747_v51, %v3000_v49 }
 0xa89   :  { %v3002_v59 = vpack.c.bf16 %v3001_v28, %v3001_v28  ;;  %4750 = vtanh.f32 %v3001_v28 }
 0xa8b   :  { %3036 = vmatmul.mubr.bf16.vlgmr.msra.gmra.mrb[76].mxu0 %v3002_v59  ;;  %4333 = vmatmul.mubr.bf16.vlgmr.msra.gmra.mrb[96].mxu1 %v3002_v59 }
 0xa8c   :  { %3086 = vmatpush1.bf16.msra.mxu0 %v6756_v23  ;;  %4337 = vmatpush3.bf16.msra.mxu1 %v6759_v25  ;;  %v7432_v23 = vld [vmem:[#allocation23_spill] sm:$0xff]  ;;  %v7433_v25 = vld [vmem:[#allocation24_spill] sm:$0xff] }
 0xa8d   :  { %3087 = vmatprep.subr.bf16.mxu0 %v6762_v24  ;;  %4338 = vmatprep.subr.bf16.mxu1 %v7240_v54  ;;  %v4582_v24 = vld [vmem:[%s7058_s9] sm:$0xff]  }
 0xa8e   :  { %3117 = vmatprep.mubr.bf16.mxu0 %v7241_v1  ;;  %4352 = vmatprep.mubr.msk.bf16.mxu1 %vm5035_vm1, %v7240_v54  ;;  %v7430_v1 = vld [vmem:[#allocation21_spill] sm:$0xff] }
 0xa90   :  { %3088 = vmatpush1.bf16.msra.mxu0 %v6769_v53  ;;  %4339 = vmatpush3.bf16.msra.mxu1 %v6772_v11  ;;  %v3084_v53 = vpack.c.bf16 %v6920_v34, %v6920_v34  ;;  %v4583_v11 = vld [vmem:[%s7058_s9 + $0x8] sm:$0xff]  }
 0xa91   :  { %3089 = vmatprep.subr.bf16.mxu0 %v6775_v4  ;;  %4340 = vmatprep.subr.bf16.mxu1 %v7240_v54  ;;  %v4584_v4 = vld [vmem:[%s7058_s9 + $0x10] sm:$0xff]  }
 0xa94   :  { %3090 = vmatpush1.bf16.msra.mxu0 %v6779_v47  ;;  %4341 = vmatpush3.bf16.msra.mxu1 %v6782_v18  ;;  %v4585_v47 = vld [vmem:[%s7058_s9 + $0x18] sm:$0xff]   ;;  %v4586_v18 = vld [vmem:[%s7058_s9 + $0x20] sm:$0xff]  }
 0xa95   :  { %3091 = vmatprep.subr.bf16.mxu0 %v6785_v3  ;;  %4342 = vmatprep.subr.bf16.mxu1 %v7240_v54  ;;  %v4587_v3 = vld [vmem:[%s7058_s9 + $0x28] sm:$0xff]  }
 0xa98   :  { %3092 = vmatpush1.bf16.msra.mxu0 %v6789_v63  ;;  %4343 = vmatpush3.bf16.msra.mxu1 %v6792_v10  ;;  %v4588_v63 = vld [vmem:[%s7058_s9 + $0x30] sm:$0xff]   ;;  %v4589_v10 = vld [vmem:[%s7058_s9 + $0x38] sm:$0xff]  }
 0xa99   :  { %3093 = vmatprep.subr.bf16.mxu0 %v6795_v57  ;;  %4344 = vmatprep.subr.bf16.mxu1 %v7240_v54  ;;  %v4751_v57 = vpop.eup %4750 }
 0xa9c   :  { %3094 = vmatpush1.bf16.msra.mxu0 %v6799_v52  ;;  %4345 = vmatpush3.bf16.msra.mxu1 %v7429_v0  ;;  %v3187_v52 = vpack.c.bf16 %v4751_v57, %v4751_v57  ;;  %v3619_v0 = vld [vmem:[%s7060_s11] ss:$0 sm:$0xff] }
 0xa9d   :  { %3095 = vmatprep.subr.bf16.mxu0 %v7430_v1  ;;  %4346 = vmatprep.subr.bf16.mxu1 %v7240_v54 }
 0xaa0   :  { %3096 = vmatpush1.bf16.msra.mxu0 %v6809_v48  ;;  %4347 = vmatpush3.bf16.msra.mxu1 %v7431_v26  ;;  %v4592_v48 = vld [vmem:[%s7059_s10 + $0x10] sm:$0xff]  }
 0xaa1   :  { %3097 = vmatprep.subr.bf16.mxu0 %v7432_v23  ;;  %4348 = vmatprep.subr.bf16.mxu1 %v7240_v54 }
 0xaa4   :  { %3098 = vmatpush1.bf16.msra.mxu0 %v7433_v25  ;;  %4349 = vmatpush3.bf16.msra.mxu1 %v6822_v8  ;;  %v4591_v8 = vld [vmem:[%s7059_s10 + $0x8] sm:$0xff]  }
 0xaa5   :  { %3099 = vmatprep.subr.bf16.mxu0 %v6825_v27  ;;  %4350 = vmatprep.subr.bf16.mxu1 %v7240_v54  ;;  %v4590_v27 = vld [vmem:[%s7059_s10] sm:$0xff]  }
 0xaa8   :  { %3100 = vmatpush1.bf16.msra.mxu0 %v6829_v41  ;;  %4351 = vmatpush3.bf16.msra.mxu1 %v6832_v61  ;;  %v4593_v41 = vld [vmem:[%s7059_s10 + $0x18] sm:$0xff]   ;;  %v4594_v61 = vld [vmem:[%s7059_s10 + $0x20] sm:$0xff]  }
 0xaa9   :  { %4376 = vmatprep.subr.bf16.mxu1 %v7240_v54  ;;  %4356 = vmatprep.subr.bf16.mxu0 %v7240_v54 }
 0xaab   :  { %3118 = vmatmul.mubr.bf16.vlgmr.msra.gmra.mrb[76].mxu0 %v3084_v53  ;;  %4353 = vmatmul.mubr.bf16.vlgmr.msra.gmra.mrb[100].mxu1 %v3084_v53 }
 0xaac   :  { %4377 = vmatpush3.bf16.msra.mxu1 %v4582_v24  ;;  %4392 = vmatprep.mubr.msk.bf16.mxu1 %vm5035_vm1, %v7240_v54 }
 0xaad   :  { %4378 = vmatprep.subr.bf16.mxu1 %v7240_v54  ;;  %4372 = vmatprep.mubr.msk.bf16.mxu0 %vm5035_vm1, %v7240_v54 }
 0xaae   :  { %4357 = vmatpush3.bf16.msra.mxu0 %v4590_v27 }
 0xaaf   :  { %4358 = vmatprep.subr.bf16.mxu0 %v7240_v54 }
 0xab0   :  { %4379 = vmatpush3.bf16.msra.mxu1 %v4583_v11 }
 0xab1   :  { %4380 = vmatprep.subr.bf16.mxu1 %v7240_v54 }
 0xab2   :  { %4359 = vmatpush3.bf16.msra.mxu0 %v4591_v8 }
 0xab3   :  { %4360 = vmatprep.subr.bf16.mxu0 %v7240_v54 }
 0xab4   :  { %4381 = vmatpush3.bf16.msra.mxu1 %v4584_v4 }
 0xab5   :  { %4382 = vmatprep.subr.bf16.mxu1 %v7240_v54 }
 0xab6   :  { %4361 = vmatpush3.bf16.msra.mxu0 %v4592_v48 }
 0xab7   :  { %4362 = vmatprep.subr.bf16.mxu0 %v7240_v54 }
 0xab8   :  { %4383 = vmatpush3.bf16.msra.mxu1 %v4585_v47 }
 0xab9   :  { %4384 = vmatprep.subr.bf16.mxu1 %v7240_v54 }
 0xaba   :  { %4363 = vmatpush3.bf16.msra.mxu0 %v4593_v41 }
 0xabb   :  { %4364 = vmatprep.subr.bf16.mxu0 %v7240_v54 }
 0xabc   :  { %4385 = vmatpush3.bf16.msra.mxu1 %v4586_v18 }
 0xabd   :  { %4386 = vmatprep.subr.bf16.mxu1 %v7240_v54 }
 0xabe   :  { %4365 = vmatpush3.bf16.msra.mxu0 %v4594_v61 }
 0xabf   :  { %4366 = vmatprep.subr.bf16.mxu0 %v7240_v54 }
 0xac0   :  { %4387 = vmatpush3.bf16.msra.mxu1 %v4587_v3 }
 0xac1   :  { %4388 = vmatprep.subr.bf16.mxu1 %v7240_v54 }
 0xac2   :  { %4367 = vmatpush3.bf16.msra.mxu0 %v4595_v29 }
 0xac3   :  { %4368 = vmatprep.subr.bf16.mxu0 %v7240_v54 }
 0xac4   :  { %4389 = vmatpush3.bf16.msra.mxu1 %v4588_v63 }
 0xac5   :  { %4390 = vmatprep.subr.bf16.mxu1 %v7240_v54 }
 0xac6   :  { %4369 = vmatpush3.bf16.msra.mxu0 %v4596_v62 }
 0xac7   :  { %4370 = vmatprep.subr.bf16.mxu0 %v7240_v54 }
 0xac8   :  { %4391 = vmatpush3.bf16.msra.mxu1 %v4589_v10 }
 0xaca   :  { %4371 = vmatpush3.bf16.msra.mxu0 %v4597_v13 }
 0xacb   :  { %4393 = vmatmul.mubr.bf16.vlgmr.msra.gmra.mrb[104].mxu1 %v3187_v52  ;;  %4396 = vmatprep.subr.bf16.mxu0 %v7240_v54 }
 0xb5e   :  { %v3078_v15 = vpop.f32.mrb[96].mxu1 }
 0xb5f   :  { %v4334_v5 = vpop.f32.mrb[97].mxu1 }
 0xb60   :  { %v3081_v21 = vpop.f32.mrb[98].mxu1 }
 0xb61   :  { %v4335_v50 = vpop.f32.mrb[99].mxu1 }
 0xb7e   :  { %v3119_v6 = vpop.f32.mrb[76].mxu0  ;;  %v3160_v55 = vpop.f32.mrb[100].mxu1 }
 0xb7f   :  { %v4433_v2 = vadd.f32 %v7317_v46, %v3119_v6  ;;  %v3121_v22 = vpop.f32.mrb[77].mxu0  ;;  %v4354_v33 = vpop.f32.mrb[101].mxu1  ;;  %v3161_v60 = vadd.f32 %v3160_v55, %v7425_v19  ;;  %v3079_v46 = vadd.f32 %v3078_v15, %v5694_v14  ;;  %v4598_v14 = vld [vmem:[%s7061_s12] sm:$0xff]  }
 0xb80   :  { %v3123_v40 = vpop.f32.mrb[78].mxu0  ;;  %v3163_v16 = vpop.f32.mrb[102].mxu1  ;;  %v4435_v44 = vadd.f32 %v7424_v12, %v3121_v22 }
 0xb81   :  { %v3601_v32 = vmul.f32 -1.442695, %v4433_v2  ;;  %v3124_v37 = vpop.f32.mrb[79].mxu0  ;;  %v4355_v38 = vpop.f32.mrb[103].mxu1 }
 0xb82   :  { %v3602_v35 = vmul.f32 -1.442695, %v4435_v44 }
 0xb83   :  { %4752 = vpow2.f32 %v3601_v32 }
 0xb84   :  { %4754 = vpow2.f32 %v3602_v35 }
 0xb8d   :  { %v4753_v39 = vpop.eup %4752 }
 0xb8e   :  { %v3174_v20 = vadd.f32 1.0, %v4753_v39  ;;  %v4755_v36 = vpop.eup %4754 }
 0xb8f   :  { %v3175_v7 = vadd.f32 1.0, %v4755_v36 }
 0xb90   :  { %4756 = vrcp.f32 %v3174_v20 }
 0xb9a   :  { %v4757_v42 = vpop.eup %4756 }
 0xb9b   :  { %v3180_v31 = vmul.f32 %v4757_v42, %v3161_v60 }
 0xb9d   :  { %v3181_v43 = vadd.f32 %v3180_v31, %v3079_v46 }
 0xb9e   :  { %v3392_v58 = vpop.f32.mrb[104].mxu1 }
 0xb9f   :  { %4758 = vtanh.f32 %v3181_v43  ;;  %v4394_v45 = vpop.f32.mrb[105].mxu1 }
 0xba0   :  { %v3395_v30 = vpop.f32.mrb[106].mxu1  ;;  %4760 = vrcp.f32 %v3175_v7 }
 0xba1   :  { %v4395_v12 = vpop.f32.mrb[107].mxu1 }
 0xba9   :  { %v4759_v56 = vpop.eup %4758 }
 0xbaa   :  { %v3183_v51 = vsub.f32 %v6920_v34, %v4759_v56  ;;  %v4761_v9 = vpop.eup %4760  ;;  %v4599_v34 = vld [vmem:[%s7061_s12 + $0x8] sm:$0xff]  }
 0xbac   :  { %v3184_v17 = vmul.f32 %v4761_v9, %v3183_v51 }
 0xbae   :  { %v3185_v49 = vadd.f32 %v4759_v56, %v3184_v17 }
 0xbb0   :  { %4762 = vtanh.f32 %v3185_v49 }
 0xbba   :  { %v4763_v19 = vpop.eup %4762 }
 0xbbb   :  { %v3189_v28 = vpack.c.bf16 %v4763_v19, %v4763_v19 }
 0xbbd   :  { %4373 = vmatmul.mubr.bf16.vlgmr.msra.gmra.mrb[80].mxu0 %v3189_v28 }
 0xbbe   :  { %4400 = vmatprep.mubr.msk.bf16.mxu0 %vm5035_vm1, %v7240_v54  ;;  %4397 = vmatpush3.bf16.msra.mxu0 %v4598_v14 }
 0xbbf   :  { %4398 = vmatprep.subr.bf16.mxu0 %v7240_v54  ;;  %v3620_v54 = vld [vmem:[#allocation3] ss:$0 sm:$0xff] }
 0xbc2   :  { %4399 = vmatpush3.bf16.msra.mxu0 %v4599_v34 }
 0xc90   :  { %v3304_v59 = vpop.f32.mrb[80].mxu0 }
 0xc91   :  { %v3393_v1 = vadd.f32 %v3392_v58, %v3304_v59  ;;  %v4374_v26 = vpop.f32.mrb[81].mxu0 }
 0xc92   :  { %v3307_v23 = vpop.f32.mrb[82].mxu0 }
 0xc93   :  { %v3405_v25 = vadd.f32 %v3619_v0, %v3393_v1  ;;  %v4375_v24 = vpop.f32.mrb[83].mxu0 }
 0xc95   :  { %4764 = vtanh.f32 %v3405_v25 }
 0xc9f   :  { %v4765_v53 = vpop.eup %4764 }
 0xca0   :  { %v3407_v11 = vpack.c.bf16 %v4765_v53, %v4765_v53 }
 0xca2   :  { %4401 = vmatmul.mubr.msk.bf16.vlgmr.msra.gmra.mrb[84].mxu0 %vm3431_vm2, %v3407_v11 }
 0xd75   :  { %v3469_v4 = vpop.f32.mrb[84].mxu0 }
 0xd76   :  { %v3470_v47 = vadd.f32 %v3620_v54, %v3469_v4  ;;  %v4402_v18 = vpop.f32.mrb[85].mxu0 }
 0xd77   :  { %v3472_v3 = vpop.f32.mrb[86].mxu0 }
 0xd78   :  { %3476 = vst.msk [vmem:[%s7063_s14] sm:$0xff] %vm3475_vm3, %v3470_v47  ;;  %v4403_v63 = vpop.f32.mrb[87].mxu0 }
 0xd79   :  { %3481 = vsyncpa [#allocation5], 1 }
 0xd7a   :  { %3482 = vsyncpa [#allocation7], 1 }
 0xd7b   :  { %3483 = vsyncpa [#allocation10], 1 }

</bundles_post_ra>
